<compile_context>
chip_gen: v7x
topology: tpu7x:2x2x1
jax: 0.10.0
libtpu: 0.0.40
codegen_flags: <defaults>
</compile_context>

<pallas_src>
import jax
import jax.numpy as jnp
from jax.experimental import pallas as pl
from jax.experimental.pallas import tpu as pltpu

D_MODEL = 768       # nn.LSTM(input_size=768, ...)
HIDDEN = 64         # hidden_size=64
NUM_LABELS = 4      # num_labels
SEQ = 8             # sequence length
BATCH = 2           # batch size


# ---------------------------------------------------------------------------
# Pallas kernel: 2-layer bidirectional LSTM + mean pool over time + Linear head
# ---------------------------------------------------------------------------
def bilstm_head_kernel(xcat_ref, w0_ref, b0_ref, whh0_ref,
                       w1_ref, b1_ref, whh1_ref, wfc_ref, bfc_ref,
                       out_ref):
    H = HIDDEN
    H2 = 2 * H
    B, _ = out_ref.shape
    SB = xcat_ref.shape[0]
    S = SB // B

    # Hoist recurrent weights out of the unrolled time loops.
    whh0 = whh0_ref[...]            # (2H, 8H) block-diagonal fwd/rev
    whh1 = whh1_ref[...]

    # ---- layer-0 input projection: both directions, all time steps, one bf16 matmul ----
    # Row s*B+b of xcat = [x[b, s, :] | x[b, S-1-s, :]]; gate columns [i | f | o | g],
    # each 2H wide as [fwd | rev].
    xg0 = jnp.dot(xcat_ref[...], w0_ref[...],
                  preferred_element_type=jnp.float32) + b0_ref[...]      # (S*B, 8H) f32

    def lstm_step(pre, h, c, whh):
        # pre / h / c: (B, 2H) carrying [fwd | rev]; whh: (2H, 8H) block-diagonal.
        g = pre + jnp.dot(h, whh, preferred_element_type=jnp.float32)    # (B, 8H)
        sig = jax.nn.sigmoid(g[:, :3 * H2])     # [i | f | o] — three aligned 128-lane blocks
        g_t = jnp.tanh(g[:, 3 * H2:])           # g block
        i_g = sig[:, :H2]
        f_g = sig[:, H2:2 * H2]
        o_g = sig[:, 2 * H2:3 * H2]
        c = f_g * c + i_g * g_t
        h = o_g * jnp.tanh(c)
        return h, c

    # ---- layer-0 recurrence: fwd & rev chains advance together (SIMD across lanes) ----
    h = jnp.zeros((B, H2), jnp.float32)
    c = jnp.zeros((B, H2), jnp.float32)
    steps0 = []
    for s in range(S):                                    # unrolled; h/c live in vregs
        h, c = lstm_step(xg0[s * B:(s + 1) * B, :], h, c, whh0)
        steps0.append(h)                                  # [h_f(time s) | h_r(time S-1-s)]

    # Reassemble the layer-0 bidirectional output per *time* index, in registers.
    fwd_stack = jnp.concatenate(steps0, axis=0)           # block t: [h_f(t)     | h_r(S-1-t)]
    rev_stack = jnp.concatenate(steps0[::-1], axis=0)     # block t: [h_f(S-1-t) | h_r(t)]
    col = jax.lax.broadcasted_iota(jnp.int32, (SB, H2), 1)
    l0_fwd = jnp.where(col < H, fwd_stack, rev_stack)     # l0(t)     = [h_f(t)     | h_r(t)]
    l0_rev = jnp.where(col < H, rev_stack, fwd_stack)     # l0(S-1-t) = [h_f(S-1-t) | h_r(S-1-t)]

    # ---- layer-1 input projection: both directions in one matmul ----
    l0_cat = jnp.concatenate([l0_fwd, l0_rev], axis=1)    # (S*B, 4H)
    xg1 = jnp.dot(l0_cat, w1_ref[...],
                  preferred_element_type=jnp.float32) + b1_ref[...]      # (S*B, 8H)

    # ---- layer-1 recurrence + mean pooling over time ----
    h = jnp.zeros((B, H2), jnp.float32)
    c = jnp.zeros((B, H2), jnp.float32)
    acc = jnp.zeros((B, H2), jnp.float32)
    for s in range(S):
        h, c = lstm_step(xg1[s * B:(s + 1) * B, :], h, c, whh1)
        acc = acc + h                                     # order-independent sum over time

    pooled = acc * (1.0 / jnp.float32(S))                 # mean(dim=1); dropout = identity (eval)
    out_ref[...] = jnp.dot(pooled, wfc_ref[...],
                           preferred_element_type=jnp.float32) + bfc_ref[...]


# ---------------------------------------------------------------------------
# Weight packing for the fused kernel layout
# ---------------------------------------------------------------------------
def _pack_layer(w_ih_f, w_ih_r, w_hh_f, w_hh_r, b_f, b_r, H):
    """Pack one bidirectional LSTM layer.

    Combined gate-column layout: 4 blocks [i, f, o, g], each 2H wide = [fwd | rev].
      w_in : (2*Din, 8H) — applied to rows [x(t) | x(S-1-t)]
      w_hh : (2H, 8H)    — block-diagonal, applied to state [h_f | h_r]
      b    : (1, 8H)     — fused b_ih + b_hh
    """
    din = w_ih_f.shape[0]
    order = (0, 1, 3, 2)                       # per-direction gate order i, f, g, o -> [i f o g]
    zf = jnp.zeros((din, H), w_ih_f.dtype)
    zh = jnp.zeros((H, H), w_hh_f.dtype)
    w_in_cols, w_hh_cols, b_cols = [], [], []
    for k in order:
        sl = slice(k * H, (k + 1) * H)
        w_in_cols.append(jnp.concatenate([w_ih_f[:, sl], zf], axis=0))   # fwd gates <- x(t)
        w_in_cols.append(jnp.concatenate([zf, w_ih_r[:, sl]], axis=0))   # rev gates <- x(S-1-t)
        w_hh_cols.append(jnp.concatenate([w_hh_f[:, sl], zh], axis=0))   # fwd gates <- h_f
        w_hh_cols.append(jnp.concatenate([zh, w_hh_r[:, sl]], axis=0))   # rev gates <- h_r
        b_cols.append(b_f[:, sl])
        b_cols.append(b_r[:, sl])
    return (jnp.concatenate(w_in_cols, axis=1),
            jnp.concatenate(w_hh_cols, axis=1),
            jnp.concatenate(b_cols, axis=1))


# ---------------------------------------------------------------------------
# Wrapper
# ---------------------------------------------------------------------------
@jax.jit
def transformer_bilstm_forward(sequence_output, params):
    """sequence_output: [B, S, 768] f32 (BERT last_hidden_state). Returns logits [B, num_labels]."""
    B, S, D = sequence_output.shape
    H = params["w_hh0f"].shape[0]
    L = params["w_fc"].shape[1]

    # Layout prep in plain XLA (cheap, one-time): time-major rows [x(t) | x(S-1-t)] in bf16.
    x_t = jnp.transpose(sequence_output, (1, 0, 2))              # (S, B, D)
    xcat = jnp.concatenate([x_t, x_t[::-1]], axis=-1)            # (S, B, 2D)
    xcat = xcat.reshape(S * B, 2 * D).astype(jnp.bfloat16)

    w0, whh0, b0 = _pack_layer(params["w_ih0f"], params["w_ih0r"],
                               params["w_hh0f"], params["w_hh0r"],
                               params["b0f"], params["b0r"], H)
    w1, whh1, b1 = _pack_layer(params["w_ih1f"], params["w_ih1r"],
                               params["w_hh1f"], params["w_hh1r"],
                               params["b1f"], params["b1r"], H)
    w0 = w0.astype(jnp.bfloat16)       # layer-0 projection runs in bf16 on the MXU (f32 accum)

    args = (xcat, w0, b0, whh0, w1, b1, whh1, params["w_fc"], params["b_fc"])
    in_specs = [pl.BlockSpec(a.shape, lambda i, nd=a.ndim: (0,) * nd) for a in args]

    out = pl.pallas_call(
        bilstm_head_kernel,
        out_shape=jax.ShapeDtypeStruct((B, L), jnp.float32),
        grid_spec=pltpu.PrefetchScalarGridSpec(
            num_scalar_prefetch=0,
            grid=(1,),                 # single invocation: whole batch handled in-kernel
            in_specs=in_specs,
            out_specs=pl.BlockSpec((B, L), lambda i: (0, 0)),
        ),
        compiler_params=pltpu.CompilerParams(
            dimension_semantics=("arbitrary",)),
    )(*args)
    return out


# ---------------------------------------------------------------------------
# Deterministic synthetic parameter init (shapes from nn.LSTM / nn.Linear)
# ---------------------------------------------------------------------------
def init_params(key, hidden=HIDDEN, num_labels=NUM_LABELS):
    H4 = 4 * hidden
    ks = jax.random.split(key, 16)

    def w(k, shape, scale=0.05):
        return (scale * jax.random.normal(k, shape)).astype(jnp.float32)

    return {
        # layer 0 (input 768), gate order i, f, g, o; stored transposed as [in, 4H]
        "w_ih0f": w(ks[0], (D_MODEL, H4)), "w_hh0f": w(ks[1], (hidden, H4)),
        "b0f": w(ks[2], (1, H4)),          # b_ih + b_hh fused
        "w_ih0r": w(ks[3], (D_MODEL, H4)), "w_hh0r": w(ks[4], (hidden, H4)),
        "b0r": w(ks[5], (1, H4)),
        # layer 1 (input 2H = 128)
        "w_ih1f": w(ks[6], (2 * hidden, H4)), "w_hh1f": w(ks[7], (hidden, H4)),
        "b1f": w(ks[8], (1, H4)),
        "w_ih1r": w(ks[9], (2 * hidden, H4)), "w_hh1r": w(ks[10], (hidden, H4)),
        "b1r": w(ks[11], (1, H4)),
        # fc: Linear(2H -> num_labels), stored transposed as [2H, L]
        "w_fc": w(ks[12], (2 * hidden, num_labels)),
        "b_fc": w(ks[13], (1, num_labels)),
    }


# ---------------------------------------------------------------------------
# Pure-JAX reference (eval mode), used only for a correctness check
# ---------------------------------------------------------------------------
def reference_forward(x, p):
    H = HIDDEN

    def run_dir(xs, w_ih, w_hh, b, reverse):
        S = xs.shape[0]
        h = jnp.zeros((H,), jnp.float32)
        c = jnp.zeros((H,), jnp.float32)
        outs = [None] * S
        order = range(S - 1, -1, -1) if reverse else range(S)
        for t in order:
            gates = xs[t] @ w_ih + h @ w_hh + b[0]
            i = jax.nn.sigmoid(gates[0:H])
            f = jax.nn.sigmoid(gates[H:2 * H])
            g = jnp.tanh(gates[2 * H:3 * H])
            o = jax.nn.sigmoid(gates[3 * H:4 * H])
            c = f * c + i * g
            h = o * jnp.tanh(c)
            outs[t] = h
        return jnp.stack(outs)

    def one(xb):
        l0 = jnp.concatenate(
            [run_dir(xb, p["w_ih0f"], p["w_hh0f"], p["b0f"], False),
             run_dir(xb, p["w_ih0r"], p["w_hh0r"], p["b0r"], True)], axis=-1)
        l1 = jnp.concatenate(
            [run_dir(l0, p["w_ih1f"], p["w_hh1f"], p["b1f"], False),
             run_dir(l0, p["w_ih1r"], p["w_hh1r"], p["b1r"], True)], axis=-1)
        pooled = l1.mean(axis=0)
        return pooled @ p["w_fc"] + p["b_fc"][0]

    return jnp.stack([one(x[b]) for b in range(x.shape[0])])


if __name__ == "__main__":
    key = jax.random.PRNGKey(0)
    k_seq, k_par = jax.random.split(key)

    # Synthetic BERT last_hidden_state: [B, S, 768]
    sequence_output = jax.random.normal(k_seq, (BATCH, SEQ, D_MODEL), dtype=jnp.float32)
    params = init_params(k_par)

    logits = transformer_bilstm_forward(sequence_output, params)
    logits = jax.block_until_ready(logits)

    ref = reference_forward(sequence_output, params)
    assert logits.shape == (BATCH, NUM_LABELS), logits.shape
    assert jnp.allclose(logits, ref, atol=5e-3, rtol=5e-3), (logits, ref)

    print("KERNEL_OK")
</pallas_src>

<mosaic_0001>
module attributes {stable_mosaic.version = 11 : i64} {
  func.func @bilstm_head_kernel(%arg0: i32, %arg1: memref<16x1536xbf16, #tpu.memory_space<vmem>>, %arg2: memref<1536x512xbf16, #tpu.memory_space<vmem>>, %arg3: memref<1x512xf32, #tpu.memory_space<vmem>>, %arg4: memref<128x512xf32, #tpu.memory_space<vmem>>, %arg5: memref<256x512xf32, #tpu.memory_space<vmem>>, %arg6: memref<1x512xf32, #tpu.memory_space<vmem>>, %arg7: memref<128x512xf32, #tpu.memory_space<vmem>>, %arg8: memref<128x4xf32, #tpu.memory_space<vmem>>, %arg9: memref<1x4xf32, #tpu.memory_space<vmem>>, %arg10: memref<2x4xf32, #tpu.memory_space<vmem>>) attributes {dimension_semantics = [#tpu.dimension_semantics<arbitrary>], iteration_bounds = array<i64: 1>, scalar_prefetch = 0 : i64, scratch_operands = 0 : i64, tpu.core_type = #tpu.core_type<tc>, window_params = [{pipeline_mode = #tpu.pipeline_mode<synchronous>, transform_indices = @transform_0, window_bounds = array<i64: 16, 1536>}, {pipeline_mode = #tpu.pipeline_mode<synchronous>, transform_indices = @transform_1, window_bounds = array<i64: 1536, 512>}, {pipeline_mode = #tpu.pipeline_mode<synchronous>, transform_indices = @transform_2, window_bounds = array<i64: 1, 512>}, {pipeline_mode = #tpu.pipeline_mode<synchronous>, transform_indices = @transform_3, window_bounds = array<i64: 128, 512>}, {pipeline_mode = #tpu.pipeline_mode<synchronous>, transform_indices = @transform_4, window_bounds = array<i64: 256, 512>}, {pipeline_mode = #tpu.pipeline_mode<synchronous>, transform_indices = @transform_5, window_bounds = array<i64: 1, 512>}, {pipeline_mode = #tpu.pipeline_mode<synchronous>, transform_indices = @transform_6, window_bounds = array<i64: 128, 512>}, {pipeline_mode = #tpu.pipeline_mode<synchronous>, transform_indices = @transform_7, window_bounds = array<i64: 128, 4>}, {pipeline_mode = #tpu.pipeline_mode<synchronous>, transform_indices = @transform_8, window_bounds = array<i64: 1, 4>}, {pipeline_mode = #tpu.pipeline_mode<synchronous>, transform_indices = @transform_9, window_bounds = array<i64: 2, 4>}]} {
    %c0 = arith.constant 0 : index
    %c0_0 = arith.constant 0 : index
    %0 = vector.load %arg4[%c0, %c0_0] : memref<128x512xf32, #tpu.memory_space<vmem>>, vector<128x512xf32>
    %c0_1 = arith.constant 0 : index
    %c0_2 = arith.constant 0 : index
    %1 = vector.load %arg7[%c0_1, %c0_2] : memref<128x512xf32, #tpu.memory_space<vmem>>, vector<128x512xf32>
    %c0_3 = arith.constant 0 : index
    %c0_4 = arith.constant 0 : index
    %2 = vector.load %arg1[%c0_3, %c0_4] : memref<16x1536xbf16, #tpu.memory_space<vmem>>, vector<16x1536xbf16>
    %c0_5 = arith.constant 0 : index
    %c0_6 = arith.constant 0 : index
    %3 = vector.load %arg2[%c0_5, %c0_6] : memref<1536x512xbf16, #tpu.memory_space<vmem>>, vector<1536x512xbf16>
    %cst = arith.constant dense<0.000000e+00> : vector<16x512xf32>
    %4 = tpu.matmul %2, %3, %cst {dimension_numbers = #tpu.dot_dimension_numbers<[1], [0], [0], [1], [0, 0, 1, 1], [], []>} : vector<16x1536xbf16>, vector<1536x512xbf16>, vector<16x512xf32> -> vector<16x512xf32>
    %c0_7 = arith.constant 0 : index
    %c0_8 = arith.constant 0 : index
    %5 = vector.load %arg3[%c0_7, %c0_8] : memref<1x512xf32, #tpu.memory_space<vmem>>, vector<1x512xf32>
    %6 = vector.broadcast %5 : vector<1x512xf32> to vector<16x512xf32>
    %7 = arith.addf %4, %6 : vector<16x512xf32>
    %cst_9 = arith.constant 0.000000e+00 : f32
    %8 = vector.broadcast %cst_9 : f32 to vector<2x128xf32>
    %cst_10 = arith.constant 0.000000e+00 : f32
    %9 = vector.broadcast %cst_10 : f32 to vector<2x128xf32>
    %10 = vector.extract_strided_slice %7 {offsets = [0, 0], sizes = [2, 512], strides = [1, 1]} : vector<16x512xf32> to vector<2x512xf32>
    %cst_11 = arith.constant dense<0.000000e+00> : vector<2x512xf32>
    %11 = tpu.matmul %8, %0, %cst_11 {dimension_numbers = #tpu.dot_dimension_numbers<[1], [0], [0], [1], [0, 0, 1, 1], [], []>} : vector<2x128xf32>, vector<128x512xf32>, vector<2x512xf32> -> vector<2x512xf32>
    %12 = arith.addf %10, %11 : vector<2x512xf32>
    %13 = vector.extract_strided_slice %12 {offsets = [0, 0], sizes = [2, 384], strides = [1, 1]} : vector<2x512xf32> to vector<2x384xf32>
    %14 = arith.negf %13 : vector<2x384xf32>
    %15 = math.exp %14 : vector<2x384xf32>
    %cst_12 = arith.constant 1.000000e+00 : f32
    %16 = vector.broadcast %cst_12 : f32 to vector<2x384xf32>
    %17 = arith.addf %16, %15 : vector<2x384xf32>
    %18 = arith.divf %16, %17 : vector<2x384xf32>
    %19 = vector.extract_strided_slice %12 {offsets = [0, 384], sizes = [2, 128], strides = [1, 1]} : vector<2x512xf32> to vector<2x128xf32>
    %20 = math.tanh %19 : vector<2x128xf32>
    %21 = vector.extract_strided_slice %18 {offsets = [0, 0], sizes = [2, 128], strides = [1, 1]} : vector<2x384xf32> to vector<2x128xf32>
    %22 = vector.extract_strided_slice %18 {offsets = [0, 128], sizes = [2, 128], strides = [1, 1]} : vector<2x384xf32> to vector<2x128xf32>
    %23 = vector.extract_strided_slice %18 {offsets = [0, 256], sizes = [2, 128], strides = [1, 1]} : vector<2x384xf32> to vector<2x128xf32>
    %24 = arith.mulf %22, %9 : vector<2x128xf32>
    %25 = arith.mulf %21, %20 : vector<2x128xf32>
    %26 = arith.addf %24, %25 : vector<2x128xf32>
    %27 = math.tanh %26 : vector<2x128xf32>
    %28 = arith.mulf %23, %27 : vector<2x128xf32>
    %29 = vector.extract_strided_slice %7 {offsets = [2, 0], sizes = [2, 512], strides = [1, 1]} : vector<16x512xf32> to vector<2x512xf32>
    %cst_13 = arith.constant dense<0.000000e+00> : vector<2x512xf32>
    %30 = tpu.matmul %28, %0, %cst_13 {dimension_numbers = #tpu.dot_dimension_numbers<[1], [0], [0], [1], [0, 0, 1, 1], [], []>} : vector<2x128xf32>, vector<128x512xf32>, vector<2x512xf32> -> vector<2x512xf32>
    %31 = arith.addf %29, %30 : vector<2x512xf32>
    %32 = vector.extract_strided_slice %31 {offsets = [0, 0], sizes = [2, 384], strides = [1, 1]} : vector<2x512xf32> to vector<2x384xf32>
    %33 = arith.negf %32 : vector<2x384xf32>
    %34 = math.exp %33 : vector<2x384xf32>
    %cst_14 = arith.constant 1.000000e+00 : f32
    %35 = vector.broadcast %cst_14 : f32 to vector<2x384xf32>
    %36 = arith.addf %35, %34 : vector<2x384xf32>
    %37 = arith.divf %35, %36 : vector<2x384xf32>
    %38 = vector.extract_strided_slice %31 {offsets = [0, 384], sizes = [2, 128], strides = [1, 1]} : vector<2x512xf32> to vector<2x128xf32>
    %39 = math.tanh %38 : vector<2x128xf32>
    %40 = vector.extract_strided_slice %37 {offsets = [0, 0], sizes = [2, 128], strides = [1, 1]} : vector<2x384xf32> to vector<2x128xf32>
    %41 = vector.extract_strided_slice %37 {offsets = [0, 128], sizes = [2, 128], strides = [1, 1]} : vector<2x384xf32> to vector<2x128xf32>
    %42 = vector.extract_strided_slice %37 {offsets = [0, 256], sizes = [2, 128], strides = [1, 1]} : vector<2x384xf32> to vector<2x128xf32>
    %43 = arith.mulf %41, %26 : vector<2x128xf32>
    %44 = arith.mulf %40, %39 : vector<2x128xf32>
    %45 = arith.addf %43, %44 : vector<2x128xf32>
    %46 = math.tanh %45 : vector<2x128xf32>
    %47 = arith.mulf %42, %46 : vector<2x128xf32>
    %48 = vector.extract_strided_slice %7 {offsets = [4, 0], sizes = [2, 512], strides = [1, 1]} : vector<16x512xf32> to vector<2x512xf32>
    %cst_15 = arith.constant dense<0.000000e+00> : vector<2x512xf32>
    %49 = tpu.matmul %47, %0, %cst_15 {dimension_numbers = #tpu.dot_dimension_numbers<[1], [0], [0], [1], [0, 0, 1, 1], [], []>} : vector<2x128xf32>, vector<128x512xf32>, vector<2x512xf32> -> vector<2x512xf32>
    %50 = arith.addf %48, %49 : vector<2x512xf32>
    %51 = vector.extract_strided_slice %50 {offsets = [0, 0], sizes = [2, 384], strides = [1, 1]} : vector<2x512xf32> to vector<2x384xf32>
    %52 = arith.negf %51 : vector<2x384xf32>
    %53 = math.exp %52 : vector<2x384xf32>
    %cst_16 = arith.constant 1.000000e+00 : f32
    %54 = vector.broadcast %cst_16 : f32 to vector<2x384xf32>
    %55 = arith.addf %54, %53 : vector<2x384xf32>
    %56 = arith.divf %54, %55 : vector<2x384xf32>
    %57 = vector.extract_strided_slice %50 {offsets = [0, 384], sizes = [2, 128], strides = [1, 1]} : vector<2x512xf32> to vector<2x128xf32>
    %58 = math.tanh %57 : vector<2x128xf32>
    %59 = vector.extract_strided_slice %56 {offsets = [0, 0], sizes = [2, 128], strides = [1, 1]} : vector<2x384xf32> to vector<2x128xf32>
    %60 = vector.extract_strided_slice %56 {offsets = [0, 128], sizes = [2, 128], strides = [1, 1]} : vector<2x384xf32> to vector<2x128xf32>
    %61 = vector.extract_strided_slice %56 {offsets = [0, 256], sizes = [2, 128], strides = [1, 1]} : vector<2x384xf32> to vector<2x128xf32>
    %62 = arith.mulf %60, %45 : vector<2x128xf32>
    %63 = arith.mulf %59, %58 : vector<2x128xf32>
    %64 = arith.addf %62, %63 : vector<2x128xf32>
    %65 = math.tanh %64 : vector<2x128xf32>
    %66 = arith.mulf %61, %65 : vector<2x128xf32>
    %67 = vector.extract_strided_slice %7 {offsets = [6, 0], sizes = [2, 512], strides = [1, 1]} : vector<16x512xf32> to vector<2x512xf32>
    %cst_17 = arith.constant dense<0.000000e+00> : vector<2x512xf32>
    %68 = tpu.matmul %66, %0, %cst_17 {dimension_numbers = #tpu.dot_dimension_numbers<[1], [0], [0], [1], [0, 0, 1, 1], [], []>} : vector<2x128xf32>, vector<128x512xf32>, vector<2x512xf32> -> vector<2x512xf32>
    %69 = arith.addf %67, %68 : vector<2x512xf32>
    %70 = vector.extract_strided_slice %69 {offsets = [0, 0], sizes = [2, 384], strides = [1, 1]} : vector<2x512xf32> to vector<2x384xf32>
    %71 = arith.negf %70 : vector<2x384xf32>
    %72 = math.exp %71 : vector<2x384xf32>
    %cst_18 = arith.constant 1.000000e+00 : f32
    %73 = vector.broadcast %cst_18 : f32 to vector<2x384xf32>
    %74 = arith.addf %73, %72 : vector<2x384xf32>
    %75 = arith.divf %73, %74 : vector<2x384xf32>
    %76 = vector.extract_strided_slice %69 {offsets = [0, 384], sizes = [2, 128], strides = [1, 1]} : vector<2x512xf32> to vector<2x128xf32>
    %77 = math.tanh %76 : vector<2x128xf32>
    %78 = vector.extract_strided_slice %75 {offsets = [0, 0], sizes = [2, 128], strides = [1, 1]} : vector<2x384xf32> to vector<2x128xf32>
    %79 = vector.extract_strided_slice %75 {offsets = [0, 128], sizes = [2, 128], strides = [1, 1]} : vector<2x384xf32> to vector<2x128xf32>
    %80 = vector.extract_strided_slice %75 {offsets = [0, 256], sizes = [2, 128], strides = [1, 1]} : vector<2x384xf32> to vector<2x128xf32>
    %81 = arith.mulf %79, %64 : vector<2x128xf32>
    %82 = arith.mulf %78, %77 : vector<2x128xf32>
    %83 = arith.addf %81, %82 : vector<2x128xf32>
    %84 = math.tanh %83 : vector<2x128xf32>
    %85 = arith.mulf %80, %84 : vector<2x128xf32>
    %86 = vector.extract_strided_slice %7 {offsets = [8, 0], sizes = [2, 512], strides = [1, 1]} : vector<16x512xf32> to vector<2x512xf32>
    %cst_19 = arith.constant dense<0.000000e+00> : vector<2x512xf32>
    %87 = tpu.matmul %85, %0, %cst_19 {dimension_numbers = #tpu.dot_dimension_numbers<[1], [0], [0], [1], [0, 0, 1, 1], [], []>} : vector<2x128xf32>, vector<128x512xf32>, vector<2x512xf32> -> vector<2x512xf32>
    %88 = arith.addf %86, %87 : vector<2x512xf32>
    %89 = vector.extract_strided_slice %88 {offsets = [0, 0], sizes = [2, 384], strides = [1, 1]} : vector<2x512xf32> to vector<2x384xf32>
    %90 = arith.negf %89 : vector<2x384xf32>
    %91 = math.exp %90 : vector<2x384xf32>
    %cst_20 = arith.constant 1.000000e+00 : f32
    %92 = vector.broadcast %cst_20 : f32 to vector<2x384xf32>
    %93 = arith.addf %92, %91 : vector<2x384xf32>
    %94 = arith.divf %92, %93 : vector<2x384xf32>
    %95 = vector.extract_strided_slice %88 {offsets = [0, 384], sizes = [2, 128], strides = [1, 1]} : vector<2x512xf32> to vector<2x128xf32>
    %96 = math.tanh %95 : vector<2x128xf32>
    %97 = vector.extract_strided_slice %94 {offsets = [0, 0], sizes = [2, 128], strides = [1, 1]} : vector<2x384xf32> to vector<2x128xf32>
    %98 = vector.extract_strided_slice %94 {offsets = [0, 128], sizes = [2, 128], strides = [1, 1]} : vector<2x384xf32> to vector<2x128xf32>
    %99 = vector.extract_strided_slice %94 {offsets = [0, 256], sizes = [2, 128], strides = [1, 1]} : vector<2x384xf32> to vector<2x128xf32>
    %100 = arith.mulf %98, %83 : vector<2x128xf32>
    %101 = arith.mulf %97, %96 : vector<2x128xf32>
    %102 = arith.addf %100, %101 : vector<2x128xf32>
    %103 = math.tanh %102 : vector<2x128xf32>
    %104 = arith.mulf %99, %103 : vector<2x128xf32>
    %105 = vector.extract_strided_slice %7 {offsets = [10, 0], sizes = [2, 512], strides = [1, 1]} : vector<16x512xf32> to vector<2x512xf32>
    %cst_21 = arith.constant dense<0.000000e+00> : vector<2x512xf32>
    %106 = tpu.matmul %104, %0, %cst_21 {dimension_numbers = #tpu.dot_dimension_numbers<[1], [0], [0], [1], [0, 0, 1, 1], [], []>} : vector<2x128xf32>, vector<128x512xf32>, vector<2x512xf32> -> vector<2x512xf32>
    %107 = arith.addf %105, %106 : vector<2x512xf32>
    %108 = vector.extract_strided_slice %107 {offsets = [0, 0], sizes = [2, 384], strides = [1, 1]} : vector<2x512xf32> to vector<2x384xf32>
    %109 = arith.negf %108 : vector<2x384xf32>
    %110 = math.exp %109 : vector<2x384xf32>
    %cst_22 = arith.constant 1.000000e+00 : f32
    %111 = vector.broadcast %cst_22 : f32 to vector<2x384xf32>
    %112 = arith.addf %111, %110 : vector<2x384xf32>
    %113 = arith.divf %111, %112 : vector<2x384xf32>
    %114 = vector.extract_strided_slice %107 {offsets = [0, 384], sizes = [2, 128], strides = [1, 1]} : vector<2x512xf32> to vector<2x128xf32>
    %115 = math.tanh %114 : vector<2x128xf32>
    %116 = vector.extract_strided_slice %113 {offsets = [0, 0], sizes = [2, 128], strides = [1, 1]} : vector<2x384xf32> to vector<2x128xf32>
    %117 = vector.extract_strided_slice %113 {offsets = [0, 128], sizes = [2, 128], strides = [1, 1]} : vector<2x384xf32> to vector<2x128xf32>
    %118 = vector.extract_strided_slice %113 {offsets = [0, 256], sizes = [2, 128], strides = [1, 1]} : vector<2x384xf32> to vector<2x128xf32>
    %119 = arith.mulf %117, %102 : vector<2x128xf32>
    %120 = arith.mulf %116, %115 : vector<2x128xf32>
    %121 = arith.addf %119, %120 : vector<2x128xf32>
    %122 = math.tanh %121 : vector<2x128xf32>
    %123 = arith.mulf %118, %122 : vector<2x128xf32>
    %124 = vector.extract_strided_slice %7 {offsets = [12, 0], sizes = [2, 512], strides = [1, 1]} : vector<16x512xf32> to vector<2x512xf32>
    %cst_23 = arith.constant dense<0.000000e+00> : vector<2x512xf32>
    %125 = tpu.matmul %123, %0, %cst_23 {dimension_numbers = #tpu.dot_dimension_numbers<[1], [0], [0], [1], [0, 0, 1, 1], [], []>} : vector<2x128xf32>, vector<128x512xf32>, vector<2x512xf32> -> vector<2x512xf32>
    %126 = arith.addf %124, %125 : vector<2x512xf32>
    %127 = vector.extract_strided_slice %126 {offsets = [0, 0], sizes = [2, 384], strides = [1, 1]} : vector<2x512xf32> to vector<2x384xf32>
    %128 = arith.negf %127 : vector<2x384xf32>
    %129 = math.exp %128 : vector<2x384xf32>
    %cst_24 = arith.constant 1.000000e+00 : f32
    %130 = vector.broadcast %cst_24 : f32 to vector<2x384xf32>
    %131 = arith.addf %130, %129 : vector<2x384xf32>
    %132 = arith.divf %130, %131 : vector<2x384xf32>
    %133 = vector.extract_strided_slice %126 {offsets = [0, 384], sizes = [2, 128], strides = [1, 1]} : vector<2x512xf32> to vector<2x128xf32>
    %134 = math.tanh %133 : vector<2x128xf32>
    %135 = vector.extract_strided_slice %132 {offsets = [0, 0], sizes = [2, 128], strides = [1, 1]} : vector<2x384xf32> to vector<2x128xf32>
    %136 = vector.extract_strided_slice %132 {offsets = [0, 128], sizes = [2, 128], strides = [1, 1]} : vector<2x384xf32> to vector<2x128xf32>
    %137 = vector.extract_strided_slice %132 {offsets = [0, 256], sizes = [2, 128], strides = [1, 1]} : vector<2x384xf32> to vector<2x128xf32>
    %138 = arith.mulf %136, %121 : vector<2x128xf32>
    %139 = arith.mulf %135, %134 : vector<2x128xf32>
    %140 = arith.addf %138, %139 : vector<2x128xf32>
    %141 = math.tanh %140 : vector<2x128xf32>
    %142 = arith.mulf %137, %141 : vector<2x128xf32>
    %143 = vector.extract_strided_slice %7 {offsets = [14, 0], sizes = [2, 512], strides = [1, 1]} : vector<16x512xf32> to vector<2x512xf32>
    %cst_25 = arith.constant dense<0.000000e+00> : vector<2x512xf32>
    %144 = tpu.matmul %142, %0, %cst_25 {dimension_numbers = #tpu.dot_dimension_numbers<[1], [0], [0], [1], [0, 0, 1, 1], [], []>} : vector<2x128xf32>, vector<128x512xf32>, vector<2x512xf32> -> vector<2x512xf32>
    %145 = arith.addf %143, %144 : vector<2x512xf32>
    %146 = vector.extract_strided_slice %145 {offsets = [0, 0], sizes = [2, 384], strides = [1, 1]} : vector<2x512xf32> to vector<2x384xf32>
    %147 = arith.negf %146 : vector<2x384xf32>
    %148 = math.exp %147 : vector<2x384xf32>
    %cst_26 = arith.constant 1.000000e+00 : f32
    %149 = vector.broadcast %cst_26 : f32 to vector<2x384xf32>
    %150 = arith.addf %149, %148 : vector<2x384xf32>
    %151 = arith.divf %149, %150 : vector<2x384xf32>
    %152 = vector.extract_strided_slice %145 {offsets = [0, 384], sizes = [2, 128], strides = [1, 1]} : vector<2x512xf32> to vector<2x128xf32>
    %153 = math.tanh %152 : vector<2x128xf32>
    %154 = vector.extract_strided_slice %151 {offsets = [0, 0], sizes = [2, 128], strides = [1, 1]} : vector<2x384xf32> to vector<2x128xf32>
    %155 = vector.extract_strided_slice %151 {offsets = [0, 128], sizes = [2, 128], strides = [1, 1]} : vector<2x384xf32> to vector<2x128xf32>
    %156 = vector.extract_strided_slice %151 {offsets = [0, 256], sizes = [2, 128], strides = [1, 1]} : vector<2x384xf32> to vector<2x128xf32>
    %157 = arith.mulf %155, %140 : vector<2x128xf32>
    %158 = arith.mulf %154, %153 : vector<2x128xf32>
    %159 = arith.addf %157, %158 : vector<2x128xf32>
    %160 = math.tanh %159 : vector<2x128xf32>
    %161 = arith.mulf %156, %160 : vector<2x128xf32>
    %162 = tpu.concatenate %28, %47, %66, %85, %104, %123, %142, %161 in 0 : vector<2x128xf32>, vector<2x128xf32>, vector<2x128xf32>, vector<2x128xf32>, vector<2x128xf32>, vector<2x128xf32>, vector<2x128xf32>, vector<2x128xf32> -> vector<16x128xf32>
    %163 = tpu.concatenate %161, %142, %123, %104, %85, %66, %47, %28 in 0 : vector<2x128xf32>, vector<2x128xf32>, vector<2x128xf32>, vector<2x128xf32>, vector<2x128xf32>, vector<2x128xf32>, vector<2x128xf32>, vector<2x128xf32> -> vector<16x128xf32>
    %164 = tpu.iota {dimensions = array<i32: 1>} : vector<16x128xi32>
    %c64_i32 = arith.constant 64 : i32
    %165 = vector.broadcast %c64_i32 : i32 to vector<16x128xi32>
    %166 = arith.cmpi slt, %164, %165 : vector<16x128xi32>
    %167 = arith.select %166, %162, %163 : vector<16x128xi1>, vector<16x128xf32>
    %c64_i32_27 = arith.constant 64 : i32
    %168 = vector.broadcast %c64_i32_27 : i32 to vector<16x128xi32>
    %169 = arith.cmpi slt, %164, %168 : vector<16x128xi32>
    %170 = arith.select %169, %163, %162 : vector<16x128xi1>, vector<16x128xf32>
    %171 = tpu.concatenate %167, %170 in 1 : vector<16x128xf32>, vector<16x128xf32> -> vector<16x256xf32>
    %c0_28 = arith.constant 0 : index
    %c0_29 = arith.constant 0 : index
    %172 = vector.load %arg5[%c0_28, %c0_29] : memref<256x512xf32, #tpu.memory_space<vmem>>, vector<256x512xf32>
    %cst_30 = arith.constant dense<0.000000e+00> : vector<16x512xf32>
    %173 = tpu.matmul %171, %172, %cst_30 {dimension_numbers = #tpu.dot_dimension_numbers<[1], [0], [0], [1], [0, 0, 1, 1], [], []>} : vector<16x256xf32>, vector<256x512xf32>, vector<16x512xf32> -> vector<16x512xf32>
    %c0_31 = arith.constant 0 : index
    %c0_32 = arith.constant 0 : index
    %174 = vector.load %arg6[%c0_31, %c0_32] : memref<1x512xf32, #tpu.memory_space<vmem>>, vector<1x512xf32>
    %175 = vector.broadcast %174 : vector<1x512xf32> to vector<16x512xf32>
    %176 = arith.addf %173, %175 : vector<16x512xf32>
    %cst_33 = arith.constant 0.000000e+00 : f32
    %177 = vector.broadcast %cst_33 : f32 to vector<2x128xf32>
    %cst_34 = arith.constant 0.000000e+00 : f32
    %178 = vector.broadcast %cst_34 : f32 to vector<2x128xf32>
    %cst_35 = arith.constant 0.000000e+00 : f32
    %179 = vector.broadcast %cst_35 : f32 to vector<2x128xf32>
    %180 = vector.extract_strided_slice %176 {offsets = [0, 0], sizes = [2, 512], strides = [1, 1]} : vector<16x512xf32> to vector<2x512xf32>
    %cst_36 = arith.constant dense<0.000000e+00> : vector<2x512xf32>
    %181 = tpu.matmul %177, %1, %cst_36 {dimension_numbers = #tpu.dot_dimension_numbers<[1], [0], [0], [1], [0, 0, 1, 1], [], []>} : vector<2x128xf32>, vector<128x512xf32>, vector<2x512xf32> -> vector<2x512xf32>
    %182 = arith.addf %180, %181 : vector<2x512xf32>
    %183 = vector.extract_strided_slice %182 {offsets = [0, 0], sizes = [2, 384], strides = [1, 1]} : vector<2x512xf32> to vector<2x384xf32>
    %184 = arith.negf %183 : vector<2x384xf32>
    %185 = math.exp %184 : vector<2x384xf32>
    %cst_37 = arith.constant 1.000000e+00 : f32
    %186 = vector.broadcast %cst_37 : f32 to vector<2x384xf32>
    %187 = arith.addf %186, %185 : vector<2x384xf32>
    %188 = arith.divf %186, %187 : vector<2x384xf32>
    %189 = vector.extract_strided_slice %182 {offsets = [0, 384], sizes = [2, 128], strides = [1, 1]} : vector<2x512xf32> to vector<2x128xf32>
    %190 = math.tanh %189 : vector<2x128xf32>
    %191 = vector.extract_strided_slice %188 {offsets = [0, 0], sizes = [2, 128], strides = [1, 1]} : vector<2x384xf32> to vector<2x128xf32>
    %192 = vector.extract_strided_slice %188 {offsets = [0, 128], sizes = [2, 128], strides = [1, 1]} : vector<2x384xf32> to vector<2x128xf32>
    %193 = vector.extract_strided_slice %188 {offsets = [0, 256], sizes = [2, 128], strides = [1, 1]} : vector<2x384xf32> to vector<2x128xf32>
    %194 = arith.mulf %192, %178 : vector<2x128xf32>
    %195 = arith.mulf %191, %190 : vector<2x128xf32>
    %196 = arith.addf %194, %195 : vector<2x128xf32>
    %197 = math.tanh %196 : vector<2x128xf32>
    %198 = arith.mulf %193, %197 : vector<2x128xf32>
    %199 = arith.addf %179, %198 : vector<2x128xf32>
    %200 = vector.extract_strided_slice %176 {offsets = [2, 0], sizes = [2, 512], strides = [1, 1]} : vector<16x512xf32> to vector<2x512xf32>
    %cst_38 = arith.constant dense<0.000000e+00> : vector<2x512xf32>
    %201 = tpu.matmul %198, %1, %cst_38 {dimension_numbers = #tpu.dot_dimension_numbers<[1], [0], [0], [1], [0, 0, 1, 1], [], []>} : vector<2x128xf32>, vector<128x512xf32>, vector<2x512xf32> -> vector<2x512xf32>
    %202 = arith.addf %200, %201 : vector<2x512xf32>
    %203 = vector.extract_strided_slice %202 {offsets = [0, 0], sizes = [2, 384], strides = [1, 1]} : vector<2x512xf32> to vector<2x384xf32>
    %204 = arith.negf %203 : vector<2x384xf32>
    %205 = math.exp %204 : vector<2x384xf32>
    %cst_39 = arith.constant 1.000000e+00 : f32
    %206 = vector.broadcast %cst_39 : f32 to vector<2x384xf32>
    %207 = arith.addf %206, %205 : vector<2x384xf32>
    %208 = arith.divf %206, %207 : vector<2x384xf32>
    %209 = vector.extract_strided_slice %202 {offsets = [0, 384], sizes = [2, 128], strides = [1, 1]} : vector<2x512xf32> to vector<2x128xf32>
    %210 = math.tanh %209 : vector<2x128xf32>
    %211 = vector.extract_strided_slice %208 {offsets = [0, 0], sizes = [2, 128], strides = [1, 1]} : vector<2x384xf32> to vector<2x128xf32>
    %212 = vector.extract_strided_slice %208 {offsets = [0, 128], sizes = [2, 128], strides = [1, 1]} : vector<2x384xf32> to vector<2x128xf32>
    %213 = vector.extract_strided_slice %208 {offsets = [0, 256], sizes = [2, 128], strides = [1, 1]} : vector<2x384xf32> to vector<2x128xf32>
    %214 = arith.mulf %212, %196 : vector<2x128xf32>
    %215 = arith.mulf %211, %210 : vector<2x128xf32>
    %216 = arith.addf %214, %215 : vector<2x128xf32>
    %217 = math.tanh %216 : vector<2x128xf32>
    %218 = arith.mulf %213, %217 : vector<2x128xf32>
    %219 = arith.addf %199, %218 : vector<2x128xf32>
    %220 = vector.extract_strided_slice %176 {offsets = [4, 0], sizes = [2, 512], strides = [1, 1]} : vector<16x512xf32> to vector<2x512xf32>
    %cst_40 = arith.constant dense<0.000000e+00> : vector<2x512xf32>
    %221 = tpu.matmul %218, %1, %cst_40 {dimension_numbers = #tpu.dot_dimension_numbers<[1], [0], [0], [1], [0, 0, 1, 1], [], []>} : vector<2x128xf32>, vector<128x512xf32>, vector<2x512xf32> -> vector<2x512xf32>
    %222 = arith.addf %220, %221 : vector<2x512xf32>
    %223 = vector.extract_strided_slice %222 {offsets = [0, 0], sizes = [2, 384], strides = [1, 1]} : vector<2x512xf32> to vector<2x384xf32>
    %224 = arith.negf %223 : vector<2x384xf32>
    %225 = math.exp %224 : vector<2x384xf32>
    %cst_41 = arith.constant 1.000000e+00 : f32
    %226 = vector.broadcast %cst_41 : f32 to vector<2x384xf32>
    %227 = arith.addf %226, %225 : vector<2x384xf32>
    %228 = arith.divf %226, %227 : vector<2x384xf32>
    %229 = vector.extract_strided_slice %222 {offsets = [0, 384], sizes = [2, 128], strides = [1, 1]} : vector<2x512xf32> to vector<2x128xf32>
    %230 = math.tanh %229 : vector<2x128xf32>
    %231 = vector.extract_strided_slice %228 {offsets = [0, 0], sizes = [2, 128], strides = [1, 1]} : vector<2x384xf32> to vector<2x128xf32>
    %232 = vector.extract_strided_slice %228 {offsets = [0, 128], sizes = [2, 128], strides = [1, 1]} : vector<2x384xf32> to vector<2x128xf32>
    %233 = vector.extract_strided_slice %228 {offsets = [0, 256], sizes = [2, 128], strides = [1, 1]} : vector<2x384xf32> to vector<2x128xf32>
    %234 = arith.mulf %232, %216 : vector<2x128xf32>
    %235 = arith.mulf %231, %230 : vector<2x128xf32>
    %236 = arith.addf %234, %235 : vector<2x128xf32>
    %237 = math.tanh %236 : vector<2x128xf32>
    %238 = arith.mulf %233, %237 : vector<2x128xf32>
    %239 = arith.addf %219, %238 : vector<2x128xf32>
    %240 = vector.extract_strided_slice %176 {offsets = [6, 0], sizes = [2, 512], strides = [1, 1]} : vector<16x512xf32> to vector<2x512xf32>
    %cst_42 = arith.constant dense<0.000000e+00> : vector<2x512xf32>
    %241 = tpu.matmul %238, %1, %cst_42 {dimension_numbers = #tpu.dot_dimension_numbers<[1], [0], [0], [1], [0, 0, 1, 1], [], []>} : vector<2x128xf32>, vector<128x512xf32>, vector<2x512xf32> -> vector<2x512xf32>
    %242 = arith.addf %240, %241 : vector<2x512xf32>
    %243 = vector.extract_strided_slice %242 {offsets = [0, 0], sizes = [2, 384], strides = [1, 1]} : vector<2x512xf32> to vector<2x384xf32>
    %244 = arith.negf %243 : vector<2x384xf32>
    %245 = math.exp %244 : vector<2x384xf32>
    %cst_43 = arith.constant 1.000000e+00 : f32
    %246 = vector.broadcast %cst_43 : f32 to vector<2x384xf32>
    %247 = arith.addf %246, %245 : vector<2x384xf32>
    %248 = arith.divf %246, %247 : vector<2x384xf32>
    %249 = vector.extract_strided_slice %242 {offsets = [0, 384], sizes = [2, 128], strides = [1, 1]} : vector<2x512xf32> to vector<2x128xf32>
    %250 = math.tanh %249 : vector<2x128xf32>
    %251 = vector.extract_strided_slice %248 {offsets = [0, 0], sizes = [2, 128], strides = [1, 1]} : vector<2x384xf32> to vector<2x128xf32>
    %252 = vector.extract_strided_slice %248 {offsets = [0, 128], sizes = [2, 128], strides = [1, 1]} : vector<2x384xf32> to vector<2x128xf32>
    %253 = vector.extract_strided_slice %248 {offsets = [0, 256], sizes = [2, 128], strides = [1, 1]} : vector<2x384xf32> to vector<2x128xf32>
    %254 = arith.mulf %252, %236 : vector<2x128xf32>
    %255 = arith.mulf %251, %250 : vector<2x128xf32>
    %256 = arith.addf %254, %255 : vector<2x128xf32>
    %257 = math.tanh %256 : vector<2x128xf32>
    %258 = arith.mulf %253, %257 : vector<2x128xf32>
    %259 = arith.addf %239, %258 : vector<2x128xf32>
    %260 = vector.extract_strided_slice %176 {offsets = [8, 0], sizes = [2, 512], strides = [1, 1]} : vector<16x512xf32> to vector<2x512xf32>
    %cst_44 = arith.constant dense<0.000000e+00> : vector<2x512xf32>
    %261 = tpu.matmul %258, %1, %cst_44 {dimension_numbers = #tpu.dot_dimension_numbers<[1], [0], [0], [1], [0, 0, 1, 1], [], []>} : vector<2x128xf32>, vector<128x512xf32>, vector<2x512xf32> -> vector<2x512xf32>
    %262 = arith.addf %260, %261 : vector<2x512xf32>
    %263 = vector.extract_strided_slice %262 {offsets = [0, 0], sizes = [2, 384], strides = [1, 1]} : vector<2x512xf32> to vector<2x384xf32>
    %264 = arith.negf %263 : vector<2x384xf32>
    %265 = math.exp %264 : vector<2x384xf32>
    %cst_45 = arith.constant 1.000000e+00 : f32
    %266 = vector.broadcast %cst_45 : f32 to vector<2x384xf32>
    %267 = arith.addf %266, %265 : vector<2x384xf32>
    %268 = arith.divf %266, %267 : vector<2x384xf32>
    %269 = vector.extract_strided_slice %262 {offsets = [0, 384], sizes = [2, 128], strides = [1, 1]} : vector<2x512xf32> to vector<2x128xf32>
    %270 = math.tanh %269 : vector<2x128xf32>
    %271 = vector.extract_strided_slice %268 {offsets = [0, 0], sizes = [2, 128], strides = [1, 1]} : vector<2x384xf32> to vector<2x128xf32>
    %272 = vector.extract_strided_slice %268 {offsets = [0, 128], sizes = [2, 128], strides = [1, 1]} : vector<2x384xf32> to vector<2x128xf32>
    %273 = vector.extract_strided_slice %268 {offsets = [0, 256], sizes = [2, 128], strides = [1, 1]} : vector<2x384xf32> to vector<2x128xf32>
    %274 = arith.mulf %272, %256 : vector<2x128xf32>
    %275 = arith.mulf %271, %270 : vector<2x128xf32>
    %276 = arith.addf %274, %275 : vector<2x128xf32>
    %277 = math.tanh %276 : vector<2x128xf32>
    %278 = arith.mulf %273, %277 : vector<2x128xf32>
    %279 = arith.addf %259, %278 : vector<2x128xf32>
    %280 = vector.extract_strided_slice %176 {offsets = [10, 0], sizes = [2, 512], strides = [1, 1]} : vector<16x512xf32> to vector<2x512xf32>
    %cst_46 = arith.constant dense<0.000000e+00> : vector<2x512xf32>
    %281 = tpu.matmul %278, %1, %cst_46 {dimension_numbers = #tpu.dot_dimension_numbers<[1], [0], [0], [1], [0, 0, 1, 1], [], []>} : vector<2x128xf32>, vector<128x512xf32>, vector<2x512xf32> -> vector<2x512xf32>
    %282 = arith.addf %280, %281 : vector<2x512xf32>
    %283 = vector.extract_strided_slice %282 {offsets = [0, 0], sizes = [2, 384], strides = [1, 1]} : vector<2x512xf32> to vector<2x384xf32>
    %284 = arith.negf %283 : vector<2x384xf32>
    %285 = math.exp %284 : vector<2x384xf32>
    %cst_47 = arith.constant 1.000000e+00 : f32
    %286 = vector.broadcast %cst_47 : f32 to vector<2x384xf32>
    %287 = arith.addf %286, %285 : vector<2x384xf32>
    %288 = arith.divf %286, %287 : vector<2x384xf32>
    %289 = vector.extract_strided_slice %282 {offsets = [0, 384], sizes = [2, 128], strides = [1, 1]} : vector<2x512xf32> to vector<2x128xf32>
    %290 = math.tanh %289 : vector<2x128xf32>
    %291 = vector.extract_strided_slice %288 {offsets = [0, 0], sizes = [2, 128], strides = [1, 1]} : vector<2x384xf32> to vector<2x128xf32>
    %292 = vector.extract_strided_slice %288 {offsets = [0, 128], sizes = [2, 128], strides = [1, 1]} : vector<2x384xf32> to vector<2x128xf32>
    %293 = vector.extract_strided_slice %288 {offsets = [0, 256], sizes = [2, 128], strides = [1, 1]} : vector<2x384xf32> to vector<2x128xf32>
    %294 = arith.mulf %292, %276 : vector<2x128xf32>
    %295 = arith.mulf %291, %290 : vector<2x128xf32>
    %296 = arith.addf %294, %295 : vector<2x128xf32>
    %297 = math.tanh %296 : vector<2x128xf32>
    %298 = arith.mulf %293, %297 : vector<2x128xf32>
    %299 = arith.addf %279, %298 : vector<2x128xf32>
    %300 = vector.extract_strided_slice %176 {offsets = [12, 0], sizes = [2, 512], strides = [1, 1]} : vector<16x512xf32> to vector<2x512xf32>
    %cst_48 = arith.constant dense<0.000000e+00> : vector<2x512xf32>
    %301 = tpu.matmul %298, %1, %cst_48 {dimension_numbers = #tpu.dot_dimension_numbers<[1], [0], [0], [1], [0, 0, 1, 1], [], []>} : vector<2x128xf32>, vector<128x512xf32>, vector<2x512xf32> -> vector<2x512xf32>
    %302 = arith.addf %300, %301 : vector<2x512xf32>
    %303 = vector.extract_strided_slice %302 {offsets = [0, 0], sizes = [2, 384], strides = [1, 1]} : vector<2x512xf32> to vector<2x384xf32>
    %304 = arith.negf %303 : vector<2x384xf32>
    %305 = math.exp %304 : vector<2x384xf32>
    %cst_49 = arith.constant 1.000000e+00 : f32
    %306 = vector.broadcast %cst_49 : f32 to vector<2x384xf32>
    %307 = arith.addf %306, %305 : vector<2x384xf32>
    %308 = arith.divf %306, %307 : vector<2x384xf32>
    %309 = vector.extract_strided_slice %302 {offsets = [0, 384], sizes = [2, 128], strides = [1, 1]} : vector<2x512xf32> to vector<2x128xf32>
    %310 = math.tanh %309 : vector<2x128xf32>
    %311 = vector.extract_strided_slice %308 {offsets = [0, 0], sizes = [2, 128], strides = [1, 1]} : vector<2x384xf32> to vector<2x128xf32>
    %312 = vector.extract_strided_slice %308 {offsets = [0, 128], sizes = [2, 128], strides = [1, 1]} : vector<2x384xf32> to vector<2x128xf32>
    %313 = vector.extract_strided_slice %308 {offsets = [0, 256], sizes = [2, 128], strides = [1, 1]} : vector<2x384xf32> to vector<2x128xf32>
    %314 = arith.mulf %312, %296 : vector<2x128xf32>
    %315 = arith.mulf %311, %310 : vector<2x128xf32>
    %316 = arith.addf %314, %315 : vector<2x128xf32>
    %317 = math.tanh %316 : vector<2x128xf32>
    %318 = arith.mulf %313, %317 : vector<2x128xf32>
    %319 = arith.addf %299, %318 : vector<2x128xf32>
    %320 = vector.extract_strided_slice %176 {offsets = [14, 0], sizes = [2, 512], strides = [1, 1]} : vector<16x512xf32> to vector<2x512xf32>
    %cst_50 = arith.constant dense<0.000000e+00> : vector<2x512xf32>
    %321 = tpu.matmul %318, %1, %cst_50 {dimension_numbers = #tpu.dot_dimension_numbers<[1], [0], [0], [1], [0, 0, 1, 1], [], []>} : vector<2x128xf32>, vector<128x512xf32>, vector<2x512xf32> -> vector<2x512xf32>
    %322 = arith.addf %320, %321 : vector<2x512xf32>
    %323 = vector.extract_strided_slice %322 {offsets = [0, 0], sizes = [2, 384], strides = [1, 1]} : vector<2x512xf32> to vector<2x384xf32>
    %324 = arith.negf %323 : vector<2x384xf32>
    %325 = math.exp %324 : vector<2x384xf32>
    %cst_51 = arith.constant 1.000000e+00 : f32
    %326 = vector.broadcast %cst_51 : f32 to vector<2x384xf32>
    %327 = arith.addf %326, %325 : vector<2x384xf32>
    %328 = arith.divf %326, %327 : vector<2x384xf32>
    %329 = vector.extract_strided_slice %322 {offsets = [0, 384], sizes = [2, 128], strides = [1, 1]} : vector<2x512xf32> to vector<2x128xf32>
    %330 = math.tanh %329 : vector<2x128xf32>
    %331 = vector.extract_strided_slice %328 {offsets = [0, 0], sizes = [2, 128], strides = [1, 1]} : vector<2x384xf32> to vector<2x128xf32>
    %332 = vector.extract_strided_slice %328 {offsets = [0, 128], sizes = [2, 128], strides = [1, 1]} : vector<2x384xf32> to vector<2x128xf32>
    %333 = vector.extract_strided_slice %328 {offsets = [0, 256], sizes = [2, 128], strides = [1, 1]} : vector<2x384xf32> to vector<2x128xf32>
    %334 = arith.mulf %332, %316 : vector<2x128xf32>
    %335 = arith.mulf %331, %330 : vector<2x128xf32>
    %336 = arith.addf %334, %335 : vector<2x128xf32>
    %337 = math.tanh %336 : vector<2x128xf32>
    %338 = arith.mulf %333, %337 : vector<2x128xf32>
    %339 = arith.addf %319, %338 : vector<2x128xf32>
    %cst_52 = arith.constant 1.000000e+00 : f32
    %cst_53 = arith.constant 8.000000e+00 : f32
    %340 = arith.divf %cst_52, %cst_53 : f32
    %341 = vector.broadcast %340 : f32 to vector<2x128xf32>
    %342 = arith.mulf %339, %341 : vector<2x128xf32>
    %c0_54 = arith.constant 0 : index
    %c0_55 = arith.constant 0 : index
    %343 = vector.load %arg8[%c0_54, %c0_55] : memref<128x4xf32, #tpu.memory_space<vmem>>, vector<128x4xf32>
    %cst_56 = arith.constant dense<0.000000e+00> : vector<2x4xf32>
    %344 = tpu.matmul %342, %343, %cst_56 {dimension_numbers = #tpu.dot_dimension_numbers<[1], [0], [0], [1], [0, 0, 1, 1], [], []>} : vector<2x128xf32>, vector<128x4xf32>, vector<2x4xf32> -> vector<2x4xf32>
    %c0_57 = arith.constant 0 : index
    %c0_58 = arith.constant 0 : index
    %345 = vector.load %arg9[%c0_57, %c0_58] : memref<1x4xf32, #tpu.memory_space<vmem>>, vector<1x4xf32>
    %346 = vector.broadcast %345 : vector<1x4xf32> to vector<2x4xf32>
    %347 = arith.addf %344, %346 : vector<2x4xf32>
    %c0_59 = arith.constant 0 : index
    %c0_60 = arith.constant 0 : index
    %348 = vector.load %arg10[%c0_59, %c0_60] : memref<2x4xf32, #tpu.memory_space<vmem>>, vector<2x4xf32>
    tpu.vector_store %arg10[%c0_59, %c0_60], %347 {strides = array<i32>} : memref<2x4xf32, #tpu.memory_space<vmem>>, vector<2x4xf32>,
    return
  }
  func.func @transform_0(%arg0: i32) -> (i32, i32) {
    %c0_i32 = arith.constant 0 : i32
    %c0_i32_0 = arith.constant 0 : i32
    %c0_i32_1 = arith.constant 0 : i32
    return %c0_i32, %c0_i32_0 : i32, i32
  }
  func.func @transform_1(%arg0: i32) -> (i32, i32) {
    %c0_i32 = arith.constant 0 : i32
    %c0_i32_0 = arith.constant 0 : i32
    %c0_i32_1 = arith.constant 0 : i32
    return %c0_i32, %c0_i32_0 : i32, i32
  }
  func.func @transform_2(%arg0: i32) -> (i32, i32) {
    %c0_i32 = arith.constant 0 : i32
    %c0_i32_0 = arith.constant 0 : i32
    %c0_i32_1 = arith.constant 0 : i32
    return %c0_i32, %c0_i32_0 : i32, i32
  }
  func.func @transform_3(%arg0: i32) -> (i32, i32) {
    %c0_i32 = arith.constant 0 : i32
    %c0_i32_0 = arith.constant 0 : i32
    %c0_i32_1 = arith.constant 0 : i32
    return %c0_i32, %c0_i32_0 : i32, i32
  }
  func.func @transform_4(%arg0: i32) -> (i32, i32) {
    %c0_i32 = arith.constant 0 : i32
    %c0_i32_0 = arith.constant 0 : i32
    %c0_i32_1 = arith.constant 0 : i32
    return %c0_i32, %c0_i32_0 : i32, i32
  }
  func.func @transform_5(%arg0: i32) -> (i32, i32) {
    %c0_i32 = arith.constant 0 : i32
    %c0_i32_0 = arith.constant 0 : i32
    %c0_i32_1 = arith.constant 0 : i32
    return %c0_i32, %c0_i32_0 : i32, i32
  }
  func.func @transform_6(%arg0: i32) -> (i32, i32) {
    %c0_i32 = arith.constant 0 : i32
    %c0_i32_0 = arith.constant 0 : i32
    %c0_i32_1 = arith.constant 0 : i32
    return %c0_i32, %c0_i32_0 : i32, i32
  }
  func.func @transform_7(%arg0: i32) -> (i32, i32) {
    %c0_i32 = arith.constant 0 : i32
    %c0_i32_0 = arith.constant 0 : i32
    %c0_i32_1 = arith.constant 0 : i32
    return %c0_i32, %c0_i32_0 : i32, i32
  }
  func.func @transform_8(%arg0: i32) -> (i32, i32) {
    %c0_i32 = arith.constant 0 : i32
    %c0_i32_0 = arith.constant 0 : i32
    %c0_i32_1 = arith.constant 0 : i32
    return %c0_i32, %c0_i32_0 : i32, i32
  }
  func.func @transform_9(%arg0: i32) -> (i32, i32) {
    %c0_i32 = arith.constant 0 : i32
    %c0_i32_0 = arith.constant 0 : i32
    %c0_i32_1 = arith.constant 0 : i32
    return %c0_i32, %c0_i32_0 : i32, i32
  }
}

</mosaic_0001>

<bundles_post_ra>
// kernel: transformer_bilstm_forward.1
= control target key start
LH: loop header
LB: loop body
LE: loop exit
PB: predicated region body
PF: predicated region fallthrough
CT: control target
= control target key end

     0   :  { %s12092_s0 = inlined_call_operand.vmem [shape: bf16[16,1536], index: 0, kind: input, shape index: {}]   ;;  %s12093_s1 = inlined_call_operand.vmem [shape: bf16[1536,512], index: 1, kind: input, shape index: {}]   ;;  %s12094_s2 = inlined_call_operand.vmem [shape: f32[1,512], index: 2, kind: input, shape index: {}]   ;;  %s12095_s3 = inlined_call_operand.vmem [shape: f32[128,512], index: 3, kind: input, shape index: {}]   ;;  %s12096_s4 = inlined_call_operand.vmem [shape: f32[256,512], index: 4, kind: input, shape index: {}]   ;;  %s12097_s5 = inlined_call_operand.vmem [shape: f32[1,512], index: 5, kind: input, shape index: {}]   ;;  %s12098_s6 = inlined_call_operand.vmem [shape: f32[128,512], index: 6, kind: input, shape index: {}]   ;;  %s12099_s7 = inlined_call_operand.vmem [shape: f32[128,4], index: 7, kind: input, shape index: {}]   ;;  %s12100_s8 = inlined_call_operand.vmem [shape: f32[1,4], index: 8, kind: input, shape index: {}]   ;;  %s12101_s9 = inlined_call_operand.hbm [shape: f32[2,4], index: 9, kind: output, shape index: {}]  }
   0x1   :  { %v8200_v0 = vld [vmem:[%s12093_s1 + $0x4] ss:$16 sps:$4 sm:$0xff]   ;;  %v8202_v1 = vld [vmem:[%s12093_s1 + $0xc] ss:$16 sps:$4 sm:$0xff]   ;;  %v8204_v2 = vld [vmem:[%s12093_s1] ss:$16 sps:$4 sm:$0xff]  }
   0x2   :  { %2559 = vmatprep.subr.bf16.mxu0 %v8200_v0  ;;  %v8205_v3 = vld [vmem:[%s12093_s1 + $0x8] ss:$16 sps:$4 sm:$0xff]   ;;  %2817 = vmatprep.subr.bf16.mxu1 %v8202_v1  ;;  %v8206_v4 = vld [vmem:[%s12093_s1 + $0x24] ss:$16 sps:$4 sm:$0xff]   ;;  %v8208_v5 = vld [vmem:[%s12093_s1 + $0x2c] ss:$16 sps:$4 sm:$0xff]  }
   0x3   :  { %2560 = vmatpush1.bf16.msra.mxu0 %v8204_v2  ;;  %2818 = vmatpush1.bf16.msra.mxu1 %v8205_v3  ;;  %v8210_v6 = vld [vmem:[%s12093_s1 + $0x20] ss:$16 sps:$4 sm:$0xff]   ;;  %v8211_v7 = vld [vmem:[%s12093_s1 + $0x28] ss:$16 sps:$4 sm:$0xff]   ;;  %v8212_v8 = vld [vmem:[%s12093_s1 + $0x44] ss:$16 sps:$4 sm:$0xff]  }
   0x4   :  { %2561 = vmatprep.subr.bf16.mxu0 %v8206_v4  ;;  %2819 = vmatprep.subr.bf16.mxu1 %v8208_v5  ;;  %v8214_v9 = vld [vmem:[%s12093_s1 + $0x4c] ss:$16 sps:$4 sm:$0xff]   ;;  %v8216_v10 = vld [vmem:[%s12093_s1 + $0x40] ss:$16 sps:$4 sm:$0xff]   ;;  %v8217_v11 = vld [vmem:[%s12093_s1 + $0x48] ss:$16 sps:$4 sm:$0xff]  }
   0x5   :  { %v8218_v12 = vld [vmem:[%s12093_s1 + $0x64] ss:$16 sps:$4 sm:$0xff]   ;;  %v8220_v13 = vld [vmem:[%s12093_s1 + $0x6c] ss:$16 sps:$4 sm:$0xff]   ;;  %v8222_v14 = vld [vmem:[%s12093_s1 + $0x60] ss:$16 sps:$4 sm:$0xff]  }
   0x6   :  { %v8223_v15 = vld [vmem:[%s12093_s1 + $0x68] ss:$16 sps:$4 sm:$0xff]   ;;  %v8224_v16 = vld [vmem:[%s12093_s1 + $0x84] ss:$16 sps:$4 sm:$0xff]   ;;  %v8226_v17 = vld [vmem:[%s12093_s1 + $0x8c] ss:$16 sps:$4 sm:$0xff]  }
   0x7   :  { %2562 = vmatpush1.bf16.msra.mxu0 %v8210_v6  ;;  %2820 = vmatpush1.bf16.msra.mxu1 %v8211_v7  ;;  %v8228_v18 = vld [vmem:[%s12093_s1 + $0x80] ss:$16 sps:$4 sm:$0xff]   ;;  %v8229_v19 = vld [vmem:[%s12093_s1 + $0x88] ss:$16 sps:$4 sm:$0xff]   ;;  %v8230_v20 = vld [vmem:[%s12093_s1 + $0xa4] ss:$16 sps:$4 sm:$0xff]  }
   0x8   :  { %2563 = vmatprep.subr.bf16.mxu0 %v8212_v8  ;;  %2821 = vmatprep.subr.bf16.mxu1 %v8214_v9  ;;  %v8232_v21 = vld [vmem:[%s12093_s1 + $0xac] ss:$16 sps:$4 sm:$0xff]   ;;  %v8234_v22 = vld [vmem:[%s12093_s1 + $0xa0] ss:$16 sps:$4 sm:$0xff]   ;;  %v8235_v23 = vld [vmem:[%s12093_s1 + $0xa8] ss:$16 sps:$4 sm:$0xff]  }
   0x9   :  { %v8236_v24 = vld [vmem:[%s12093_s1 + $0xc4] ss:$16 sps:$4 sm:$0xff]   ;;  %v8238_v25 = vld [vmem:[%s12093_s1 + $0xcc] ss:$16 sps:$4 sm:$0xff]   ;;  %v8240_v26 = vld [vmem:[%s12093_s1 + $0xc0] ss:$16 sps:$4 sm:$0xff]  }
   0xa   :  { %v8241_v27 = vld [vmem:[%s12093_s1 + $0xc8] ss:$16 sps:$4 sm:$0xff]   ;;  %v8242_v28 = vld [vmem:[%s12093_s1 + $0xe4] ss:$16 sps:$4 sm:$0xff]   ;;  %v8244_v29 = vld [vmem:[%s12093_s1 + $0xec] ss:$16 sps:$4 sm:$0xff]  }
   0xb   :  { %2564 = vmatpush1.bf16.msra.mxu0 %v8216_v10  ;;  %2822 = vmatpush1.bf16.msra.mxu1 %v8217_v11  ;;  %v8246_v30 = vld [vmem:[%s12093_s1 + $0xe0] ss:$16 sps:$4 sm:$0xff]   ;;  %v8247_v31 = vld [vmem:[%s12093_s1 + $0xe8] ss:$16 sps:$4 sm:$0xff]   ;;  %v8248_v32 = vld [vmem:[%s12093_s1 + $0x104] ss:$16 sps:$4 sm:$0xff]  }
   0xc   :  { %2565 = vmatprep.subr.bf16.mxu0 %v8218_v12  ;;  %2823 = vmatprep.subr.bf16.mxu1 %v8220_v13  ;;  %v8250_v33 = vld [vmem:[%s12093_s1 + $0x10c] ss:$16 sps:$4 sm:$0xff]   ;;  %v8252_v34 = vld [vmem:[%s12093_s1 + $0x100] ss:$16 sps:$4 sm:$0xff]   ;;  %v8253_v35 = vld [vmem:[%s12093_s1 + $0x108] ss:$16 sps:$4 sm:$0xff]  }
   0xd   :  { %v8254_v36 = vld [vmem:[%s12093_s1 + $0x124] ss:$16 sps:$4 sm:$0xff]   ;;  %v8256_v37 = vld [vmem:[%s12093_s1 + $0x12c] ss:$16 sps:$4 sm:$0xff]   ;;  %v8258_v38 = vld [vmem:[%s12093_s1 + $0x120] ss:$16 sps:$4 sm:$0xff]  }
   0xe   :  { %v8259_v39 = vld [vmem:[%s12093_s1 + $0x128] ss:$16 sps:$4 sm:$0xff]   ;;  %v8260_v40 = vld [vmem:[%s12093_s1 + $0x144] ss:$16 sps:$4 sm:$0xff]   ;;  %v8262_v41 = vld [vmem:[%s12093_s1 + $0x14c] ss:$16 sps:$4 sm:$0xff]  }
   0xf   :  { %2566 = vmatpush1.bf16.msra.mxu0 %v8222_v14  ;;  %2824 = vmatpush1.bf16.msra.mxu1 %v8223_v15  ;;  %v8264_v42 = vld [vmem:[%s12093_s1 + $0x140] ss:$16 sps:$4 sm:$0xff]   ;;  %v8265_v43 = vld [vmem:[%s12093_s1 + $0x148] ss:$16 sps:$4 sm:$0xff]   ;;  %v8266_v44 = vld [vmem:[%s12093_s1 + $0x164] ss:$16 sps:$4 sm:$0xff]  }
  0x10   :  { %2567 = vmatprep.subr.bf16.mxu0 %v8224_v16  ;;  %2825 = vmatprep.subr.bf16.mxu1 %v8226_v17  ;;  %v8268_v45 = vld [vmem:[%s12093_s1 + $0x16c] ss:$16 sps:$4 sm:$0xff]   ;;  %v8270_v46 = vld [vmem:[%s12093_s1 + $0x160] ss:$16 sps:$4 sm:$0xff]   ;;  %v8271_v47 = vld [vmem:[%s12093_s1 + $0x168] ss:$16 sps:$4 sm:$0xff]  }
  0x11   :  { %v8298_v48 = vld [vmem:[%s12092_s0 + $0x4] ss:$48 sps:$4 sm:$0xff]   ;;  %v8274_v50 = vld [vmem:[%s12093_s1 + $0x18c] ss:$16 sps:$4 sm:$0xff]   ;;  %v8276_v51 = vld [vmem:[%s12093_s1 + $0x180] ss:$16 sps:$4 sm:$0xff]  }
  0x12   :  { %v8272_v49 = vld [vmem:[%s12093_s1 + $0x184] ss:$16 sps:$4 sm:$0xff]   ;;  %2591 = vmatprep.mubr.bf16.mxu0 %v8298_v48  ;;  %2849 = vmatprep.mubr.bf16.mxu1 %v8298_v48  ;;  %v8277_v52 = vld [vmem:[%s12093_s1 + $0x188] ss:$16 sps:$4 sm:$0xff]   ;;  %v8280_v54 = vld [vmem:[%s12093_s1 + $0x1ac] ss:$16 sps:$4 sm:$0xff]  }
  0x13   :  { %2568 = vmatpush1.bf16.msra.mxu0 %v8228_v18  ;;  %2826 = vmatpush1.bf16.msra.mxu1 %v8229_v19  ;;  %v8278_v53 = vld [vmem:[%s12093_s1 + $0x1a4] ss:$16 sps:$4 sm:$0xff]   ;;  %v8282_v55 = vld [vmem:[%s12093_s1 + $0x1a0] ss:$16 sps:$4 sm:$0xff]   ;;  %v8283_v56 = vld [vmem:[%s12093_s1 + $0x1a8] ss:$16 sps:$4 sm:$0xff]  }
  0x14   :  { %2569 = vmatprep.subr.bf16.mxu0 %v8230_v20  ;;  %2827 = vmatprep.subr.bf16.mxu1 %v8232_v21  ;;  %v8284_v57 = vld [vmem:[%s12093_s1 + $0x1c4] ss:$16 sps:$4 sm:$0xff]   ;;  %v8286_v58 = vld [vmem:[%s12093_s1 + $0x1cc] ss:$16 sps:$4 sm:$0xff]   ;;  %v8288_v59 = vld [vmem:[%s12093_s1 + $0x1c0] ss:$16 sps:$4 sm:$0xff]  }
  0x15   :  { %v8289_v60 = vld [vmem:[%s12093_s1 + $0x1c8] ss:$16 sps:$4 sm:$0xff]   ;;  %v8290_v61 = vld [vmem:[%s12093_s1 + $0x1e4] ss:$16 sps:$4 sm:$0xff]   ;;  %v8292_v62 = vld [vmem:[%s12093_s1 + $0x1ec] ss:$16 sps:$4 sm:$0xff]  }
  0x16   :  { %v8294_v63 = vld [vmem:[%s12093_s1 + $0x1e0] ss:$16 sps:$4 sm:$0xff]   ;;  %v8295_v0 = vld [vmem:[%s12093_s1 + $0x1e8] ss:$16 sps:$4 sm:$0xff]   ;;  %v8301_v1 = vld [vmem:[%s12093_s1 + $0x204] ss:$16 sps:$4 sm:$0xff]  }
  0x17   :  { %2570 = vmatpush1.bf16.msra.mxu0 %v8234_v22  ;;  %2828 = vmatpush1.bf16.msra.mxu1 %v8235_v23  ;;  %v8304_v2 = vld [vmem:[%s12093_s1 + $0x20c] ss:$16 sps:$4 sm:$0xff]   ;;  %v8296_v3 = vld [vmem:[%s12092_s0] ss:$48 sps:$4 sm:$0xff]   ;;  %v8302_v5 = vld [vmem:[%s12093_s1 + $0x208] ss:$16 sps:$4 sm:$0xff]  }
  0x18   :  { %2571 = vmatprep.subr.bf16.mxu0 %v8236_v24  ;;  %2829 = vmatprep.subr.bf16.mxu1 %v8238_v25  ;;  %v8299_v4 = vld [vmem:[%s12093_s1 + $0x200] ss:$16 sps:$4 sm:$0xff]   ;;  %v8307_v6 = vld [vmem:[%s12093_s1 + $0x224] ss:$16 sps:$4 sm:$0xff]   ;;  %v8310_v7 = vld [vmem:[%s12093_s1 + $0x22c] ss:$16 sps:$4 sm:$0xff]  }
  0x19   :  { %v8305_v8 = vld [vmem:[%s12093_s1 + $0x220] ss:$16 sps:$4 sm:$0xff]   ;;  %v8308_v9 = vld [vmem:[%s12093_s1 + $0x228] ss:$16 sps:$4 sm:$0xff]   ;;  %v8313_v10 = vld [vmem:[%s12093_s1 + $0x244] ss:$16 sps:$4 sm:$0xff]  }
  0x1a   :  { %v8316_v11 = vld [vmem:[%s12093_s1 + $0x24c] ss:$16 sps:$4 sm:$0xff]   ;;  %v8311_v12 = vld [vmem:[%s12093_s1 + $0x240] ss:$16 sps:$4 sm:$0xff]   ;;  %v8314_v13 = vld [vmem:[%s12093_s1 + $0x248] ss:$16 sps:$4 sm:$0xff]  }
  0x1b   :  { %2572 = vmatpush1.bf16.msra.mxu0 %v8240_v26  ;;  %2830 = vmatpush1.bf16.msra.mxu1 %v8241_v27  ;;  %v8319_v14 = vld [vmem:[%s12093_s1 + $0x264] ss:$16 sps:$4 sm:$0xff]   ;;  %v8322_v15 = vld [vmem:[%s12093_s1 + $0x26c] ss:$16 sps:$4 sm:$0xff]   ;;  %v8317_v16 = vld [vmem:[%s12093_s1 + $0x260] ss:$16 sps:$4 sm:$0xff]  }
  0x1c   :  { %2573 = vmatprep.subr.bf16.mxu0 %v8242_v28  ;;  %2831 = vmatprep.subr.bf16.mxu1 %v8244_v29  ;;  %v8320_v17 = vld [vmem:[%s12093_s1 + $0x268] ss:$16 sps:$4 sm:$0xff]   ;;  %v8325_v18 = vld [vmem:[%s12093_s1 + $0x284] ss:$16 sps:$4 sm:$0xff]   ;;  %v8328_v19 = vld [vmem:[%s12093_s1 + $0x28c] ss:$16 sps:$4 sm:$0xff]  }
  0x1d   :  { %v8323_v20 = vld [vmem:[%s12093_s1 + $0x280] ss:$16 sps:$4 sm:$0xff]   ;;  %v8326_v21 = vld [vmem:[%s12093_s1 + $0x288] ss:$16 sps:$4 sm:$0xff]   ;;  %v8331_v22 = vld [vmem:[%s12093_s1 + $0x2a4] ss:$16 sps:$4 sm:$0xff]  }
  0x1e   :  { %v8334_v23 = vld [vmem:[%s12093_s1 + $0x2ac] ss:$16 sps:$4 sm:$0xff]   ;;  %v8329_v24 = vld [vmem:[%s12093_s1 + $0x2a0] ss:$16 sps:$4 sm:$0xff]   ;;  %v8332_v25 = vld [vmem:[%s12093_s1 + $0x2a8] ss:$16 sps:$4 sm:$0xff]  }
  0x1f   :  { %2574 = vmatpush1.bf16.msra.mxu0 %v8246_v30  ;;  %2832 = vmatpush1.bf16.msra.mxu1 %v8247_v31  ;;  %v8337_v26 = vld [vmem:[%s12093_s1 + $0x2c4] ss:$16 sps:$4 sm:$0xff]   ;;  %v8340_v27 = vld [vmem:[%s12093_s1 + $0x2cc] ss:$16 sps:$4 sm:$0xff]   ;;  %v8335_v28 = vld [vmem:[%s12093_s1 + $0x2c0] ss:$16 sps:$4 sm:$0xff]  }
  0x20   :  { %2575 = vmatprep.subr.bf16.mxu0 %v8248_v32  ;;  %2833 = vmatprep.subr.bf16.mxu1 %v8250_v33  ;;  %v8338_v29 = vld [vmem:[%s12093_s1 + $0x2c8] ss:$16 sps:$4 sm:$0xff]   ;;  %v8397_v30 = vld [vmem:[%s12092_s0 + $0xc] ss:$48 sps:$4 sm:$0xff]   ;;  %v8343_v31 = vld [vmem:[%s12093_s1 + $0x2e4] ss:$16 sps:$4 sm:$0xff]  }
  0x21   :  { %v8346_v32 = vld [vmem:[%s12093_s1 + $0x2ec] ss:$16 sps:$4 sm:$0xff]   ;;  %v8341_v33 = vld [vmem:[%s12093_s1 + $0x2e0] ss:$16 sps:$4 sm:$0xff]  }
  0x22   :  { %v8370_v48 = vld [vmem:[%s12093_s1 + $0x36c] ss:$16 sps:$4 sm:$0xff]  }
  0x23   :  { %2576 = vmatpush1.bf16.msra.mxu0 %v8252_v34  ;;  %2834 = vmatpush1.bf16.msra.mxu1 %v8253_v35  ;;  %v8344_v34 = vld [vmem:[%s12093_s1 + $0x2e8] ss:$16 sps:$4 sm:$0xff]   ;;  %v8349_v35 = vld [vmem:[%s12093_s1 + $0x304] ss:$16 sps:$4 sm:$0xff]  }
  0x24   :  { %2577 = vmatprep.subr.bf16.mxu0 %v8254_v36  ;;  %2835 = vmatprep.subr.bf16.mxu1 %v8256_v37  ;;  %v8352_v36 = vld [vmem:[%s12093_s1 + $0x30c] ss:$16 sps:$4 sm:$0xff]   ;;  %v8347_v37 = vld [vmem:[%s12093_s1 + $0x300] ss:$16 sps:$4 sm:$0xff]  }
  0x27   :  { %2578 = vmatpush1.bf16.msra.mxu0 %v8258_v38  ;;  %2836 = vmatpush1.bf16.msra.mxu1 %v8259_v39  ;;  %v8350_v38 = vld [vmem:[%s12093_s1 + $0x308] ss:$16 sps:$4 sm:$0xff]   ;;  %v8355_v39 = vld [vmem:[%s12093_s1 + $0x324] ss:$16 sps:$4 sm:$0xff]  }
  0x28   :  { %2579 = vmatprep.subr.bf16.mxu0 %v8260_v40  ;;  %2837 = vmatprep.subr.bf16.mxu1 %v8262_v41  ;;  %v8358_v40 = vld [vmem:[%s12093_s1 + $0x32c] ss:$16 sps:$4 sm:$0xff]   ;;  %v8353_v41 = vld [vmem:[%s12093_s1 + $0x320] ss:$16 sps:$4 sm:$0xff]  }
  0x2b   :  { %2580 = vmatpush1.bf16.msra.mxu0 %v8264_v42  ;;  %2838 = vmatpush1.bf16.msra.mxu1 %v8265_v43  ;;  %v8356_v42 = vld [vmem:[%s12093_s1 + $0x328] ss:$16 sps:$4 sm:$0xff]   ;;  %v8361_v43 = vld [vmem:[%s12093_s1 + $0x344] ss:$16 sps:$4 sm:$0xff]  }
  0x2c   :  { %2581 = vmatprep.subr.bf16.mxu0 %v8266_v44  ;;  %2839 = vmatprep.subr.bf16.mxu1 %v8268_v45  ;;  %v8364_v44 = vld [vmem:[%s12093_s1 + $0x34c] ss:$16 sps:$4 sm:$0xff]   ;;  %v8359_v45 = vld [vmem:[%s12093_s1 + $0x340] ss:$16 sps:$4 sm:$0xff]  }
  0x2f   :  { %2582 = vmatpush1.bf16.msra.mxu0 %v8270_v46  ;;  %2840 = vmatpush1.bf16.msra.mxu1 %v8271_v47  ;;  %v8362_v46 = vld [vmem:[%s12093_s1 + $0x348] ss:$16 sps:$4 sm:$0xff]   ;;  %v8367_v47 = vld [vmem:[%s12093_s1 + $0x364] ss:$16 sps:$4 sm:$0xff]  }
  0x30   :  { %2583 = vmatprep.subr.bf16.mxu0 %v8272_v49  ;;  %2841 = vmatprep.subr.bf16.mxu1 %v8274_v50  ;;  %v8365_v49 = vld [vmem:[%s12093_s1 + $0x360] ss:$16 sps:$4 sm:$0xff]   ;;  %v8368_v50 = vld [vmem:[%s12093_s1 + $0x368] ss:$16 sps:$4 sm:$0xff]  }
  0x33   :  { %2584 = vmatpush1.bf16.msra.mxu0 %v8276_v51  ;;  %2842 = vmatpush1.bf16.msra.mxu1 %v8277_v52  ;;  %v8373_v51 = vld [vmem:[%s12093_s1 + $0x384] ss:$16 sps:$4 sm:$0xff]   ;;  %v8376_v52 = vld [vmem:[%s12093_s1 + $0x38c] ss:$16 sps:$4 sm:$0xff]  }
  0x34   :  { %2585 = vmatprep.subr.bf16.mxu0 %v8278_v53  ;;  %2843 = vmatprep.subr.bf16.mxu1 %v8280_v54  ;;  %v8371_v53 = vld [vmem:[%s12093_s1 + $0x380] ss:$16 sps:$4 sm:$0xff]   ;;  %v8374_v54 = vld [vmem:[%s12093_s1 + $0x388] ss:$16 sps:$4 sm:$0xff]  }
  0x37   :  { %2586 = vmatpush1.bf16.msra.mxu0 %v8282_v55  ;;  %2844 = vmatpush1.bf16.msra.mxu1 %v8283_v56  ;;  %v8379_v55 = vld [vmem:[%s12093_s1 + $0x3a4] ss:$16 sps:$4 sm:$0xff]   ;;  %v8382_v56 = vld [vmem:[%s12093_s1 + $0x3ac] ss:$16 sps:$4 sm:$0xff]  }
  0x38   :  { %2587 = vmatprep.subr.bf16.mxu0 %v8284_v57  ;;  %2845 = vmatprep.subr.bf16.mxu1 %v8286_v58  ;;  %v8377_v57 = vld [vmem:[%s12093_s1 + $0x3a0] ss:$16 sps:$4 sm:$0xff]   ;;  %v8380_v58 = vld [vmem:[%s12093_s1 + $0x3a8] ss:$16 sps:$4 sm:$0xff]  }
  0x3b   :  { %2588 = vmatpush1.bf16.msra.mxu0 %v8288_v59  ;;  %2846 = vmatpush1.bf16.msra.mxu1 %v8289_v60  ;;  %v8385_v59 = vld [vmem:[%s12093_s1 + $0x3c4] ss:$16 sps:$4 sm:$0xff]   ;;  %v8388_v60 = vld [vmem:[%s12093_s1 + $0x3cc] ss:$16 sps:$4 sm:$0xff]  }
  0x3c   :  { %2589 = vmatprep.subr.bf16.mxu0 %v8290_v61  ;;  %2847 = vmatprep.subr.bf16.mxu1 %v8292_v62  ;;  %v8383_v61 = vld [vmem:[%s12093_s1 + $0x3c0] ss:$16 sps:$4 sm:$0xff]   ;;  %v8386_v62 = vld [vmem:[%s12093_s1 + $0x3c8] ss:$16 sps:$4 sm:$0xff]  }
  0x3f   :  { %2590 = vmatpush1.bf16.msra.mxu0 %v8294_v63  ;;  %2848 = vmatpush1.bf16.msra.mxu1 %v8295_v0  ;;  %v8391_v63 = vld [vmem:[%s12093_s1 + $0x3e4] ss:$16 sps:$4 sm:$0xff]   ;;  %v8394_v0 = vld [vmem:[%s12093_s1 + $0x3ec] ss:$16 sps:$4 sm:$0xff]  }
  0x40   :  { %2602 = vmatprep.subr.bf16.mxu0 %v8301_v1  ;;  %2860 = vmatprep.subr.bf16.mxu1 %v8304_v2  ;;  %v8389_v1 = vld [vmem:[%s12093_s1 + $0x3e0] ss:$16 sps:$4 sm:$0xff]   ;;  %v8392_v2 = vld [vmem:[%s12093_s1 + $0x3e8] ss:$16 sps:$4 sm:$0xff]  }
  0x42   :  { %2592 = vmatmul.mubr.bf16.vlgmr.msra.gmra.mrb[0].mxu0 %v8296_v3  ;;  %2850 = vmatmul.mubr.bf16.vlgmr.msra.gmra.mrb[0].mxu1 %v8296_v3  ;;  %v8400_v3 = vld [vmem:[%s12093_s1 + $0x404] ss:$16 sps:$4 sm:$0xff]  }
  0x43   :  { %2603 = vmatpush1.bf16.msra.mxu0 %v8299_v4  ;;  %2861 = vmatpush1.bf16.msra.mxu1 %v8302_v5  ;;  %v8403_v4 = vld [vmem:[%s12093_s1 + $0x40c] ss:$16 sps:$4 sm:$0xff]   ;;  %v8395_v5 = vld [vmem:[%s12092_s0 + $0x8] ss:$48 sps:$4 sm:$0xff]  }
  0x44   :  { %2604 = vmatprep.subr.bf16.mxu0 %v8307_v6  ;;  %2862 = vmatprep.subr.bf16.mxu1 %v8310_v7  ;;  %v8398_v6 = vld [vmem:[%s12093_s1 + $0x400] ss:$16 sps:$4 sm:$0xff]   ;;  %v8401_v7 = vld [vmem:[%s12093_s1 + $0x408] ss:$16 sps:$4 sm:$0xff]  }
  0x45   :  { %2634 = vmatprep.mubr.bf16.mxu0 %v8397_v30  ;;  %2892 = vmatprep.mubr.bf16.mxu1 %v8397_v30  ;;  %v8439_v30 = vld [vmem:[%s12093_s1 + $0x4cc] ss:$16 sps:$4 sm:$0xff]  }
  0x47   :  { %2605 = vmatpush1.bf16.msra.mxu0 %v8305_v8  ;;  %2863 = vmatpush1.bf16.msra.mxu1 %v8308_v9  ;;  %v8406_v8 = vld [vmem:[%s12093_s1 + $0x424] ss:$16 sps:$4 sm:$0xff]   ;;  %v8409_v9 = vld [vmem:[%s12093_s1 + $0x42c] ss:$16 sps:$4 sm:$0xff]  }
  0x48   :  { %2606 = vmatprep.subr.bf16.mxu0 %v8313_v10  ;;  %2864 = vmatprep.subr.bf16.mxu1 %v8316_v11  ;;  %v8404_v10 = vld [vmem:[%s12093_s1 + $0x420] ss:$16 sps:$4 sm:$0xff]   ;;  %v8407_v11 = vld [vmem:[%s12093_s1 + $0x428] ss:$16 sps:$4 sm:$0xff]  }
  0x4b   :  { %2607 = vmatpush1.bf16.msra.mxu0 %v8311_v12  ;;  %2865 = vmatpush1.bf16.msra.mxu1 %v8314_v13  ;;  %v8496_v12 = vld [vmem:[%s12092_s0 + $0x14] ss:$48 sps:$4 sm:$0xff]  }
  0x4c   :  { %2608 = vmatprep.subr.bf16.mxu0 %v8319_v14  ;;  %2866 = vmatprep.subr.bf16.mxu1 %v8322_v15  ;;  %v8412_v13 = vld [vmem:[%s12093_s1 + $0x444] ss:$16 sps:$4 sm:$0xff]   ;;  %v8415_v14 = vld [vmem:[%s12093_s1 + $0x44c] ss:$16 sps:$4 sm:$0xff]   ;;  %v8410_v15 = vld [vmem:[%s12093_s1 + $0x440] ss:$16 sps:$4 sm:$0xff]  }
  0x4f   :  { %2609 = vmatpush1.bf16.msra.mxu0 %v8317_v16  ;;  %2867 = vmatpush1.bf16.msra.mxu1 %v8320_v17  ;;  %v8413_v16 = vld [vmem:[%s12093_s1 + $0x448] ss:$16 sps:$4 sm:$0xff]   ;;  %v8418_v17 = vld [vmem:[%s12093_s1 + $0x464] ss:$16 sps:$4 sm:$0xff]  }
  0x50   :  { %2610 = vmatprep.subr.bf16.mxu0 %v8325_v18  ;;  %2868 = vmatprep.subr.bf16.mxu1 %v8328_v19  ;;  %v8421_v18 = vld [vmem:[%s12093_s1 + $0x46c] ss:$16 sps:$4 sm:$0xff]   ;;  %v8416_v19 = vld [vmem:[%s12093_s1 + $0x460] ss:$16 sps:$4 sm:$0xff]  }
  0x53   :  { %2611 = vmatpush1.bf16.msra.mxu0 %v8323_v20  ;;  %2869 = vmatpush1.bf16.msra.mxu1 %v8326_v21  ;;  %v8419_v20 = vld [vmem:[%s12093_s1 + $0x468] ss:$16 sps:$4 sm:$0xff]   ;;  %v8424_v21 = vld [vmem:[%s12093_s1 + $0x484] ss:$16 sps:$4 sm:$0xff]  }
  0x54   :  { %2612 = vmatprep.subr.bf16.mxu0 %v8331_v22  ;;  %2870 = vmatprep.subr.bf16.mxu1 %v8334_v23  ;;  %v8427_v22 = vld [vmem:[%s12093_s1 + $0x48c] ss:$16 sps:$4 sm:$0xff]   ;;  %v8422_v23 = vld [vmem:[%s12093_s1 + $0x480] ss:$16 sps:$4 sm:$0xff]  }
  0x57   :  { %2613 = vmatpush1.bf16.msra.mxu0 %v8329_v24  ;;  %2871 = vmatpush1.bf16.msra.mxu1 %v8332_v25  ;;  %v8425_v24 = vld [vmem:[%s12093_s1 + $0x488] ss:$16 sps:$4 sm:$0xff]   ;;  %v8430_v25 = vld [vmem:[%s12093_s1 + $0x4a4] ss:$16 sps:$4 sm:$0xff]  }
  0x58   :  { %2614 = vmatprep.subr.bf16.mxu0 %v8337_v26  ;;  %2872 = vmatprep.subr.bf16.mxu1 %v8340_v27  ;;  %v8433_v26 = vld [vmem:[%s12093_s1 + $0x4ac] ss:$16 sps:$4 sm:$0xff]   ;;  %v8428_v27 = vld [vmem:[%s12093_s1 + $0x4a0] ss:$16 sps:$4 sm:$0xff]  }
  0x5b   :  { %2615 = vmatpush1.bf16.msra.mxu0 %v8335_v28  ;;  %2873 = vmatpush1.bf16.msra.mxu1 %v8338_v29  ;;  %v8431_v28 = vld [vmem:[%s12093_s1 + $0x4a8] ss:$16 sps:$4 sm:$0xff]   ;;  %v8436_v29 = vld [vmem:[%s12093_s1 + $0x4c4] ss:$16 sps:$4 sm:$0xff]  }
  0x5c   :  { %2616 = vmatprep.subr.bf16.mxu0 %v8343_v31  ;;  %2874 = vmatprep.subr.bf16.mxu1 %v8346_v32  ;;  %v8434_v31 = vld [vmem:[%s12093_s1 + $0x4c0] ss:$16 sps:$4 sm:$0xff]   ;;  %v8437_v32 = vld [vmem:[%s12093_s1 + $0x4c8] ss:$16 sps:$4 sm:$0xff]  }
  0x5f   :  { %2617 = vmatpush1.bf16.msra.mxu0 %v8341_v33  ;;  %2875 = vmatpush1.bf16.msra.mxu1 %v8344_v34  ;;  %v8442_v33 = vld [vmem:[%s12093_s1 + $0x4e4] ss:$16 sps:$4 sm:$0xff]   ;;  %v8445_v34 = vld [vmem:[%s12093_s1 + $0x4ec] ss:$16 sps:$4 sm:$0xff]  }
  0x60   :  { %2618 = vmatprep.subr.bf16.mxu0 %v8349_v35  ;;  %2876 = vmatprep.subr.bf16.mxu1 %v8352_v36  ;;  %v8440_v35 = vld [vmem:[%s12093_s1 + $0x4e0] ss:$16 sps:$4 sm:$0xff]   ;;  %v8443_v36 = vld [vmem:[%s12093_s1 + $0x4e8] ss:$16 sps:$4 sm:$0xff]  }
  0x63   :  { %2619 = vmatpush1.bf16.msra.mxu0 %v8347_v37  ;;  %2877 = vmatpush1.bf16.msra.mxu1 %v8350_v38  ;;  %v8448_v37 = vld [vmem:[%s12093_s1 + $0x504] ss:$16 sps:$4 sm:$0xff]   ;;  %v8451_v38 = vld [vmem:[%s12093_s1 + $0x50c] ss:$16 sps:$4 sm:$0xff]  }
  0x64   :  { %2620 = vmatprep.subr.bf16.mxu0 %v8355_v39  ;;  %2878 = vmatprep.subr.bf16.mxu1 %v8358_v40  ;;  %v8446_v39 = vld [vmem:[%s12093_s1 + $0x500] ss:$16 sps:$4 sm:$0xff]   ;;  %v8449_v40 = vld [vmem:[%s12093_s1 + $0x508] ss:$16 sps:$4 sm:$0xff]  }
  0x67   :  { %2621 = vmatpush1.bf16.msra.mxu0 %v8353_v41  ;;  %2879 = vmatpush1.bf16.msra.mxu1 %v8356_v42  ;;  %v8454_v41 = vld [vmem:[%s12093_s1 + $0x524] ss:$16 sps:$4 sm:$0xff]   ;;  %v8457_v42 = vld [vmem:[%s12093_s1 + $0x52c] ss:$16 sps:$4 sm:$0xff]  }
  0x68   :  { %2622 = vmatprep.subr.bf16.mxu0 %v8361_v43  ;;  %2880 = vmatprep.subr.bf16.mxu1 %v8364_v44  ;;  %v8452_v43 = vld [vmem:[%s12093_s1 + $0x520] ss:$16 sps:$4 sm:$0xff]   ;;  %v8455_v44 = vld [vmem:[%s12093_s1 + $0x528] ss:$16 sps:$4 sm:$0xff]  }
  0x6b   :  { %2623 = vmatpush1.bf16.msra.mxu0 %v8359_v45  ;;  %2881 = vmatpush1.bf16.msra.mxu1 %v8362_v46  ;;  %v8460_v45 = vld [vmem:[%s12093_s1 + $0x544] ss:$16 sps:$4 sm:$0xff]   ;;  %v8463_v46 = vld [vmem:[%s12093_s1 + $0x54c] ss:$16 sps:$4 sm:$0xff]  }
  0x6c   :  { %2624 = vmatprep.subr.bf16.mxu0 %v8367_v47  ;;  %2882 = vmatprep.subr.bf16.mxu1 %v8370_v48  ;;  %v8458_v47 = vld [vmem:[%s12093_s1 + $0x540] ss:$16 sps:$4 sm:$0xff]   ;;  %v8461_v48 = vld [vmem:[%s12093_s1 + $0x548] ss:$16 sps:$4 sm:$0xff]  }
  0x6f   :  { %2625 = vmatpush1.bf16.msra.mxu0 %v8365_v49  ;;  %2883 = vmatpush1.bf16.msra.mxu1 %v8368_v50  ;;  %v8466_v49 = vld [vmem:[%s12093_s1 + $0x564] ss:$16 sps:$4 sm:$0xff]   ;;  %v8469_v50 = vld [vmem:[%s12093_s1 + $0x56c] ss:$16 sps:$4 sm:$0xff]  }
  0x70   :  { %2626 = vmatprep.subr.bf16.mxu0 %v8373_v51  ;;  %2884 = vmatprep.subr.bf16.mxu1 %v8376_v52  ;;  %v8464_v51 = vld [vmem:[%s12093_s1 + $0x560] ss:$16 sps:$4 sm:$0xff]   ;;  %v8467_v52 = vld [vmem:[%s12093_s1 + $0x568] ss:$16 sps:$4 sm:$0xff]  }
  0x73   :  { %2627 = vmatpush1.bf16.msra.mxu0 %v8371_v53  ;;  %2885 = vmatpush1.bf16.msra.mxu1 %v8374_v54  ;;  %v8472_v53 = vld [vmem:[%s12093_s1 + $0x584] ss:$16 sps:$4 sm:$0xff]   ;;  %v8475_v54 = vld [vmem:[%s12093_s1 + $0x58c] ss:$16 sps:$4 sm:$0xff]  }
  0x74   :  { %2628 = vmatprep.subr.bf16.mxu0 %v8379_v55  ;;  %2886 = vmatprep.subr.bf16.mxu1 %v8382_v56  ;;  %v8470_v55 = vld [vmem:[%s12093_s1 + $0x580] ss:$16 sps:$4 sm:$0xff]   ;;  %v8473_v56 = vld [vmem:[%s12093_s1 + $0x588] ss:$16 sps:$4 sm:$0xff]  }
  0x77   :  { %2629 = vmatpush1.bf16.msra.mxu0 %v8377_v57  ;;  %2887 = vmatpush1.bf16.msra.mxu1 %v8380_v58  ;;  %v8478_v57 = vld [vmem:[%s12093_s1 + $0x5a4] ss:$16 sps:$4 sm:$0xff]   ;;  %v8481_v58 = vld [vmem:[%s12093_s1 + $0x5ac] ss:$16 sps:$4 sm:$0xff]  }
  0x78   :  { %2630 = vmatprep.subr.bf16.mxu0 %v8385_v59  ;;  %2888 = vmatprep.subr.bf16.mxu1 %v8388_v60  ;;  %v8476_v59 = vld [vmem:[%s12093_s1 + $0x5a0] ss:$16 sps:$4 sm:$0xff]   ;;  %v8479_v60 = vld [vmem:[%s12093_s1 + $0x5a8] ss:$16 sps:$4 sm:$0xff]  }
  0x7b   :  { %2631 = vmatpush1.bf16.msra.mxu0 %v8383_v61  ;;  %2889 = vmatpush1.bf16.msra.mxu1 %v8386_v62  ;;  %v8484_v61 = vld [vmem:[%s12093_s1 + $0x5c4] ss:$16 sps:$4 sm:$0xff]   ;;  %v8487_v62 = vld [vmem:[%s12093_s1 + $0x5cc] ss:$16 sps:$4 sm:$0xff]  }
  0x7c   :  { %2632 = vmatprep.subr.bf16.mxu0 %v8391_v63  ;;  %2890 = vmatprep.subr.bf16.mxu1 %v8394_v0  ;;  %v8482_v63 = vld [vmem:[%s12093_s1 + $0x5c0] ss:$16 sps:$4 sm:$0xff]   ;;  %v8485_v0 = vld [vmem:[%s12093_s1 + $0x5c8] ss:$16 sps:$4 sm:$0xff]  }
  0x7f   :  { %2633 = vmatpush1.bf16.msra.mxu0 %v8389_v1  ;;  %2891 = vmatpush1.bf16.msra.mxu1 %v8392_v2  ;;  %v8490_v1 = vld [vmem:[%s12093_s1 + $0x5e4] ss:$16 sps:$4 sm:$0xff]   ;;  %v8493_v2 = vld [vmem:[%s12093_s1 + $0x5ec] ss:$16 sps:$4 sm:$0xff]  }
  0x80   :  { %2645 = vmatprep.subr.bf16.mxu0 %v8400_v3  ;;  %2903 = vmatprep.subr.bf16.mxu1 %v8403_v4  ;;  %v8488_v3 = vld [vmem:[%s12093_s1 + $0x5e0] ss:$16 sps:$4 sm:$0xff]   ;;  %v8491_v4 = vld [vmem:[%s12093_s1 + $0x5e8] ss:$16 sps:$4 sm:$0xff]  }
  0x82   :  { %2635 = vmatmul.mubr.bf16.vlgmr.msra.gmra.mrb[0].mxu0 %v8395_v5  ;;  %2893 = vmatmul.mubr.bf16.vlgmr.msra.gmra.mrb[0].mxu1 %v8395_v5  ;;  %v8499_v5 = vld [vmem:[%s12093_s1 + $0x604] ss:$16 sps:$4 sm:$0xff]  }
  0x83   :  { %2646 = vmatpush1.bf16.msra.mxu0 %v8398_v6  ;;  %2904 = vmatpush1.bf16.msra.mxu1 %v8401_v7  ;;  %v8502_v6 = vld [vmem:[%s12093_s1 + $0x60c] ss:$16 sps:$4 sm:$0xff]   ;;  %v8494_v7 = vld [vmem:[%s12092_s0 + $0x10] ss:$48 sps:$4 sm:$0xff]  }
  0x84   :  { %2647 = vmatprep.subr.bf16.mxu0 %v8406_v8  ;;  %2905 = vmatprep.subr.bf16.mxu1 %v8409_v9  ;;  %v8497_v8 = vld [vmem:[%s12093_s1 + $0x600] ss:$16 sps:$4 sm:$0xff]   ;;  %v8500_v9 = vld [vmem:[%s12093_s1 + $0x608] ss:$16 sps:$4 sm:$0xff]  }
  0x85   :  { %2677 = vmatprep.mubr.bf16.mxu0 %v8496_v12  ;;  %2935 = vmatprep.mubr.bf16.mxu1 %v8496_v12  ;;  %v8595_v12 = vld [vmem:[%s12092_s0 + $0x1c] ss:$48 sps:$4 sm:$0xff]  }
  0x87   :  { %2648 = vmatpush1.bf16.msra.mxu0 %v8404_v10  ;;  %2906 = vmatpush1.bf16.msra.mxu1 %v8407_v11  ;;  %v8505_v10 = vld [vmem:[%s12093_s1 + $0x624] ss:$16 sps:$4 sm:$0xff]   ;;  %v8508_v11 = vld [vmem:[%s12093_s1 + $0x62c] ss:$16 sps:$4 sm:$0xff]  }
  0x88   :  { %2649 = vmatprep.subr.bf16.mxu0 %v8412_v13  ;;  %2907 = vmatprep.subr.bf16.mxu1 %v8415_v14  ;;  %v8503_v13 = vld [vmem:[%s12093_s1 + $0x620] ss:$16 sps:$4 sm:$0xff]   ;;  %v8506_v14 = vld [vmem:[%s12093_s1 + $0x628] ss:$16 sps:$4 sm:$0xff]  }
  0x8b   :  { %2650 = vmatpush1.bf16.msra.mxu0 %v8410_v15  ;;  %2908 = vmatpush1.bf16.msra.mxu1 %v8413_v16  ;;  %v8511_v15 = vld [vmem:[%s12093_s1 + $0x644] ss:$16 sps:$4 sm:$0xff]   ;;  %v8514_v16 = vld [vmem:[%s12093_s1 + $0x64c] ss:$16 sps:$4 sm:$0xff]  }
  0x8c   :  { %2651 = vmatprep.subr.bf16.mxu0 %v8418_v17  ;;  %2909 = vmatprep.subr.bf16.mxu1 %v8421_v18  ;;  %v8509_v17 = vld [vmem:[%s12093_s1 + $0x640] ss:$16 sps:$4 sm:$0xff]   ;;  %v8512_v18 = vld [vmem:[%s12093_s1 + $0x648] ss:$16 sps:$4 sm:$0xff]  }
  0x8f   :  { %2652 = vmatpush1.bf16.msra.mxu0 %v8416_v19  ;;  %2910 = vmatpush1.bf16.msra.mxu1 %v8419_v20  ;;  %v8517_v19 = vld [vmem:[%s12093_s1 + $0x664] ss:$16 sps:$4 sm:$0xff]   ;;  %v8520_v20 = vld [vmem:[%s12093_s1 + $0x66c] ss:$16 sps:$4 sm:$0xff]  }
  0x90   :  { %2653 = vmatprep.subr.bf16.mxu0 %v8424_v21  ;;  %2911 = vmatprep.subr.bf16.mxu1 %v8427_v22  ;;  %v8515_v21 = vld [vmem:[%s12093_s1 + $0x660] ss:$16 sps:$4 sm:$0xff]   ;;  %v8518_v22 = vld [vmem:[%s12093_s1 + $0x668] ss:$16 sps:$4 sm:$0xff]  }
  0x93   :  { %2654 = vmatpush1.bf16.msra.mxu0 %v8422_v23  ;;  %2912 = vmatpush1.bf16.msra.mxu1 %v8425_v24  ;;  %v8523_v23 = vld [vmem:[%s12093_s1 + $0x684] ss:$16 sps:$4 sm:$0xff]   ;;  %v8526_v24 = vld [vmem:[%s12093_s1 + $0x68c] ss:$16 sps:$4 sm:$0xff]  }
  0x94   :  { %2655 = vmatprep.subr.bf16.mxu0 %v8430_v25  ;;  %2913 = vmatprep.subr.bf16.mxu1 %v8433_v26  ;;  %v8521_v25 = vld [vmem:[%s12093_s1 + $0x680] ss:$16 sps:$4 sm:$0xff]   ;;  %v8524_v26 = vld [vmem:[%s12093_s1 + $0x688] ss:$16 sps:$4 sm:$0xff]  }
  0x97   :  { %2656 = vmatpush1.bf16.msra.mxu0 %v8428_v27  ;;  %2914 = vmatpush1.bf16.msra.mxu1 %v8431_v28  ;;  %v8529_v27 = vld [vmem:[%s12093_s1 + $0x6a4] ss:$16 sps:$4 sm:$0xff]   ;;  %v8532_v28 = vld [vmem:[%s12093_s1 + $0x6ac] ss:$16 sps:$4 sm:$0xff]  }
  0x98   :  { %2657 = vmatprep.subr.bf16.mxu0 %v8436_v29  ;;  %2915 = vmatprep.subr.bf16.mxu1 %v8439_v30  ;;  %v8527_v29 = vld [vmem:[%s12093_s1 + $0x6a0] ss:$16 sps:$4 sm:$0xff]   ;;  %v8530_v30 = vld [vmem:[%s12093_s1 + $0x6a8] ss:$16 sps:$4 sm:$0xff]  }
  0x9b   :  { %2658 = vmatpush1.bf16.msra.mxu0 %v8434_v31  ;;  %2916 = vmatpush1.bf16.msra.mxu1 %v8437_v32  ;;  %v8535_v31 = vld [vmem:[%s12093_s1 + $0x6c4] ss:$16 sps:$4 sm:$0xff]   ;;  %v8538_v32 = vld [vmem:[%s12093_s1 + $0x6cc] ss:$16 sps:$4 sm:$0xff]  }
  0x9c   :  { %2659 = vmatprep.subr.bf16.mxu0 %v8442_v33  ;;  %2917 = vmatprep.subr.bf16.mxu1 %v8445_v34  ;;  %v8533_v33 = vld [vmem:[%s12093_s1 + $0x6c0] ss:$16 sps:$4 sm:$0xff]   ;;  %v8536_v34 = vld [vmem:[%s12093_s1 + $0x6c8] ss:$16 sps:$4 sm:$0xff]  }
  0x9f   :  { %2660 = vmatpush1.bf16.msra.mxu0 %v8440_v35  ;;  %2918 = vmatpush1.bf16.msra.mxu1 %v8443_v36  ;;  %v8541_v35 = vld [vmem:[%s12093_s1 + $0x6e4] ss:$16 sps:$4 sm:$0xff]   ;;  %v8544_v36 = vld [vmem:[%s12093_s1 + $0x6ec] ss:$16 sps:$4 sm:$0xff]  }
  0xa0   :  { %2661 = vmatprep.subr.bf16.mxu0 %v8448_v37  ;;  %2919 = vmatprep.subr.bf16.mxu1 %v8451_v38  ;;  %v8539_v37 = vld [vmem:[%s12093_s1 + $0x6e0] ss:$16 sps:$4 sm:$0xff]   ;;  %v8542_v38 = vld [vmem:[%s12093_s1 + $0x6e8] ss:$16 sps:$4 sm:$0xff]  }
  0xa3   :  { %2662 = vmatpush1.bf16.msra.mxu0 %v8446_v39  ;;  %2920 = vmatpush1.bf16.msra.mxu1 %v8449_v40  ;;  %v8547_v39 = vld [vmem:[%s12093_s1 + $0x704] ss:$16 sps:$4 sm:$0xff]   ;;  %v8550_v40 = vld [vmem:[%s12093_s1 + $0x70c] ss:$16 sps:$4 sm:$0xff]  }
  0xa4   :  { %2663 = vmatprep.subr.bf16.mxu0 %v8454_v41  ;;  %2921 = vmatprep.subr.bf16.mxu1 %v8457_v42  ;;  %v8545_v41 = vld [vmem:[%s12093_s1 + $0x700] ss:$16 sps:$4 sm:$0xff]   ;;  %v8548_v42 = vld [vmem:[%s12093_s1 + $0x708] ss:$16 sps:$4 sm:$0xff]  }
  0xa7   :  { %2664 = vmatpush1.bf16.msra.mxu0 %v8452_v43  ;;  %2922 = vmatpush1.bf16.msra.mxu1 %v8455_v44  ;;  %v8553_v43 = vld [vmem:[%s12093_s1 + $0x724] ss:$16 sps:$4 sm:$0xff]   ;;  %v8556_v44 = vld [vmem:[%s12093_s1 + $0x72c] ss:$16 sps:$4 sm:$0xff]  }
  0xa8   :  { %2665 = vmatprep.subr.bf16.mxu0 %v8460_v45  ;;  %2923 = vmatprep.subr.bf16.mxu1 %v8463_v46  ;;  %v8551_v45 = vld [vmem:[%s12093_s1 + $0x720] ss:$16 sps:$4 sm:$0xff]   ;;  %v8554_v46 = vld [vmem:[%s12093_s1 + $0x728] ss:$16 sps:$4 sm:$0xff]  }
  0xab   :  { %2666 = vmatpush1.bf16.msra.mxu0 %v8458_v47  ;;  %2924 = vmatpush1.bf16.msra.mxu1 %v8461_v48  ;;  %v8559_v47 = vld [vmem:[%s12093_s1 + $0x744] ss:$16 sps:$4 sm:$0xff]   ;;  %v8562_v48 = vld [vmem:[%s12093_s1 + $0x74c] ss:$16 sps:$4 sm:$0xff]  }
  0xac   :  { %2667 = vmatprep.subr.bf16.mxu0 %v8466_v49  ;;  %2925 = vmatprep.subr.bf16.mxu1 %v8469_v50  ;;  %v8557_v49 = vld [vmem:[%s12093_s1 + $0x740] ss:$16 sps:$4 sm:$0xff]   ;;  %v8560_v50 = vld [vmem:[%s12093_s1 + $0x748] ss:$16 sps:$4 sm:$0xff]  }
  0xaf   :  { %2668 = vmatpush1.bf16.msra.mxu0 %v8464_v51  ;;  %2926 = vmatpush1.bf16.msra.mxu1 %v8467_v52  ;;  %v8565_v51 = vld [vmem:[%s12093_s1 + $0x764] ss:$16 sps:$4 sm:$0xff]   ;;  %v8568_v52 = vld [vmem:[%s12093_s1 + $0x76c] ss:$16 sps:$4 sm:$0xff]  }
  0xb0   :  { %2669 = vmatprep.subr.bf16.mxu0 %v8472_v53  ;;  %2927 = vmatprep.subr.bf16.mxu1 %v8475_v54  ;;  %v8563_v53 = vld [vmem:[%s12093_s1 + $0x760] ss:$16 sps:$4 sm:$0xff]   ;;  %v8566_v54 = vld [vmem:[%s12093_s1 + $0x768] ss:$16 sps:$4 sm:$0xff]  }
  0xb3   :  { %2670 = vmatpush1.bf16.msra.mxu0 %v8470_v55  ;;  %2928 = vmatpush1.bf16.msra.mxu1 %v8473_v56  ;;  %v8571_v55 = vld [vmem:[%s12093_s1 + $0x784] ss:$16 sps:$4 sm:$0xff]   ;;  %v8574_v56 = vld [vmem:[%s12093_s1 + $0x78c] ss:$16 sps:$4 sm:$0xff]  }
  0xb4   :  { %2671 = vmatprep.subr.bf16.mxu0 %v8478_v57  ;;  %2929 = vmatprep.subr.bf16.mxu1 %v8481_v58  ;;  %v8569_v57 = vld [vmem:[%s12093_s1 + $0x780] ss:$16 sps:$4 sm:$0xff]   ;;  %v8572_v58 = vld [vmem:[%s12093_s1 + $0x788] ss:$16 sps:$4 sm:$0xff]  }
  0xb7   :  { %2672 = vmatpush1.bf16.msra.mxu0 %v8476_v59  ;;  %2930 = vmatpush1.bf16.msra.mxu1 %v8479_v60  ;;  %v8577_v59 = vld [vmem:[%s12093_s1 + $0x7a4] ss:$16 sps:$4 sm:$0xff]   ;;  %v8580_v60 = vld [vmem:[%s12093_s1 + $0x7ac] ss:$16 sps:$4 sm:$0xff]  }
  0xb8   :  { %2673 = vmatprep.subr.bf16.mxu0 %v8484_v61  ;;  %2931 = vmatprep.subr.bf16.mxu1 %v8487_v62  ;;  %v8575_v61 = vld [vmem:[%s12093_s1 + $0x7a0] ss:$16 sps:$4 sm:$0xff]   ;;  %v8578_v62 = vld [vmem:[%s12093_s1 + $0x7a8] ss:$16 sps:$4 sm:$0xff]  }
  0xbb   :  { %2674 = vmatpush1.bf16.msra.mxu0 %v8482_v63  ;;  %2932 = vmatpush1.bf16.msra.mxu1 %v8485_v0  ;;  %v8583_v63 = vld [vmem:[%s12093_s1 + $0x7c4] ss:$16 sps:$4 sm:$0xff]   ;;  %v8586_v0 = vld [vmem:[%s12093_s1 + $0x7cc] ss:$16 sps:$4 sm:$0xff]  }
  0xbc   :  { %2675 = vmatprep.subr.bf16.mxu0 %v8490_v1  ;;  %2933 = vmatprep.subr.bf16.mxu1 %v8493_v2  ;;  %v8581_v1 = vld [vmem:[%s12093_s1 + $0x7c0] ss:$16 sps:$4 sm:$0xff]   ;;  %v8584_v2 = vld [vmem:[%s12093_s1 + $0x7c8] ss:$16 sps:$4 sm:$0xff]  }
  0xbf   :  { %2676 = vmatpush1.bf16.msra.mxu0 %v8488_v3  ;;  %2934 = vmatpush1.bf16.msra.mxu1 %v8491_v4  ;;  %v8589_v3 = vld [vmem:[%s12093_s1 + $0x7e4] ss:$16 sps:$4 sm:$0xff]   ;;  %v8592_v4 = vld [vmem:[%s12093_s1 + $0x7ec] ss:$16 sps:$4 sm:$0xff]  }
  0xc0   :  { %2688 = vmatprep.subr.bf16.mxu0 %v8499_v5  ;;  %2946 = vmatprep.subr.bf16.mxu1 %v8502_v6  ;;  %v8587_v5 = vld [vmem:[%s12093_s1 + $0x7e0] ss:$16 sps:$4 sm:$0xff]   ;;  %v8590_v6 = vld [vmem:[%s12093_s1 + $0x7e8] ss:$16 sps:$4 sm:$0xff]  }
  0xc2   :  { %2678 = vmatmul.mubr.bf16.vlgmr.msra.gmra.mrb[0].mxu0 %v8494_v7  ;;  %2936 = vmatmul.mubr.bf16.vlgmr.msra.gmra.mrb[0].mxu1 %v8494_v7  ;;  %v8598_v7 = vld [vmem:[%s12093_s1 + $0x804] ss:$16 sps:$4 sm:$0xff]  }
  0xc3   :  { %2689 = vmatpush1.bf16.msra.mxu0 %v8497_v8  ;;  %2947 = vmatpush1.bf16.msra.mxu1 %v8500_v9  ;;  %v8601_v8 = vld [vmem:[%s12093_s1 + $0x80c] ss:$16 sps:$4 sm:$0xff]   ;;  %v8593_v9 = vld [vmem:[%s12092_s0 + $0x18] ss:$48 sps:$4 sm:$0xff]  }
  0xc4   :  { %2690 = vmatprep.subr.bf16.mxu0 %v8505_v10  ;;  %2948 = vmatprep.subr.bf16.mxu1 %v8508_v11  ;;  %v8596_v10 = vld [vmem:[%s12093_s1 + $0x800] ss:$16 sps:$4 sm:$0xff]   ;;  %v8599_v11 = vld [vmem:[%s12093_s1 + $0x808] ss:$16 sps:$4 sm:$0xff]  }
  0xc5   :  { %2720 = vmatprep.mubr.bf16.mxu0 %v8595_v12  ;;  %2978 = vmatprep.mubr.bf16.mxu1 %v8595_v12  ;;  %v8604_v12 = vld [vmem:[%s12093_s1 + $0x824] ss:$16 sps:$4 sm:$0xff]  }
  0xc7   :  { %2691 = vmatpush1.bf16.msra.mxu0 %v8503_v13  ;;  %2949 = vmatpush1.bf16.msra.mxu1 %v8506_v14  ;;  %v8607_v13 = vld [vmem:[%s12093_s1 + $0x82c] ss:$16 sps:$4 sm:$0xff]   ;;  %v8694_v14 = vld [vmem:[%s12092_s0 + $0x24] ss:$48 sps:$4 sm:$0xff]  }
  0xc8   :  { %2692 = vmatprep.subr.bf16.mxu0 %v8511_v15  ;;  %2950 = vmatprep.subr.bf16.mxu1 %v8514_v16  ;;  %v8602_v15 = vld [vmem:[%s12093_s1 + $0x820] ss:$16 sps:$4 sm:$0xff]   ;;  %v8605_v16 = vld [vmem:[%s12093_s1 + $0x828] ss:$16 sps:$4 sm:$0xff]  }
  0xcb   :  { %2693 = vmatpush1.bf16.msra.mxu0 %v8509_v17  ;;  %2951 = vmatpush1.bf16.msra.mxu1 %v8512_v18  ;;  %v8610_v17 = vld [vmem:[%s12093_s1 + $0x844] ss:$16 sps:$4 sm:$0xff]   ;;  %v8613_v18 = vld [vmem:[%s12093_s1 + $0x84c] ss:$16 sps:$4 sm:$0xff]  }
  0xcc   :  { %2694 = vmatprep.subr.bf16.mxu0 %v8517_v19  ;;  %2952 = vmatprep.subr.bf16.mxu1 %v8520_v20  ;;  %v8608_v19 = vld [vmem:[%s12093_s1 + $0x840] ss:$16 sps:$4 sm:$0xff]   ;;  %v8611_v20 = vld [vmem:[%s12093_s1 + $0x848] ss:$16 sps:$4 sm:$0xff]  }
  0xcf   :  { %2695 = vmatpush1.bf16.msra.mxu0 %v8515_v21  ;;  %2953 = vmatpush1.bf16.msra.mxu1 %v8518_v22  ;;  %v8616_v21 = vld [vmem:[%s12093_s1 + $0x864] ss:$16 sps:$4 sm:$0xff]   ;;  %v8619_v22 = vld [vmem:[%s12093_s1 + $0x86c] ss:$16 sps:$4 sm:$0xff]  }
  0xd0   :  { %2696 = vmatprep.subr.bf16.mxu0 %v8523_v23  ;;  %2954 = vmatprep.subr.bf16.mxu1 %v8526_v24  ;;  %v8614_v23 = vld [vmem:[%s12093_s1 + $0x860] ss:$16 sps:$4 sm:$0xff]   ;;  %v8617_v24 = vld [vmem:[%s12093_s1 + $0x868] ss:$16 sps:$4 sm:$0xff]  }
  0xd3   :  { %2697 = vmatpush1.bf16.msra.mxu0 %v8521_v25  ;;  %2955 = vmatpush1.bf16.msra.mxu1 %v8524_v26  ;;  %v8622_v25 = vld [vmem:[%s12093_s1 + $0x884] ss:$16 sps:$4 sm:$0xff]   ;;  %v8625_v26 = vld [vmem:[%s12093_s1 + $0x88c] ss:$16 sps:$4 sm:$0xff]  }
  0xd4   :  { %2698 = vmatprep.subr.bf16.mxu0 %v8529_v27  ;;  %2956 = vmatprep.subr.bf16.mxu1 %v8532_v28  ;;  %v8620_v27 = vld [vmem:[%s12093_s1 + $0x880] ss:$16 sps:$4 sm:$0xff]   ;;  %v8623_v28 = vld [vmem:[%s12093_s1 + $0x888] ss:$16 sps:$4 sm:$0xff]  }
  0xd7   :  { %2699 = vmatpush1.bf16.msra.mxu0 %v8527_v29  ;;  %2957 = vmatpush1.bf16.msra.mxu1 %v8530_v30  ;;  %v8628_v29 = vld [vmem:[%s12093_s1 + $0x8a4] ss:$16 sps:$4 sm:$0xff]   ;;  %v8631_v30 = vld [vmem:[%s12093_s1 + $0x8ac] ss:$16 sps:$4 sm:$0xff]  }
  0xd8   :  { %2700 = vmatprep.subr.bf16.mxu0 %v8535_v31  ;;  %2958 = vmatprep.subr.bf16.mxu1 %v8538_v32  ;;  %v8626_v31 = vld [vmem:[%s12093_s1 + $0x8a0] ss:$16 sps:$4 sm:$0xff]   ;;  %v8629_v32 = vld [vmem:[%s12093_s1 + $0x8a8] ss:$16 sps:$4 sm:$0xff]  }
  0xdb   :  { %2701 = vmatpush1.bf16.msra.mxu0 %v8533_v33  ;;  %2959 = vmatpush1.bf16.msra.mxu1 %v8536_v34  ;;  %v8634_v33 = vld [vmem:[%s12093_s1 + $0x8c4] ss:$16 sps:$4 sm:$0xff]   ;;  %v8637_v34 = vld [vmem:[%s12093_s1 + $0x8cc] ss:$16 sps:$4 sm:$0xff]  }
  0xdc   :  { %2702 = vmatprep.subr.bf16.mxu0 %v8541_v35  ;;  %2960 = vmatprep.subr.bf16.mxu1 %v8544_v36  ;;  %v8632_v35 = vld [vmem:[%s12093_s1 + $0x8c0] ss:$16 sps:$4 sm:$0xff]   ;;  %v8635_v36 = vld [vmem:[%s12093_s1 + $0x8c8] ss:$16 sps:$4 sm:$0xff]  }
  0xdf   :  { %2703 = vmatpush1.bf16.msra.mxu0 %v8539_v37  ;;  %2961 = vmatpush1.bf16.msra.mxu1 %v8542_v38  ;;  %v8640_v37 = vld [vmem:[%s12093_s1 + $0x8e4] ss:$16 sps:$4 sm:$0xff]   ;;  %v8643_v38 = vld [vmem:[%s12093_s1 + $0x8ec] ss:$16 sps:$4 sm:$0xff]  }
  0xe0   :  { %2704 = vmatprep.subr.bf16.mxu0 %v8547_v39  ;;  %2962 = vmatprep.subr.bf16.mxu1 %v8550_v40 }
  0xe3   :  { %2705 = vmatpush1.bf16.msra.mxu0 %v8545_v41  ;;  %2963 = vmatpush1.bf16.msra.mxu1 %v8548_v42 }
  0xe4   :  { %2706 = vmatprep.subr.bf16.mxu0 %v8553_v43  ;;  %2964 = vmatprep.subr.bf16.mxu1 %v8556_v44 }
  0xe7   :  { %2707 = vmatpush1.bf16.msra.mxu0 %v8551_v45  ;;  %2965 = vmatpush1.bf16.msra.mxu1 %v8554_v46 }
  0xe8   :  { %2708 = vmatprep.subr.bf16.mxu0 %v8559_v47  ;;  %2966 = vmatprep.subr.bf16.mxu1 %v8562_v48 }
  0xeb   :  { %2709 = vmatpush1.bf16.msra.mxu0 %v8557_v49  ;;  %2967 = vmatpush1.bf16.msra.mxu1 %v8560_v50 }
  0xec   :  { %2710 = vmatprep.subr.bf16.mxu0 %v8565_v51  ;;  %2968 = vmatprep.subr.bf16.mxu1 %v8568_v52 }
  0xef   :  { %2711 = vmatpush1.bf16.msra.mxu0 %v8563_v53  ;;  %2969 = vmatpush1.bf16.msra.mxu1 %v8566_v54 }
  0xf0   :  { %2712 = vmatprep.subr.bf16.mxu0 %v8571_v55  ;;  %2970 = vmatprep.subr.bf16.mxu1 %v8574_v56 }
  0xf3   :  { %2713 = vmatpush1.bf16.msra.mxu0 %v8569_v57  ;;  %2971 = vmatpush1.bf16.msra.mxu1 %v8572_v58 }
  0xf4   :  { %2714 = vmatprep.subr.bf16.mxu0 %v8577_v59  ;;  %2972 = vmatprep.subr.bf16.mxu1 %v8580_v60 }
  0xf7   :  { %2715 = vmatpush1.bf16.msra.mxu0 %v8575_v61  ;;  %2973 = vmatpush1.bf16.msra.mxu1 %v8578_v62 }
  0xf8   :  { %2716 = vmatprep.subr.bf16.mxu0 %v8583_v63  ;;  %2974 = vmatprep.subr.bf16.mxu1 %v8586_v0 }
  0xfb   :  { %2717 = vmatpush1.bf16.msra.mxu0 %v8581_v1  ;;  %2975 = vmatpush1.bf16.msra.mxu1 %v8584_v2 }
  0xfc   :  { %2718 = vmatprep.subr.bf16.mxu0 %v8589_v3  ;;  %2976 = vmatprep.subr.bf16.mxu1 %v8592_v4 }
  0xff   :  { %2719 = vmatpush1.bf16.msra.mxu0 %v8587_v5  ;;  %2977 = vmatpush1.bf16.msra.mxu1 %v8590_v6 }
 0x100   :  { %2731 = vmatprep.subr.bf16.mxu0 %v8598_v7  ;;  %2989 = vmatprep.subr.bf16.mxu1 %v8601_v8 }
 0x102   :  { %2721 = vmatmul.mubr.bf16.vlgmr.msra.gmra.mrb[0].mxu0 %v8593_v9  ;;  %2979 = vmatmul.mubr.bf16.vlgmr.msra.gmra.mrb[0].mxu1 %v8593_v9 }
 0x103   :  { %2732 = vmatpush1.bf16.msra.mxu0 %v8596_v10  ;;  %2990 = vmatpush1.bf16.msra.mxu1 %v8599_v11 }
 0x104   :  { %2733 = vmatprep.subr.bf16.mxu0 %v8604_v12  ;;  %2991 = vmatprep.subr.bf16.mxu1 %v8607_v13 }
 0x105   :  { %2763 = vmatprep.mubr.bf16.mxu0 %v8694_v14  ;;  %3021 = vmatprep.mubr.bf16.mxu1 %v8694_v14 }
 0x107   :  { %2734 = vmatpush1.bf16.msra.mxu0 %v8602_v15  ;;  %2992 = vmatpush1.bf16.msra.mxu1 %v8605_v16 }
 0x108   :  { %2735 = vmatprep.subr.bf16.mxu0 %v8610_v17  ;;  %2993 = vmatprep.subr.bf16.mxu1 %v8613_v18 }
 0x10b   :  { %2736 = vmatpush1.bf16.msra.mxu0 %v8608_v19  ;;  %2994 = vmatpush1.bf16.msra.mxu1 %v8611_v20 }
 0x10c   :  { %2737 = vmatprep.subr.bf16.mxu0 %v8616_v21  ;;  %2995 = vmatprep.subr.bf16.mxu1 %v8619_v22 }
 0x10f   :  { %2738 = vmatpush1.bf16.msra.mxu0 %v8614_v23  ;;  %2996 = vmatpush1.bf16.msra.mxu1 %v8617_v24 }
 0x110   :  { %2739 = vmatprep.subr.bf16.mxu0 %v8622_v25  ;;  %2997 = vmatprep.subr.bf16.mxu1 %v8625_v26 }
 0x113   :  { %2740 = vmatpush1.bf16.msra.mxu0 %v8620_v27  ;;  %2998 = vmatpush1.bf16.msra.mxu1 %v8623_v28 }
 0x114   :  { %2741 = vmatprep.subr.bf16.mxu0 %v8628_v29  ;;  %2999 = vmatprep.subr.bf16.mxu1 %v8631_v30 }
 0x117   :  { %2742 = vmatpush1.bf16.msra.mxu0 %v8626_v31  ;;  %3000 = vmatpush1.bf16.msra.mxu1 %v8629_v32 }
 0x118   :  { %2743 = vmatprep.subr.bf16.mxu0 %v8634_v33  ;;  %3001 = vmatprep.subr.bf16.mxu1 %v8637_v34 }
 0x119   :  { %14 = vsyncpa [#allocation3], 0  ;;  %v8638_v39 = vld [vmem:[%s12093_s1 + $0x8e0] ss:$16 sps:$4 sm:$0xff]   ;;  %v8641_v40 = vld [vmem:[%s12093_s1 + $0x8e8] ss:$16 sps:$4 sm:$0xff]  }
 0x11a   :  { %v8646_v41 = vld [vmem:[%s12093_s1 + $0x904] ss:$16 sps:$4 sm:$0xff]   ;;  %v8649_v42 = vld [vmem:[%s12093_s1 + $0x90c] ss:$16 sps:$4 sm:$0xff]   ;;  %v8644_v43 = vld [vmem:[%s12093_s1 + $0x900] ss:$16 sps:$4 sm:$0xff]  }
 0x11b   :  { %2744 = vmatpush1.bf16.msra.mxu0 %v8632_v35  ;;  %3002 = vmatpush1.bf16.msra.mxu1 %v8635_v36  ;;  %v8647_v44 = vld [vmem:[%s12093_s1 + $0x908] ss:$16 sps:$4 sm:$0xff]   ;;  %v8652_v45 = vld [vmem:[%s12093_s1 + $0x924] ss:$16 sps:$4 sm:$0xff]   ;;  %v8655_v46 = vld [vmem:[%s12093_s1 + $0x92c] ss:$16 sps:$4 sm:$0xff]  }
 0x11c   :  { %2745 = vmatprep.subr.bf16.mxu0 %v8640_v37  ;;  %3003 = vmatprep.subr.bf16.mxu1 %v8643_v38  ;;  %v8650_v47 = vld [vmem:[%s12093_s1 + $0x920] ss:$16 sps:$4 sm:$0xff]   ;;  %v8653_v48 = vld [vmem:[%s12093_s1 + $0x928] ss:$16 sps:$4 sm:$0xff]   ;;  %v8658_v49 = vld [vmem:[%s12093_s1 + $0x944] ss:$16 sps:$4 sm:$0xff]  }
 0x11d   :  { %v8661_v50 = vld [vmem:[%s12093_s1 + $0x94c] ss:$16 sps:$4 sm:$0xff]   ;;  %v8656_v51 = vld [vmem:[%s12093_s1 + $0x940] ss:$16 sps:$4 sm:$0xff]   ;;  %v8659_v52 = vld [vmem:[%s12093_s1 + $0x948] ss:$16 sps:$4 sm:$0xff]  }
 0x11e   :  { %v8664_v53 = vld [vmem:[%s12093_s1 + $0x964] ss:$16 sps:$4 sm:$0xff]   ;;  %v8667_v54 = vld [vmem:[%s12093_s1 + $0x96c] ss:$16 sps:$4 sm:$0xff]   ;;  %v8662_v55 = vld [vmem:[%s12093_s1 + $0x960] ss:$16 sps:$4 sm:$0xff]  }
 0x11f   :  { %2746 = vmatpush1.bf16.msra.mxu0 %v8638_v39  ;;  %3004 = vmatpush1.bf16.msra.mxu1 %v8641_v40  ;;  %v8665_v56 = vld [vmem:[%s12093_s1 + $0x968] ss:$16 sps:$4 sm:$0xff]   ;;  %v8670_v57 = vld [vmem:[%s12093_s1 + $0x984] ss:$16 sps:$4 sm:$0xff]   ;;  %v8673_v58 = vld [vmem:[%s12093_s1 + $0x98c] ss:$16 sps:$4 sm:$0xff]  }
 0x120   :  { %2747 = vmatprep.subr.bf16.mxu0 %v8646_v41  ;;  %3005 = vmatprep.subr.bf16.mxu1 %v8649_v42  ;;  %v8668_v59 = vld [vmem:[%s12093_s1 + $0x980] ss:$16 sps:$4 sm:$0xff]   ;;  %v8671_v60 = vld [vmem:[%s12093_s1 + $0x988] ss:$16 sps:$4 sm:$0xff]   ;;  %v8676_v61 = vld [vmem:[%s12093_s1 + $0x9a4] ss:$16 sps:$4 sm:$0xff]  }
 0x121   :  { %v8679_v62 = vld [vmem:[%s12093_s1 + $0x9ac] ss:$16 sps:$4 sm:$0xff]   ;;  %v8674_v63 = vld [vmem:[%s12093_s1 + $0x9a0] ss:$16 sps:$4 sm:$0xff]   ;;  %v8677_v0 = vld [vmem:[%s12093_s1 + $0x9a8] ss:$16 sps:$4 sm:$0xff]  }
 0x122   :  { %v8682_v1 = vld [vmem:[%s12093_s1 + $0x9c4] ss:$16 sps:$4 sm:$0xff]   ;;  %v8685_v2 = vld [vmem:[%s12093_s1 + $0x9cc] ss:$16 sps:$4 sm:$0xff]   ;;  %v8680_v3 = vld [vmem:[%s12093_s1 + $0x9c0] ss:$16 sps:$4 sm:$0xff]  }
 0x123   :  { %2748 = vmatpush1.bf16.msra.mxu0 %v8644_v43  ;;  %3006 = vmatpush1.bf16.msra.mxu1 %v8647_v44  ;;  %v8683_v4 = vld [vmem:[%s12093_s1 + $0x9c8] ss:$16 sps:$4 sm:$0xff]   ;;  %v8688_v5 = vld [vmem:[%s12093_s1 + $0x9e4] ss:$16 sps:$4 sm:$0xff]   ;;  %v8691_v6 = vld [vmem:[%s12093_s1 + $0x9ec] ss:$16 sps:$4 sm:$0xff]  }
 0x124   :  { %2749 = vmatprep.subr.bf16.mxu0 %v8652_v45  ;;  %3007 = vmatprep.subr.bf16.mxu1 %v8655_v46  ;;  %v8686_v7 = vld [vmem:[%s12093_s1 + $0x9e0] ss:$16 sps:$4 sm:$0xff]   ;;  %v8689_v8 = vld [vmem:[%s12093_s1 + $0x9e8] ss:$16 sps:$4 sm:$0xff]   ;;  %v8697_v9 = vld [vmem:[%s12093_s1 + $0xa04] ss:$16 sps:$4 sm:$0xff]  }
 0x125   :  { %v8700_v10 = vld [vmem:[%s12093_s1 + $0xa0c] ss:$16 sps:$4 sm:$0xff]   ;;  %v8692_v11 = vld [vmem:[%s12092_s0 + $0x20] ss:$48 sps:$4 sm:$0xff]   ;;  %v8698_v13 = vld [vmem:[%s12093_s1 + $0xa08] ss:$16 sps:$4 sm:$0xff]  }
 0x126   :  { %v8695_v12 = vld [vmem:[%s12093_s1 + $0xa00] ss:$16 sps:$4 sm:$0xff]   ;;  %v8703_v14 = vld [vmem:[%s12093_s1 + $0xa24] ss:$16 sps:$4 sm:$0xff]   ;;  %v8706_v15 = vld [vmem:[%s12093_s1 + $0xa2c] ss:$16 sps:$4 sm:$0xff]  }
 0x127   :  { %2750 = vmatpush1.bf16.msra.mxu0 %v8650_v47  ;;  %3008 = vmatpush1.bf16.msra.mxu1 %v8653_v48  ;;  %v8793_v16 = vld [vmem:[%s12092_s0 + $0x2c] ss:$48 sps:$4 sm:$0xff]   ;;  %v8701_v17 = vld [vmem:[%s12093_s1 + $0xa20] ss:$16 sps:$4 sm:$0xff]   ;;  %v8704_v18 = vld [vmem:[%s12093_s1 + $0xa28] ss:$16 sps:$4 sm:$0xff]  }
 0x128   :  { %2751 = vmatprep.subr.bf16.mxu0 %v8658_v49  ;;  %3009 = vmatprep.subr.bf16.mxu1 %v8661_v50  ;;  %v8709_v19 = vld [vmem:[%s12093_s1 + $0xa44] ss:$16 sps:$4 sm:$0xff]   ;;  %v8712_v20 = vld [vmem:[%s12093_s1 + $0xa4c] ss:$16 sps:$4 sm:$0xff]   ;;  %v8707_v21 = vld [vmem:[%s12093_s1 + $0xa40] ss:$16 sps:$4 sm:$0xff]  }
 0x129   :  { %v8710_v22 = vld [vmem:[%s12093_s1 + $0xa48] ss:$16 sps:$4 sm:$0xff]   ;;  %v8715_v23 = vld [vmem:[%s12093_s1 + $0xa64] ss:$16 sps:$4 sm:$0xff]   ;;  %v8718_v24 = vld [vmem:[%s12093_s1 + $0xa6c] ss:$16 sps:$4 sm:$0xff]  }
 0x12a   :  { %v8713_v25 = vld [vmem:[%s12093_s1 + $0xa60] ss:$16 sps:$4 sm:$0xff]   ;;  %v8716_v26 = vld [vmem:[%s12093_s1 + $0xa68] ss:$16 sps:$4 sm:$0xff]   ;;  %v8721_v27 = vld [vmem:[%s12093_s1 + $0xa84] ss:$16 sps:$4 sm:$0xff]  }
 0x12b   :  { %2752 = vmatpush1.bf16.msra.mxu0 %v8656_v51  ;;  %3010 = vmatpush1.bf16.msra.mxu1 %v8659_v52  ;;  %v8724_v28 = vld [vmem:[%s12093_s1 + $0xa8c] ss:$16 sps:$4 sm:$0xff]   ;;  %v8719_v29 = vld [vmem:[%s12093_s1 + $0xa80] ss:$16 sps:$4 sm:$0xff]   ;;  %v8722_v30 = vld [vmem:[%s12093_s1 + $0xa88] ss:$16 sps:$4 sm:$0xff]  }
 0x12c   :  { %2753 = vmatprep.subr.bf16.mxu0 %v8664_v53  ;;  %3011 = vmatprep.subr.bf16.mxu1 %v8667_v54  ;;  %v8727_v31 = vld [vmem:[%s12093_s1 + $0xaa4] ss:$16 sps:$4 sm:$0xff]   ;;  %v8730_v32 = vld [vmem:[%s12093_s1 + $0xaac] ss:$16 sps:$4 sm:$0xff]   ;;  %v8725_v33 = vld [vmem:[%s12093_s1 + $0xaa0] ss:$16 sps:$4 sm:$0xff]  }
 0x12d   :  { %v8728_v34 = vld [vmem:[%s12093_s1 + $0xaa8] ss:$16 sps:$4 sm:$0xff]   ;;  %v8733_v35 = vld [vmem:[%s12093_s1 + $0xac4] ss:$16 sps:$4 sm:$0xff]   ;;  %v8736_v36 = vld [vmem:[%s12093_s1 + $0xacc] ss:$16 sps:$4 sm:$0xff]  }
 0x12e   :  { %v8731_v37 = vld [vmem:[%s12093_s1 + $0xac0] ss:$16 sps:$4 sm:$0xff]   ;;  %v8734_v38 = vld [vmem:[%s12093_s1 + $0xac8] ss:$16 sps:$4 sm:$0xff]   ;;  %v8739_v39 = vld [vmem:[%s12093_s1 + $0xae4] ss:$16 sps:$4 sm:$0xff]  }
 0x12f   :  { %2754 = vmatpush1.bf16.msra.mxu0 %v8662_v55  ;;  %3012 = vmatpush1.bf16.msra.mxu1 %v8665_v56  ;;  %v8742_v40 = vld [vmem:[%s12093_s1 + $0xaec] ss:$16 sps:$4 sm:$0xff]   ;;  %v8737_v41 = vld [vmem:[%s12093_s1 + $0xae0] ss:$16 sps:$4 sm:$0xff]   ;;  %v8740_v42 = vld [vmem:[%s12093_s1 + $0xae8] ss:$16 sps:$4 sm:$0xff]  }
 0x130   :  { %2755 = vmatprep.subr.bf16.mxu0 %v8670_v57  ;;  %3013 = vmatprep.subr.bf16.mxu1 %v8673_v58  ;;  %v8745_v43 = vld [vmem:[%s12093_s1 + $0xb04] ss:$16 sps:$4 sm:$0xff]   ;;  %v8748_v44 = vld [vmem:[%s12093_s1 + $0xb0c] ss:$16 sps:$4 sm:$0xff]   ;;  %v8743_v45 = vld [vmem:[%s12093_s1 + $0xb00] ss:$16 sps:$4 sm:$0xff]  }
 0x131   :  { %v8746_v46 = vld [vmem:[%s12093_s1 + $0xb08] ss:$16 sps:$4 sm:$0xff]   ;;  %v8751_v47 = vld [vmem:[%s12093_s1 + $0xb24] ss:$16 sps:$4 sm:$0xff]   ;;  %v8754_v48 = vld [vmem:[%s12093_s1 + $0xb2c] ss:$16 sps:$4 sm:$0xff]  }
 0x132   :  { %v8749_v49 = vld [vmem:[%s12093_s1 + $0xb20] ss:$16 sps:$4 sm:$0xff]   ;;  %v8752_v50 = vld [vmem:[%s12093_s1 + $0xb28] ss:$16 sps:$4 sm:$0xff]   ;;  %v8757_v51 = vld [vmem:[%s12093_s1 + $0xb44] ss:$16 sps:$4 sm:$0xff]  }
 0x133   :  { %2756 = vmatpush1.bf16.msra.mxu0 %v8668_v59  ;;  %3014 = vmatpush1.bf16.msra.mxu1 %v8671_v60  ;;  %v8760_v52 = vld [vmem:[%s12093_s1 + $0xb4c] ss:$16 sps:$4 sm:$0xff]   ;;  %v8755_v53 = vld [vmem:[%s12093_s1 + $0xb40] ss:$16 sps:$4 sm:$0xff]   ;;  %v8758_v54 = vld [vmem:[%s12093_s1 + $0xb48] ss:$16 sps:$4 sm:$0xff]  }
 0x134   :  { %2757 = vmatprep.subr.bf16.mxu0 %v8676_v61  ;;  %3015 = vmatprep.subr.bf16.mxu1 %v8679_v62  ;;  %v8763_v55 = vld [vmem:[%s12093_s1 + $0xb64] ss:$16 sps:$4 sm:$0xff]   ;;  %v8766_v56 = vld [vmem:[%s12093_s1 + $0xb6c] ss:$16 sps:$4 sm:$0xff]   ;;  %v8761_v57 = vld [vmem:[%s12093_s1 + $0xb60] ss:$16 sps:$4 sm:$0xff]  }
 0x135   :  { %v8764_v58 = vld [vmem:[%s12093_s1 + $0xb68] ss:$16 sps:$4 sm:$0xff]   ;;  %v8769_v59 = vld [vmem:[%s12093_s1 + $0xb84] ss:$16 sps:$4 sm:$0xff]   ;;  %v8772_v60 = vld [vmem:[%s12093_s1 + $0xb8c] ss:$16 sps:$4 sm:$0xff]  }
 0x136   :  { %v8767_v61 = vld [vmem:[%s12093_s1 + $0xb80] ss:$16 sps:$4 sm:$0xff]   ;;  %v8770_v62 = vld [vmem:[%s12093_s1 + $0xb88] ss:$16 sps:$4 sm:$0xff]   ;;  %vm4543_vm0 = vcmask 1041408   ;;  %vm4545_vm1 = vcmask 1043456  }
 0x137   :  { %2758 = vmatpush1.bf16.msra.mxu0 %v8674_v63  ;;  %3016 = vmatpush1.bf16.msra.mxu1 %v8677_v0  ;;  %v8775_v63 = vld [vmem:[%s12093_s1 + $0xba4] ss:$16 sps:$4 sm:$0xff]   ;;  %v8778_v0 = vld [vmem:[%s12093_s1 + $0xbac] ss:$16 sps:$4 sm:$0xff]   ;;  %vm4547_vm2 = vcmask 1045504   ;;  %vm9076_vm4 = vmmov 0  }
 0x138   :  { %2759 = vmatprep.subr.bf16.mxu0 %v8682_v1  ;;  %3017 = vmatprep.subr.bf16.mxu1 %v8685_v2  ;;  %v8773_v1 = vld [vmem:[%s12093_s1 + $0xba0] ss:$16 sps:$4 sm:$0xff]   ;;  %v8776_v2 = vld [vmem:[%s12093_s1 + $0xba8] ss:$16 sps:$4 sm:$0xff]   ;;  %s9077_s24 = smov [#allocation2]   ;;  %vm6459_vm5 = vcmask 25600  }
 0x139   :  { %s6467_s25 = sshll.u32 %s9077_s24, 4  ;;  %s6468_s25 = int_to_ptr.vmem [resolvable:$true] %s6467_s25 }
 0x13a   :  { %s9050_s26 = scalar_lea.vmem %s6468_s25, 32  ;;  %p9055_p1 = scmp.lt.s32.totalorder %s6468_s25, %s6468_s25 }
 0x13b   :  { %2760 = vmatpush1.bf16.msra.mxu0 %v8680_v3  ;;  %3018 = vmatpush1.bf16.msra.mxu1 %v8683_v4  ;;  %v8781_v3 = vld [vmem:[%s12093_s1 + $0xbc4] ss:$16 sps:$4 sm:$0xff]   ;;  %v8784_v4 = vld [vmem:[%s12093_s1 + $0xbcc] ss:$16 sps:$4 sm:$0xff]   ;;  %p9051_p0 = scmp.ne.s32.totalorder %s6468_s25, %s9050_s26  ;;  %p9056_p2 = scmp.lt.s32.totalorder %s9050_s26, %s9050_s26 }
 0x13c   :  { %2761 = vmatprep.subr.bf16.mxu0 %v8688_v5  ;;  %3019 = vmatprep.subr.bf16.mxu1 %v8691_v6  ;;  %v8779_v5 = vld [vmem:[%s12093_s1 + $0xbc0] ss:$16 sps:$4 sm:$0xff]   ;;  %v8782_v6 = vld [vmem:[%s12093_s1 + $0xbc8] ss:$16 sps:$4 sm:$0xff]  }
 0x13d   :  { %p9057_p3 = por %p9056_p2, %p9055_p1 }
 0x13f   :  { %2762 = vmatpush1.bf16.msra.mxu0 %v8686_v7  ;;  %3020 = vmatpush1.bf16.msra.mxu1 %v8689_v8  ;;  %v8787_v7 = vld [vmem:[%s12093_s1 + $0xbe4] ss:$16 sps:$4 sm:$0xff]   ;;  %v8790_v8 = vld [vmem:[%s12093_s1 + $0xbec] ss:$16 sps:$4 sm:$0xff]   ;;  %p9058_p4 = pnand %p9057_p3, %p9051_p0 }
 0x140   :  { %2774 = vmatprep.subr.bf16.mxu0 %v8697_v9  ;;  %3032 = vmatprep.subr.bf16.mxu1 %v8700_v10  ;;  %v34_v9 = vld [vmem:[%s12095_s3 + $0x8] sm:$0xff] }
 0x141   :  { %v38_v10 = vld [vmem:[%s12095_s3 + $0x28] sm:$0xff] }
 0x142   :  { %2764 = vmatmul.mubr.bf16.vlgmr.msra.gmra.mrb[0].mxu0 %v8692_v11  ;;  %3022 = vmatmul.mubr.bf16.vlgmr.msra.gmra.mrb[0].mxu1 %v8692_v11  ;;  %v36_v11 = vld [vmem:[%s12095_s3 + $0x18] sm:$0xff] }
 0x143   :  { %2775 = vmatpush1.bf16.msra.mxu0 %v8695_v12  ;;  %3033 = vmatpush1.bf16.msra.mxu1 %v8698_v13  ;;  %v40_v12 = vld [vmem:[%s12095_s3 + $0x38] sm:$0xff]  ;;  %v8785_v13 = vld [vmem:[%s12093_s1 + $0xbe0] ss:$16 sps:$4 sm:$0xff]  }
 0x144   :  { %2776 = vmatprep.subr.bf16.mxu0 %v8703_v14  ;;  %3034 = vmatprep.subr.bf16.mxu1 %v8706_v15  ;;  %v8788_v14 = vld [vmem:[%s12093_s1 + $0xbe8] ss:$16 sps:$4 sm:$0xff]   ;;  %v33_v15 = vld [vmem:[%s12095_s3] sm:$0xff] }
 0x145   :  { %2806 = vmatprep.mubr.bf16.mxu0 %v8793_v16  ;;  %3064 = vmatprep.mubr.bf16.mxu1 %v8793_v16  ;;  %v37_v16 = vld [vmem:[%s12095_s3 + $0x20] sm:$0xff] }
 0x147   :  { %2777 = vmatpush1.bf16.msra.mxu0 %v8701_v17  ;;  %3035 = vmatpush1.bf16.msra.mxu1 %v8704_v18  ;;  %v10331_v17 = vpack.c.bf16 %v38_v10, %v34_v9  ;;  %v10333_v18 = vpack.c.bf16 %v40_v12, %v36_v11  ;;  %v76_v9 = vld [vmem:[%s12095_s3 + $0x158] sm:$0xff] }
 0x148   :  { %2778 = vmatprep.subr.bf16.mxu0 %v8709_v19  ;;  %3036 = vmatprep.subr.bf16.mxu1 %v8712_v20  ;;  %v35_v19 = vld [vmem:[%s12095_s3 + $0x10] sm:$0xff]  ;;  %v80_v10 = vld [vmem:[%s12095_s3 + $0x178] sm:$0xff] }
 0x149   :  { %v39_v20 = vld [vmem:[%s12095_s3 + $0x30] sm:$0xff] }
 0x14b   :  { %2779 = vmatpush1.bf16.msra.mxu0 %v8707_v21  ;;  %3037 = vmatpush1.bf16.msra.mxu1 %v8710_v22  ;;  %v42_v21 = vld [vmem:[%s12095_s3 + $0x48] sm:$0xff] }
 0x14c   :  { %2780 = vmatprep.subr.bf16.mxu0 %v8715_v23  ;;  %3038 = vmatprep.subr.bf16.mxu1 %v8718_v24  ;;  %v46_v22 = vld [vmem:[%s12095_s3 + $0x68] sm:$0xff]  ;;  %v44_v23 = vld [vmem:[%s12095_s3 + $0x58] sm:$0xff] }
 0x14d   :  { %v48_v24 = vld [vmem:[%s12095_s3 + $0x78] sm:$0xff] }
 0x14f   :  { %2781 = vmatpush1.bf16.msra.mxu0 %v8713_v25  ;;  %3039 = vmatpush1.bf16.msra.mxu1 %v8716_v26  ;;  %v8791_v25 = vld [vmem:[%s12092_s0 + $0x28] ss:$48 sps:$4 sm:$0xff]   ;;  %v10356_v26 = vpack.c.bf16 %v37_v16, %v33_v15  ;;  %v10516_v16 = vpack.c.bf16 %v80_v10, %v76_v9 }
 0x150   :  { %2782 = vmatprep.subr.bf16.mxu0 %v8721_v27  ;;  %3040 = vmatprep.subr.bf16.mxu1 %v8724_v28  ;;  %v10358_v27 = vpack.c.bf16 %v39_v20, %v35_v19  ;;  %v41_v28 = vld [vmem:[%s12095_s3 + $0x40] sm:$0xff]  ;;  %v75_v19 = vld [vmem:[%s12095_s3 + $0x150] sm:$0xff] }
 0x151   :  { %v79_v20 = vld [vmem:[%s12095_s3 + $0x170] sm:$0xff] }
 0x153   :  { %2783 = vmatpush1.bf16.msra.mxu0 %v8719_v29  ;;  %3041 = vmatpush1.bf16.msra.mxu1 %v8722_v30  ;;  %v45_v29 = vld [vmem:[%s12095_s3 + $0x60] sm:$0xff]  ;;  %v10368_v30 = vpack.c.bf16 %v46_v22, %v42_v21  ;;  %v82_v21 = vld [vmem:[%s12095_s3 + $0x188] sm:$0xff] }
 0x154   :  { %2784 = vmatprep.subr.bf16.mxu0 %v8727_v31  ;;  %3042 = vmatprep.subr.bf16.mxu1 %v8730_v32  ;;  %v10370_v31 = vpack.c.bf16 %v48_v24, %v44_v23  ;;  %v43_v32 = vld [vmem:[%s12095_s3 + $0x50] sm:$0xff]  ;;  %v86_v22 = vld [vmem:[%s12095_s3 + $0x1a8] sm:$0xff]  ;;  %v84_v23 = vld [vmem:[%s12095_s3 + $0x198] sm:$0xff] }
 0x155   :  { %v88_v24 = vld [vmem:[%s12095_s3 + $0x1b8] sm:$0xff] }
 0x157   :  { %2785 = vmatpush1.bf16.msra.mxu0 %v8725_v33  ;;  %3043 = vmatpush1.bf16.msra.mxu1 %v8728_v34  ;;  %v47_v33 = vld [vmem:[%s12095_s3 + $0x70] sm:$0xff]  ;;  %v50_v34 = vld [vmem:[%s12095_s3 + $0x88] sm:$0xff] }
 0x158   :  { %2786 = vmatprep.subr.bf16.mxu0 %v8733_v35  ;;  %3044 = vmatprep.subr.bf16.mxu1 %v8736_v36  ;;  %v54_v35 = vld [vmem:[%s12095_s3 + $0xa8] sm:$0xff]  ;;  %v52_v36 = vld [vmem:[%s12095_s3 + $0x98] sm:$0xff] }
 0x15b   :  { %2787 = vmatpush1.bf16.msra.mxu0 %v8731_v37  ;;  %3045 = vmatpush1.bf16.msra.mxu1 %v8734_v38  ;;  %v56_v37 = vld [vmem:[%s12095_s3 + $0xb8] sm:$0xff]  ;;  %v10392_v38 = vpack.c.bf16 %v45_v29, %v41_v28  ;;  %v10540_v28 = vpack.c.bf16 %v79_v20, %v75_v19  ;;  %v81_v29 = vld [vmem:[%s12095_s3 + $0x180] sm:$0xff] }
 0x15c   :  { %2788 = vmatprep.subr.bf16.mxu0 %v8739_v39  ;;  %3046 = vmatprep.subr.bf16.mxu1 %v8742_v40  ;;  %v10394_v39 = vpack.c.bf16 %v47_v33, %v43_v32  ;;  %v49_v40 = vld [vmem:[%s12095_s3 + $0x80] sm:$0xff]  ;;  %v10550_v33 = vpack.c.bf16 %v86_v22, %v82_v21 }
 0x15d   :  { %v85_v32 = vld [vmem:[%s12095_s3 + $0x1a0] sm:$0xff] }
 0x15f   :  { %2789 = vmatpush1.bf16.msra.mxu0 %v8737_v41  ;;  %3047 = vmatpush1.bf16.msra.mxu1 %v8740_v42  ;;  %v53_v41 = vld [vmem:[%s12095_s3 + $0xa0] sm:$0xff]  ;;  %v10404_v42 = vpack.c.bf16 %v54_v35, %v50_v34  ;;  %v10552_v34 = vpack.c.bf16 %v88_v24, %v84_v23  ;;  %v83_v35 = vld [vmem:[%s12095_s3 + $0x190] sm:$0xff] }
 0x160   :  { %2790 = vmatprep.subr.bf16.mxu0 %v8745_v43  ;;  %3048 = vmatprep.subr.bf16.mxu1 %v8748_v44  ;;  %v10406_v43 = vpack.c.bf16 %v56_v37, %v52_v36  ;;  %v51_v44 = vld [vmem:[%s12095_s3 + $0x90] sm:$0xff]  ;;  %v90_v37 = vld [vmem:[%s12095_s3 + $0x1c8] sm:$0xff] }
 0x161   :  { %v87_v36 = vld [vmem:[%s12095_s3 + $0x1b0] sm:$0xff] }
 0x163   :  { %2791 = vmatpush1.bf16.msra.mxu0 %v8743_v45  ;;  %3049 = vmatpush1.bf16.msra.mxu1 %v8746_v46  ;;  %v55_v45 = vld [vmem:[%s12095_s3 + $0xb0] sm:$0xff]  ;;  %v58_v46 = vld [vmem:[%s12095_s3 + $0xc8] sm:$0xff] }
 0x164   :  { %2792 = vmatprep.subr.bf16.mxu0 %v8751_v47  ;;  %3050 = vmatprep.subr.bf16.mxu1 %v8754_v48  ;;  %v62_v47 = vld [vmem:[%s12095_s3 + $0xe8] sm:$0xff]  ;;  %v60_v48 = vld [vmem:[%s12095_s3 + $0xd8] sm:$0xff] }
 0x167   :  { %2793 = vmatpush1.bf16.msra.mxu0 %v8749_v49  ;;  %3051 = vmatpush1.bf16.msra.mxu1 %v8752_v50  ;;  %v64_v49 = vld [vmem:[%s12095_s3 + $0xf8] sm:$0xff]  ;;  %v9074_v50 = vmov 0.0  }
 0x168   :  { %2794 = vmatprep.subr.bf16.mxu0 %v8757_v51  ;;  %3052 = vmatprep.subr.bf16.mxu1 %v8760_v52  ;;  %v10430_v51 = vpack.c.bf16 %v53_v41, %v49_v40  ;;  %v10432_v52 = vpack.c.bf16 %v55_v45, %v51_v44  ;;  %v94_v40 = vld [vmem:[%s12095_s3 + $0x1e8] sm:$0xff]  ;;  %v92_v41 = vld [vmem:[%s12095_s3 + $0x1d8] sm:$0xff]  ;;  %v10574_v45 = vpack.c.bf16 %v85_v32, %v81_v29 }
 0x169   :  { %v96_v44 = vld [vmem:[%s12095_s3 + $0x1f8] sm:$0xff] }
 0x16b   :  { %2795 = vmatpush1.bf16.msra.mxu0 %v8755_v53  ;;  %3053 = vmatpush1.bf16.msra.mxu1 %v8758_v54  ;;  %v57_v53 = vld [vmem:[%s12095_s3 + $0xc0] sm:$0xff] }
 0x16c   :  { %2796 = vmatprep.subr.bf16.mxu0 %v8763_v55  ;;  %3054 = vmatprep.subr.bf16.mxu1 %v8766_v56  ;;  %v61_v54 = vld [vmem:[%s12095_s3 + $0xe0] sm:$0xff]  ;;  %v10442_v55 = vpack.c.bf16 %v62_v47, %v58_v46  ;;  %v10444_v56 = vpack.c.bf16 %v64_v49, %v60_v48  ;;  %v10576_v46 = vpack.c.bf16 %v87_v36, %v83_v35 }
 0x16d   :  { %v89_v47 = vld [vmem:[%s12095_s3 + $0x1c0] sm:$0xff]  ;;  %v10583_v48 = vpack.c.bf16 %v94_v40, %v90_v37  ;;  %v10585_v49 = vpack.c.bf16 %v96_v44, %v92_v41 }
 0x16f   :  { %2797 = vmatpush1.bf16.msra.mxu0 %v8761_v57  ;;  %3055 = vmatpush1.bf16.msra.mxu1 %v8764_v58  ;;  %v59_v57 = vld [vmem:[%s12095_s3 + $0xd0] sm:$0xff] }
 0x170   :  { %2798 = vmatprep.subr.bf16.mxu0 %v8769_v59  ;;  %3056 = vmatprep.subr.bf16.mxu1 %v8772_v60  ;;  %v63_v58 = vld [vmem:[%s12095_s3 + $0xf0] sm:$0xff]  ;;  %v66_v59 = vld [vmem:[%s12095_s3 + $0x108] sm:$0xff] }
 0x171   :  { %v70_v60 = vld [vmem:[%s12095_s3 + $0x128] sm:$0xff] }
 0x173   :  { %2799 = vmatpush1.bf16.msra.mxu0 %v8767_v61  ;;  %3057 = vmatpush1.bf16.msra.mxu1 %v8770_v62  ;;  %v68_v61 = vld [vmem:[%s12095_s3 + $0x118] sm:$0xff] }
 0x174   :  { %2800 = vmatprep.subr.bf16.mxu0 %v8775_v63  ;;  %3058 = vmatprep.subr.bf16.mxu1 %v8778_v0  ;;  %v72_v62 = vld [vmem:[%s12095_s3 + $0x138] sm:$0xff]  ;;  %v10466_v63 = vpack.c.bf16 %v61_v54, %v57_v53  ;;  %v10468_v0 = vpack.c.bf16 %v63_v58, %v59_v57  ;;  %v93_v53 = vld [vmem:[%s12095_s3 + $0x1e0] sm:$0xff]  ;;  %v91_v54 = vld [vmem:[%s12095_s3 + $0x1d0] sm:$0xff] }
 0x175   :  { %v95_v57 = vld [vmem:[%s12095_s3 + $0x1f0] sm:$0xff]  ;;  %v10598_v58 = vpack.c.bf16 %v93_v53, %v89_v47 }
 0x177   :  { %2801 = vmatpush1.bf16.msra.mxu0 %v8773_v1  ;;  %3059 = vmatpush1.bf16.msra.mxu1 %v8776_v2  ;;  %v65_v1 = vld [vmem:[%s12095_s3 + $0x100] sm:$0xff] }
 0x178   :  { %2802 = vmatprep.subr.bf16.mxu0 %v8781_v3  ;;  %3060 = vmatprep.subr.bf16.mxu1 %v8784_v4  ;;  %v69_v2 = vld [vmem:[%s12095_s3 + $0x120] sm:$0xff]  ;;  %v10478_v3 = vpack.c.bf16 %v70_v60, %v66_v59  ;;  %v10480_v4 = vpack.c.bf16 %v72_v62, %v68_v61  ;;  %v10600_v59 = vpack.c.bf16 %v95_v57, %v91_v54  ;;  %v12106_v60 = vlaneseq }
 0x179   :  { %v10502_v11 = vpack.c.bf16 %v69_v2, %v65_v1  ;;  %v557_v2 = vld [vmem:[%s12094_s2] sm:$0xf] }
 0x17a   :  { %v10645_v61 = vshrl.u32 %v12106_v60, 7 }
 0x17b   :  { %2803 = vmatpush1.bf16.msra.mxu0 %v8779_v5  ;;  %3061 = vmatpush1.bf16.msra.mxu1 %v8782_v6  ;;  %v67_v5 = vld [vmem:[%s12095_s3 + $0x110] sm:$0xff] }
 0x17c   :  { %2804 = vmatprep.subr.bf16.mxu0 %v8787_v7  ;;  %3062 = vmatprep.subr.bf16.mxu1 %v8790_v8  ;;  %v71_v6 = vld [vmem:[%s12095_s3 + $0x130] sm:$0xff]  ;;  %v74_v7 = vld [vmem:[%s12095_s3 + $0x148] sm:$0xff]  ;;  %v12105_v62 = vsub.s32 0, %v10645_v61  ;;  %v12104_v1 = vsub.s32 2, %v10645_v61 }
 0x17d   :  { %v78_v8 = vld [vmem:[%s12095_s3 + $0x168] sm:$0xff]  ;;  %v10504_v12 = vpack.c.bf16 %v71_v6, %v67_v5  ;;  %v12103_v5 = vsub.s32 1, %v10645_v61  ;;  %v12102_v6 = vsub.s32 3, %v10645_v61 }
 0x17e   :  { %v10514_v15 = vpack.c.bf16 %v78_v8, %v74_v7  ;;  %v562_v9 = vrot.slane %v557_v2, %v12105_v62  ;;  %v570_v10 = vrot.slane %v557_v2, %v12104_v1 }
 0x17f   :  { %2805 = vmatpush1.bf16.msra.mxu0 %v8785_v13  ;;  %3063 = vmatpush1.bf16.msra.mxu1 %v8788_v14  ;;  %v73_v13 = vld [vmem:[%s12095_s3 + $0x140] sm:$0xff]  ;;  %v566_v19 = vrot.slane %v557_v2, %v12103_v5  ;;  %v574_v20 = vrot.slane %v557_v2, %v12102_v6 }
 0x180   :  { %6973 = vmatprep.subr.bf16.mxu0 %v10331_v17  ;;  %7005 = vmatprep.subr.bf16.mxu1 %v10333_v18  ;;  %v77_v14 = vld [vmem:[%s12095_s3 + $0x160] sm:$0xff] }
 0x182   :  { %2807 = vmatmul.mubr.bf16.vlgmr.msra.gmra.mrb[0].mxu0 %v8791_v25  ;;  %3065 = vmatmul.mubr.bf16.vlgmr.msra.gmra.mrb[0].mxu1 %v8791_v25  ;;  %v10538_v25 = vpack.c.bf16 %v77_v14, %v73_v13 }
 0x183   :  { %6975 = vmatpush1.bf16.msra.mxu0 %v10356_v26  ;;  %7007 = vmatpush1.bf16.msra.mxu1 %v10358_v27 }
 0x184   :  { %6977 = vmatprep.subr.bf16.mxu0 %v10368_v30  ;;  %7009 = vmatprep.subr.bf16.mxu1 %v10370_v31 }
 0x185   :  { %3139 = vmatprep.mubr.f32.mxu0 %v9074_v50  ;;  %3210 = vmatprep.mubr.f32.mxu1 %v9074_v50 }
 0x187   :  { %6979 = vmatpush1.bf16.msra.mxu0 %v10392_v38  ;;  %7011 = vmatpush1.bf16.msra.mxu1 %v10394_v39 }
 0x188   :  { %6981 = vmatprep.subr.bf16.mxu0 %v10404_v42  ;;  %7013 = vmatprep.subr.bf16.mxu1 %v10406_v43 }
 0x18b   :  { %6983 = vmatpush1.bf16.msra.mxu0 %v10430_v51  ;;  %7015 = vmatpush1.bf16.msra.mxu1 %v10432_v52 }
 0x18c   :  { %6985 = vmatprep.subr.bf16.mxu0 %v10442_v55  ;;  %7017 = vmatprep.subr.bf16.mxu1 %v10444_v56 }
 0x18f   :  { %6987 = vmatpush1.bf16.msra.mxu0 %v10466_v63  ;;  %7019 = vmatpush1.bf16.msra.mxu1 %v10468_v0 }
 0x190   :  { %6989 = vmatprep.subr.bf16.mxu0 %v10478_v3  ;;  %7021 = vmatprep.subr.bf16.mxu1 %v10480_v4 }
 0x193   :  { %6991 = vmatpush1.bf16.msra.mxu0 %v10502_v11  ;;  %7023 = vmatpush1.bf16.msra.mxu1 %v10504_v12 }
 0x194   :  { %6993 = vmatprep.subr.bf16.mxu0 %v10514_v15  ;;  %7025 = vmatprep.subr.bf16.mxu1 %v10516_v16 }
 0x197   :  { %6995 = vmatpush1.bf16.msra.mxu0 %v10538_v25  ;;  %7027 = vmatpush1.bf16.msra.mxu1 %v10540_v28 }
 0x198   :  { %6997 = vmatprep.subr.bf16.mxu0 %v10550_v33  ;;  %7029 = vmatprep.subr.bf16.mxu1 %v10552_v34 }
 0x19b   :  { %6999 = vmatpush1.bf16.msra.mxu0 %v10574_v45  ;;  %7031 = vmatpush1.bf16.msra.mxu1 %v10576_v46 }
 0x19c   :  { %7001 = vmatprep.subr.bf16.mxu0 %v10583_v48  ;;  %7033 = vmatprep.subr.bf16.mxu1 %v10585_v49 }
 0x19f   :  { %7003 = vmatpush1.bf16.msra.mxu0 %v10598_v58  ;;  %7035 = vmatpush1.bf16.msra.mxu1 %v10600_v59 }
 0x1a0   :  { %7037 = vmatprep.subr.bf16.mxu0 %v10331_v17  ;;  %7069 = vmatprep.subr.bf16.mxu1 %v10333_v18 }
 0x1a2   :  { %3140 = vmatmul.mubr.f32.vlgmr.msra.gmra.mrb[4].mxu0 %v9074_v50  ;;  %3211 = vmatmul.mubr.f32.vlgmr.msra.gmra.mrb[4].mxu1 %v9074_v50 }
 0x1a3   :  { %7039 = vmatpush1.bf16.msra.mxu0 %v10356_v26  ;;  %7071 = vmatpush1.bf16.msra.mxu1 %v10358_v27 }
 0x1a4   :  { %7041 = vmatprep.subr.bf16.mxu0 %v10368_v30  ;;  %7073 = vmatprep.subr.bf16.mxu1 %v10370_v31 }
 0x1a5   :  { %3309 = vmatprep.mubr.f32.mxu0 %v9074_v50  ;;  %3380 = vmatprep.mubr.f32.mxu1 %v9074_v50 }
 0x1a7   :  { %7043 = vmatpush1.bf16.msra.mxu0 %v10392_v38  ;;  %7075 = vmatpush1.bf16.msra.mxu1 %v10394_v39 }
 0x1a8   :  { %7045 = vmatprep.subr.bf16.mxu0 %v10404_v42  ;;  %7077 = vmatprep.subr.bf16.mxu1 %v10406_v43 }
 0x1ab   :  { %7047 = vmatpush1.bf16.msra.mxu0 %v10430_v51  ;;  %7079 = vmatpush1.bf16.msra.mxu1 %v10432_v52 }
 0x1ac   :  { %7049 = vmatprep.subr.bf16.mxu0 %v10442_v55  ;;  %7081 = vmatprep.subr.bf16.mxu1 %v10444_v56 }
 0x1af   :  { %7051 = vmatpush1.bf16.msra.mxu0 %v10466_v63  ;;  %7083 = vmatpush1.bf16.msra.mxu1 %v10468_v0 }
 0x1b0   :  { %7053 = vmatprep.subr.bf16.mxu0 %v10478_v3  ;;  %7085 = vmatprep.subr.bf16.mxu1 %v10480_v4 }
 0x1b3   :  { %7055 = vmatpush1.bf16.msra.mxu0 %v10502_v11  ;;  %7087 = vmatpush1.bf16.msra.mxu1 %v10504_v12 }
 0x1b4   :  { %7057 = vmatprep.subr.bf16.mxu0 %v10514_v15  ;;  %7089 = vmatprep.subr.bf16.mxu1 %v10516_v16 }
 0x1b7   :  { %7059 = vmatpush1.bf16.msra.mxu0 %v10538_v25  ;;  %7091 = vmatpush1.bf16.msra.mxu1 %v10540_v28 }
 0x1b8   :  { %7061 = vmatprep.subr.bf16.mxu0 %v10550_v33  ;;  %7093 = vmatprep.subr.bf16.mxu1 %v10552_v34 }
 0x1bb   :  { %7063 = vmatpush1.bf16.msra.mxu0 %v10574_v45  ;;  %7095 = vmatpush1.bf16.msra.mxu1 %v10576_v46 }
 0x1bc   :  { %7065 = vmatprep.subr.bf16.mxu0 %v10583_v48  ;;  %7097 = vmatprep.subr.bf16.mxu1 %v10585_v49 }
 0x1bf   :  { %7067 = vmatpush1.bf16.msra.mxu0 %v10598_v58  ;;  %7099 = vmatpush1.bf16.msra.mxu1 %v10600_v59 }
 0x1c0   :  { %7101 = vmatprep.subr.bf16.mxu0 %v10331_v17  ;;  %7133 = vmatprep.subr.bf16.mxu1 %v10333_v18 }
 0x255   :  { %v2808_v7 = vpop.f32.mrb[0].mxu0  ;;  %v3066_v8 = vpop.f32.mrb[0].mxu1 }
 0x256   :  { %v2810_v13 = vpop.f32.mrb[1].mxu0  ;;  %v3068_v14 = vpop.f32.mrb[1].mxu1  ;;  %v10670_v37 = vadd.f32 %v2808_v7, %v562_v9 }
 0x257   :  { %v2812_v21 = vpop.f32.mrb[2].mxu0  ;;  %v3070_v22 = vpop.f32.mrb[2].mxu1  ;;  %v10672_v40 = vadd.f32 %v2810_v13, %v566_v19  ;;  %v10679_v7 = vadd.f32 %v3068_v14, %v574_v20 }
 0x258   :  { %v10662_v23 = vadd.f32 %v2812_v21, %v562_v9  ;;  %v10664_v24 = vadd.f32 %v3070_v22, %v570_v10  ;;  %v2814_v29 = vpop.f32.mrb[3].mxu0  ;;  %v3072_v32 = vpop.f32.mrb[3].mxu1  ;;  %v10676_v22 = vadd.f32 %v3066_v8, %v570_v10 }
 0x259   :  { %v10666_v35 = vadd.f32 %v2814_v29, %v566_v19  ;;  %v10668_v36 = vadd.f32 %v3072_v32, %v574_v20 }
 0x275   :  { %v3141_v41 = vpop.f32.mrb[4].mxu0  ;;  %v3212_v44 = vpop.f32.mrb[4].mxu1 }
 0x276   :  { %v3217_v47 = vadd.f32 %v10670_v37, %v3141_v41  ;;  %v3143_v53 = vpop.f32.mrb[5].mxu0  ;;  %v3214_v54 = vpop.f32.mrb[5].mxu1  ;;  %v3219_v29 = vadd.f32 %v10676_v22, %v3212_v44 }
 0x277   :  { %v3218_v57 = vadd.f32 %v10672_v40, %v3143_v53  ;;  %v3220_v9 = vadd.f32 %v10679_v7, %v3214_v54 }
 0x278   :  { %v6871_v2 = vmul.f32 -1.442695, %v3217_v47  ;;  %v6873_v13 = vmul.f32 -1.442695, %v3219_v29 }
 0x279   :  { %v6872_v21 = vmul.f32 -1.442695, %v3218_v57 }
 0x27a   :  { %8794 = vpow2.f32 %v6871_v2 }
 0x27b   :  { %8796 = vpow2.f32 %v6872_v21 }
 0x27c   :  { %8798 = vtanh.f32 %v3220_v9 }
 0x27d   :  { %8800 = vpow2.f32 %v6873_v13 }
 0x284   :  { %v8795_v19 = vpop.eup %8794 }
 0x285   :  { %v3230_v32 = vadd.f32 1.0, %v8795_v19  ;;  %v8797_v41 = vpop.eup %8796 }
 0x286   :  { %v3231_v53 = vadd.f32 1.0, %v8797_v41  ;;  %v8799_v47 = vpop.eup %8798 }
 0x287   :  { %8802 = vrcp.f32 %v3230_v32  ;;  %v8801_v57 = vpop.eup %8800 }
 0x288   :  { %8804 = vrcp.f32 %v3231_v53  ;;  %v3232_v21 = vadd.f32 1.0, %v8801_v57 }
 0x28a   :  { %8806 = vrcp.f32 %v3232_v21 }
 0x291   :  { %v8803_v8 = vpop.eup %8802 }
 0x292   :  { %v3241_v10 = vmul.f32 %v8803_v8, %v8799_v47  ;;  %v8805_v2 = vpop.eup %8804 }
 0x293   :  { %v3240_v44 = vmul.f32 0.0, %v8805_v2 }
 0x294   :  { %v8807_v20 = vpop.eup %8806 }
 0x295   :  { %v10682_v14 = vadd.f32 %v3241_v10, %v3240_v44 }
 0x297   :  { %8808 = vtanh.f32 %v10682_v14 }
 0x2a1   :  { %v8809_v54 = vpop.eup %8808 }
 0x2a2   :  { %v10685_v29 = vmul.f32 %v8809_v54, %v8807_v20 }
 0x2a4   :  { %3310 = vmatmul.mubr.f32.vlgmr.msra.gmra.mrb[6].mxu0 %v10685_v29  ;;  %3381 = vmatmul.mubr.f32.vlgmr.msra.gmra.mrb[6].mxu1 %v10685_v29 }
 0x2a5   :  { %7103 = vmatpush1.bf16.msra.mxu0 %v10356_v26  ;;  %7135 = vmatpush1.bf16.msra.mxu1 %v10358_v27 }
 0x2a6   :  { %7105 = vmatprep.subr.bf16.mxu0 %v10368_v30  ;;  %7137 = vmatprep.subr.bf16.mxu1 %v10370_v31 }
 0x2a7   :  { %3497 = vmatprep.mubr.f32.mxu0 %v9074_v50  ;;  %3568 = vmatprep.mubr.f32.mxu1 %v9074_v50 }
 0x2a9   :  { %7107 = vmatpush1.bf16.msra.mxu0 %v10392_v38  ;;  %7139 = vmatpush1.bf16.msra.mxu1 %v10394_v39 }
 0x2aa   :  { %7109 = vmatprep.subr.bf16.mxu0 %v10404_v42  ;;  %7141 = vmatprep.subr.bf16.mxu1 %v10406_v43 }
 0x2ad   :  { %7111 = vmatpush1.bf16.msra.mxu0 %v10430_v51  ;;  %7143 = vmatpush1.bf16.msra.mxu1 %v10432_v52 }
 0x2ae   :  { %7113 = vmatprep.subr.bf16.mxu0 %v10442_v55  ;;  %7145 = vmatprep.subr.bf16.mxu1 %v10444_v56 }
 0x2b1   :  { %7115 = vmatpush1.bf16.msra.mxu0 %v10466_v63  ;;  %7147 = vmatpush1.bf16.msra.mxu1 %v10468_v0 }
 0x2b2   :  { %7117 = vmatprep.subr.bf16.mxu0 %v10478_v3  ;;  %7149 = vmatprep.subr.bf16.mxu1 %v10480_v4 }
 0x2b5   :  { %7119 = vmatpush1.bf16.msra.mxu0 %v10502_v11  ;;  %7151 = vmatpush1.bf16.msra.mxu1 %v10504_v12 }
 0x2b6   :  { %7121 = vmatprep.subr.bf16.mxu0 %v10514_v15  ;;  %7153 = vmatprep.subr.bf16.mxu1 %v10516_v16 }
 0x2b9   :  { %7123 = vmatpush1.bf16.msra.mxu0 %v10538_v25  ;;  %7155 = vmatpush1.bf16.msra.mxu1 %v10540_v28 }
 0x2ba   :  { %7125 = vmatprep.subr.bf16.mxu0 %v10550_v33  ;;  %7157 = vmatprep.subr.bf16.mxu1 %v10552_v34 }
 0x2bd   :  { %7127 = vmatpush1.bf16.msra.mxu0 %v10574_v45  ;;  %7159 = vmatpush1.bf16.msra.mxu1 %v10576_v46 }
 0x2be   :  { %7129 = vmatprep.subr.bf16.mxu0 %v10583_v48  ;;  %7161 = vmatprep.subr.bf16.mxu1 %v10585_v49 }
 0x2c1   :  { %7131 = vmatpush1.bf16.msra.mxu0 %v10598_v58  ;;  %7163 = vmatpush1.bf16.msra.mxu1 %v10600_v59 }
 0x2c2   :  { %7165 = vmatprep.subr.bf16.mxu0 %v10331_v17  ;;  %7197 = vmatprep.subr.bf16.mxu1 %v10333_v18 }
 0x377   :  { %v3311_v9 = vpop.f32.mrb[6].mxu0  ;;  %v3382_v13 = vpop.f32.mrb[6].mxu1 }
 0x378   :  { %v3391_v19 = vrot.slane %v3311_v9, 6  ;;  %v3313_v32 = vpop.f32.mrb[7].mxu0  ;;  %v3384_v41 = vpop.f32.mrb[7].mxu1  ;;  %v3393_v2 = vrot.slane %v3382_v13, 6  ;;  %v3423_v13 = vrot.slane %v10682_v14, 6 }
 0x379   :  { %v3392_v53 = vrot.slane %v3313_v32, 6  ;;  %v3394_v21 = vrot.slane %v3384_v41, 6 }
 0x37a   :  { %v3399_v47 = vadd.f32 %v10670_v37, %v3391_v19  ;;  %v3401_v44 = vadd.f32 %v10676_v22, %v3393_v2 }
 0x37b   :  { %v3400_v57 = vadd.f32 %v10672_v40, %v3392_v53  ;;  %v3402_v20 = vadd.f32 %v10679_v7, %v3394_v21 }
 0x37c   :  { %v6874_v8 = vmul.f32 -1.442695, %v3399_v47  ;;  %v6876_v54 = vmul.f32 -1.442695, %v3401_v44 }
 0x37d   :  { %v6875_v10 = vmul.f32 -1.442695, %v3400_v57 }
 0x37e   :  { %8810 = vpow2.f32 %v6874_v8 }
 0x37f   :  { %8812 = vpow2.f32 %v6875_v10 }
 0x380   :  { %8814 = vtanh.f32 %v3402_v20 }
 0x381   :  { %8816 = vpow2.f32 %v6876_v54 }
 0x388   :  { %v8811_v6 = vpop.eup %8810 }
 0x389   :  { %v3412_v9 = vadd.f32 1.0, %v8811_v6  ;;  %v8813_v5 = vpop.eup %8812 }
 0x38a   :  { %v3413_v19 = vadd.f32 1.0, %v8813_v5  ;;  %v8815_v32 = vpop.eup %8814 }
 0x38b   :  { %8818 = vrcp.f32 %v3412_v9  ;;  %v8817_v53 = vpop.eup %8816 }
 0x38c   :  { %8820 = vrcp.f32 %v3413_v19  ;;  %v3414_v8 = vadd.f32 1.0, %v8817_v53 }
 0x38e   :  { %8822 = vrcp.f32 %v3414_v8 }
 0x395   :  { %v8819_v47 = vpop.eup %8818 }
 0x396   :  { %v3426_v57 = vmul.f32 %v8819_v47, %v8815_v32  ;;  %v8821_v41 = vpop.eup %8820 }
 0x397   :  { %v3425_v10 = vmul.f32 %v8821_v41, %v3423_v13 }
 0x398   :  { %v8823_v6 = vpop.eup %8822 }
 0x399   :  { %v10728_v2 = vadd.f32 %v3426_v57, %v3425_v10 }
 0x39b   :  { %8824 = vtanh.f32 %v10728_v2 }
 0x3a5   :  { %v8825_v21 = vpop.eup %8824 }
 0x3a6   :  { %v10731_v44 = vmul.f32 %v8825_v21, %v8823_v6 }
 0x3a8   :  { %v3431_v5 = vrot.slane %v10731_v44, 2 }
 0x3aa   :  { %3498 = vmatmul.mubr.f32.vlgmr.msra.gmra.mrb[8].mxu0 %v3431_v5  ;;  %3569 = vmatmul.mubr.f32.vlgmr.msra.gmra.mrb[8].mxu1 %v3431_v5 }
 0x3ab   :  { %7167 = vmatpush1.bf16.msra.mxu0 %v10356_v26  ;;  %7199 = vmatpush1.bf16.msra.mxu1 %v10358_v27 }
 0x3ac   :  { %7169 = vmatprep.subr.bf16.mxu0 %v10368_v30  ;;  %7201 = vmatprep.subr.bf16.mxu1 %v10370_v31 }
 0x3ad   :  { %3685 = vmatprep.mubr.f32.mxu0 %v9074_v50  ;;  %3756 = vmatprep.mubr.f32.mxu1 %v9074_v50 }
 0x3af   :  { %7171 = vmatpush1.bf16.msra.mxu0 %v10392_v38  ;;  %7203 = vmatpush1.bf16.msra.mxu1 %v10394_v39 }
 0x3b0   :  { %7173 = vmatprep.subr.bf16.mxu0 %v10404_v42  ;;  %7205 = vmatprep.subr.bf16.mxu1 %v10406_v43 }
 0x3b3   :  { %7175 = vmatpush1.bf16.msra.mxu0 %v10430_v51  ;;  %7207 = vmatpush1.bf16.msra.mxu1 %v10432_v52 }
 0x3b4   :  { %7177 = vmatprep.subr.bf16.mxu0 %v10442_v55  ;;  %7209 = vmatprep.subr.bf16.mxu1 %v10444_v56 }
 0x3b7   :  { %7179 = vmatpush1.bf16.msra.mxu0 %v10466_v63  ;;  %7211 = vmatpush1.bf16.msra.mxu1 %v10468_v0 }
 0x3b8   :  { %7181 = vmatprep.subr.bf16.mxu0 %v10478_v3  ;;  %7213 = vmatprep.subr.bf16.mxu1 %v10480_v4 }
 0x3bb   :  { %7183 = vmatpush1.bf16.msra.mxu0 %v10502_v11  ;;  %7215 = vmatpush1.bf16.msra.mxu1 %v10504_v12 }
 0x3bc   :  { %7185 = vmatprep.subr.bf16.mxu0 %v10514_v15  ;;  %7217 = vmatprep.subr.bf16.mxu1 %v10516_v16 }
 0x3bf   :  { %7187 = vmatpush1.bf16.msra.mxu0 %v10538_v25  ;;  %7219 = vmatpush1.bf16.msra.mxu1 %v10540_v28 }
 0x3c0   :  { %7189 = vmatprep.subr.bf16.mxu0 %v10550_v33  ;;  %7221 = vmatprep.subr.bf16.mxu1 %v10552_v34 }
 0x3c3   :  { %7191 = vmatpush1.bf16.msra.mxu0 %v10574_v45  ;;  %7223 = vmatpush1.bf16.msra.mxu1 %v10576_v46 }
 0x3c4   :  { %7193 = vmatprep.subr.bf16.mxu0 %v10583_v48  ;;  %7225 = vmatprep.subr.bf16.mxu1 %v10585_v49 }
 0x3c7   :  { %7195 = vmatpush1.bf16.msra.mxu0 %v10598_v58  ;;  %7227 = vmatpush1.bf16.msra.mxu1 %v10600_v59 }
 0x3c8   :  { %7229 = vmatprep.subr.bf16.mxu0 %v10331_v17  ;;  %7261 = vmatprep.subr.bf16.mxu1 %v10333_v18 }
 0x47d   :  { %v3499_v14 = vpop.f32.mrb[8].mxu0  ;;  %v3570_v20 = vpop.f32.mrb[8].mxu1 }
 0x47e   :  { %v3579_v54 = vrot.slane %v3499_v14, 4  ;;  %v3501_v9 = vpop.f32.mrb[9].mxu0  ;;  %v3572_v19 = vpop.f32.mrb[9].mxu1  ;;  %v3581_v41 = vrot.slane %v3570_v20, 4  ;;  %v3611_v20 = vrot.slane %v10728_v2, 6 }
 0x47f   :  { %v3580_v32 = vrot.slane %v3501_v9, 4  ;;  %v3582_v8 = vrot.slane %v3572_v19, 4 }
 0x480   :  { %v3587_v53 = vadd.f32 %v10670_v37, %v3579_v54  ;;  %v3589_v10 = vadd.f32 %v10676_v22, %v3581_v41 }
 0x481   :  { %v3588_v47 = vadd.f32 %v10672_v40, %v3580_v32  ;;  %v3590_v6 = vadd.f32 %v10679_v7, %v3582_v8 }
 0x482   :  { %v6877_v13 = vmul.f32 -1.442695, %v3587_v53  ;;  %v6879_v21 = vmul.f32 -1.442695, %v3589_v10 }
 0x483   :  { %v6878_v57 = vmul.f32 -1.442695, %v3588_v47 }
 0x484   :  { %8826 = vpow2.f32 %v6877_v13 }
 0x485   :  { %8828 = vpow2.f32 %v6878_v57 }
 0x486   :  { %8830 = vtanh.f32 %v3590_v6  ;;  %v4544_v6 = vsel %vm4543_vm0, %v10685_v29, %v10731_v44 }
 0x487   :  { %8832 = vpow2.f32 %v6879_v21 }
 0x48e   :  { %v8827_v5 = vpop.eup %8826 }
 0x48f   :  { %v3600_v14 = vadd.f32 1.0, %v8827_v5  ;;  %v8829_v1 = vpop.eup %8828 }
 0x490   :  { %v3601_v54 = vadd.f32 1.0, %v8829_v1  ;;  %v8831_v9 = vpop.eup %8830 }
 0x491   :  { %8834 = vrcp.f32 %v3600_v14  ;;  %v8833_v32 = vpop.eup %8832 }
 0x492   :  { %8836 = vrcp.f32 %v3601_v54  ;;  %v3602_v13 = vadd.f32 1.0, %v8833_v32 }
 0x494   :  { %8838 = vrcp.f32 %v3602_v13 }
 0x49b   :  { %v8835_v53 = vpop.eup %8834 }
 0x49c   :  { %v3614_v47 = vmul.f32 %v8835_v53, %v8831_v9  ;;  %v8837_v19 = vpop.eup %8836 }
 0x49d   :  { %v3613_v57 = vmul.f32 %v8837_v19, %v3611_v20 }
 0x49e   :  { %v8839_v8 = vpop.eup %8838 }
 0x49f   :  { %v10773_v41 = vadd.f32 %v3614_v47, %v3613_v57 }
 0x4a1   :  { %8840 = vtanh.f32 %v10773_v41 }
 0x4ab   :  { %v8841_v10 = vpop.eup %8840 }
 0x4ac   :  { %v10776_v1 = vmul.f32 %v8841_v10, %v8839_v8 }
 0x4ae   :  { %v3619_v2 = vrot.slane %v10776_v1, 4  ;;  %v10784_v21 = vsel %vm4545_vm1, %v4544_v6, %v10776_v1 }
 0x4b0   :  { %3686 = vmatmul.mubr.f32.vlgmr.msra.gmra.mrb[10].mxu0 %v3619_v2  ;;  %3757 = vmatmul.mubr.f32.vlgmr.msra.gmra.mrb[10].mxu1 %v3619_v2 }
 0x4b1   :  { %7231 = vmatpush1.bf16.msra.mxu0 %v10356_v26  ;;  %7263 = vmatpush1.bf16.msra.mxu1 %v10358_v27 }
 0x4b2   :  { %7233 = vmatprep.subr.bf16.mxu0 %v10368_v30  ;;  %7265 = vmatprep.subr.bf16.mxu1 %v10370_v31 }
 0x4b3   :  { %3873 = vmatprep.mubr.f32.mxu0 %v9074_v50  ;;  %3944 = vmatprep.mubr.f32.mxu1 %v9074_v50 }
 0x4b5   :  { %7235 = vmatpush1.bf16.msra.mxu0 %v10392_v38  ;;  %7267 = vmatpush1.bf16.msra.mxu1 %v10394_v39 }
 0x4b6   :  { %7237 = vmatprep.subr.bf16.mxu0 %v10404_v42  ;;  %7269 = vmatprep.subr.bf16.mxu1 %v10406_v43 }
 0x4b9   :  { %7239 = vmatpush1.bf16.msra.mxu0 %v10430_v51  ;;  %7271 = vmatpush1.bf16.msra.mxu1 %v10432_v52 }
 0x4ba   :  { %7241 = vmatprep.subr.bf16.mxu0 %v10442_v55  ;;  %7273 = vmatprep.subr.bf16.mxu1 %v10444_v56 }
 0x4bd   :  { %7243 = vmatpush1.bf16.msra.mxu0 %v10466_v63  ;;  %7275 = vmatpush1.bf16.msra.mxu1 %v10468_v0 }
 0x4be   :  { %7245 = vmatprep.subr.bf16.mxu0 %v10478_v3  ;;  %7277 = vmatprep.subr.bf16.mxu1 %v10480_v4 }
 0x4c1   :  { %7247 = vmatpush1.bf16.msra.mxu0 %v10502_v11  ;;  %7279 = vmatpush1.bf16.msra.mxu1 %v10504_v12 }
 0x4c2   :  { %7249 = vmatprep.subr.bf16.mxu0 %v10514_v15  ;;  %7281 = vmatprep.subr.bf16.mxu1 %v10516_v16 }
 0x4c5   :  { %7251 = vmatpush1.bf16.msra.mxu0 %v10538_v25  ;;  %7283 = vmatpush1.bf16.msra.mxu1 %v10540_v28 }
 0x4c6   :  { %7253 = vmatprep.subr.bf16.mxu0 %v10550_v33  ;;  %7285 = vmatprep.subr.bf16.mxu1 %v10552_v34 }
 0x4c9   :  { %7255 = vmatpush1.bf16.msra.mxu0 %v10574_v45  ;;  %7287 = vmatpush1.bf16.msra.mxu1 %v10576_v46 }
 0x4ca   :  { %7257 = vmatprep.subr.bf16.mxu0 %v10583_v48  ;;  %7289 = vmatprep.subr.bf16.mxu1 %v10585_v49 }
 0x4cd   :  { %7259 = vmatpush1.bf16.msra.mxu0 %v10598_v58  ;;  %7291 = vmatpush1.bf16.msra.mxu1 %v10600_v59 }
 0x4ce   :  { %7293 = vmatprep.subr.bf16.mxu0 %v10331_v17  ;;  %7325 = vmatprep.subr.bf16.mxu1 %v10333_v18 }
 0x583   :  { %v3687_v5 = vpop.f32.mrb[10].mxu0  ;;  %v3758_v14 = vpop.f32.mrb[10].mxu1 }
 0x584   :  { %v3767_v54 = vrot.slane %v3687_v5, 2  ;;  %v3689_v9 = vpop.f32.mrb[11].mxu0  ;;  %v3760_v32 = vpop.f32.mrb[11].mxu1  ;;  %v3769_v57 = vrot.slane %v3758_v14, 2  ;;  %v3799_v14 = vrot.slane %v10773_v41, 6  ;;  %v4562_v41 = vrot.slane %v10776_v1, 2 }
 0x585   :  { %v3768_v53 = vrot.slane %v3689_v9, 2  ;;  %v3770_v8 = vrot.slane %v3760_v32, 2 }
 0x586   :  { %v3775_v20 = vadd.f32 %v10670_v37, %v3767_v54  ;;  %v3777_v10 = vadd.f32 %v10676_v22, %v3769_v57  ;;  %v4564_v57 = vrot.slane %v10731_v44, 6 }
 0x587   :  { %v3776_v47 = vadd.f32 %v10672_v40, %v3768_v53  ;;  %v3778_v6 = vadd.f32 %v10679_v7, %v3770_v8 }
 0x588   :  { %v6880_v19 = vmul.f32 -1.442695, %v3775_v20  ;;  %v6882_v2 = vmul.f32 -1.442695, %v3777_v10 }
 0x589   :  { %v6881_v13 = vmul.f32 -1.442695, %v3776_v47 }
 0x58a   :  { %8842 = vpow2.f32 %v6880_v19 }
 0x58b   :  { %8844 = vpow2.f32 %v6881_v13 }
 0x58c   :  { %8846 = vtanh.f32 %v3778_v6 }
 0x58d   :  { %8848 = vpow2.f32 %v6882_v2 }
 0x594   :  { %v8843_v62 = vpop.eup %8842 }
 0x595   :  { %v3788_v5 = vadd.f32 1.0, %v8843_v62  ;;  %v8845_v60 = vpop.eup %8844 }
 0x596   :  { %v3789_v37 = vadd.f32 1.0, %v8845_v60  ;;  %v8847_v40 = vpop.eup %8846 }
 0x597   :  { %8850 = vrcp.f32 %v3788_v5  ;;  %v8849_v54 = vpop.eup %8848 }
 0x598   :  { %8852 = vrcp.f32 %v3789_v37  ;;  %v3790_v20 = vadd.f32 1.0, %v8849_v54 }
 0x59a   :  { %8854 = vrcp.f32 %v3790_v20 }
 0x5a1   :  { %v8851_v9 = vpop.eup %8850 }
 0x5a2   :  { %v3802_v53 = vmul.f32 %v8851_v9, %v8847_v40  ;;  %v8853_v32 = vpop.eup %8852 }
 0x5a3   :  { %v3801_v22 = vmul.f32 %v8853_v32, %v3799_v14 }
 0x5a4   :  { %v8855_v62 = vpop.eup %8854 }
 0x5a5   :  { %v10825_v47 = vadd.f32 %v3802_v53, %v3801_v22 }
 0x5a7   :  { %8856 = vtanh.f32 %v10825_v47 }
 0x5b1   :  { %v8857_v7 = vpop.eup %8856 }
 0x5b2   :  { %v3805_v19 = vmul.f32 %v8857_v7, %v8855_v62 }
 0x5b4   :  { %v3807_v60 = vrot.slane %v3805_v19, 6  ;;  %v10830_v13 = vsel %vm4547_vm2, %v10784_v21, %v3805_v19 }
 0x5b6   :  { %3874 = vmatmul.mubr.f32.vlgmr.msra.gmra.mrb[12].mxu0 %v3807_v60  ;;  %3945 = vmatmul.mubr.f32.vlgmr.msra.gmra.mrb[12].mxu1 %v3807_v60  ;;  %v4572_v8 = vsel %vm4543_vm0, %v3807_v60, %v4562_v41  ;;  %v3975_v60 = vrot.slane %v10825_v47, 6 }
 0x5b7   :  { %7295 = vmatpush1.bf16.msra.mxu0 %v10356_v26  ;;  %7327 = vmatpush1.bf16.msra.mxu1 %v10358_v27  ;;  %v10838_v10 = vsel %vm4545_vm1, %v4572_v8, %v4564_v57 }
 0x5b8   :  { %7297 = vmatprep.subr.bf16.mxu0 %v10368_v30  ;;  %7329 = vmatprep.subr.bf16.mxu1 %v10370_v31 }
 0x5b9   :  { %4046 = vmatprep.mubr.f32.mxu0 %v9074_v50  ;;  %4117 = vmatprep.mubr.f32.mxu1 %v9074_v50 }
 0x5bb   :  { %7299 = vmatpush1.bf16.msra.mxu0 %v10392_v38  ;;  %7331 = vmatpush1.bf16.msra.mxu1 %v10394_v39 }
 0x5bc   :  { %7301 = vmatprep.subr.bf16.mxu0 %v10404_v42  ;;  %7333 = vmatprep.subr.bf16.mxu1 %v10406_v43 }
 0x5bf   :  { %7303 = vmatpush1.bf16.msra.mxu0 %v10430_v51  ;;  %7335 = vmatpush1.bf16.msra.mxu1 %v10432_v52 }
 0x5c0   :  { %7305 = vmatprep.subr.bf16.mxu0 %v10442_v55  ;;  %7337 = vmatprep.subr.bf16.mxu1 %v10444_v56 }
 0x5c3   :  { %7307 = vmatpush1.bf16.msra.mxu0 %v10466_v63  ;;  %7339 = vmatpush1.bf16.msra.mxu1 %v10468_v0 }
 0x5c4   :  { %7309 = vmatprep.subr.bf16.mxu0 %v10478_v3  ;;  %7341 = vmatprep.subr.bf16.mxu1 %v10480_v4 }
 0x5c7   :  { %7311 = vmatpush1.bf16.msra.mxu0 %v10502_v11  ;;  %7343 = vmatpush1.bf16.msra.mxu1 %v10504_v12 }
 0x5c8   :  { %7313 = vmatprep.subr.bf16.mxu0 %v10514_v15  ;;  %7345 = vmatprep.subr.bf16.mxu1 %v10516_v16 }
 0x5cb   :  { %7315 = vmatpush1.bf16.msra.mxu0 %v10538_v25  ;;  %7347 = vmatpush1.bf16.msra.mxu1 %v10540_v28 }
 0x5cc   :  { %7317 = vmatprep.subr.bf16.mxu0 %v10550_v33  ;;  %7349 = vmatprep.subr.bf16.mxu1 %v10552_v34 }
 0x5cf   :  { %7319 = vmatpush1.bf16.msra.mxu0 %v10574_v45  ;;  %7351 = vmatpush1.bf16.msra.mxu1 %v10576_v46 }
 0x5d0   :  { %7321 = vmatprep.subr.bf16.mxu0 %v10583_v48  ;;  %7353 = vmatprep.subr.bf16.mxu1 %v10585_v49 }
 0x5d3   :  { %7323 = vmatpush1.bf16.msra.mxu0 %v10598_v58  ;;  %7355 = vmatpush1.bf16.msra.mxu1 %v10600_v59 }
 0x5d4   :  { %7357 = vmatprep.subr.bf16.mxu0 %v10331_v17  ;;  %7389 = vmatprep.subr.bf16.mxu1 %v10333_v18 }
 0x689   :  { %v3875_v44 = vpop.f32.mrb[12].mxu0  ;;  %v3946_v1 = vpop.f32.mrb[12].mxu1 }
 0x68a   :  { %v3951_v21 = vadd.f32 %v10662_v23, %v3875_v44  ;;  %v3877_v6 = vpop.f32.mrb[13].mxu0  ;;  %v3948_v2 = vpop.f32.mrb[13].mxu1  ;;  %v3953_v54 = vadd.f32 %v10664_v24, %v3946_v1 }
 0x68b   :  { %v3952_v5 = vadd.f32 %v10666_v35, %v3877_v6  ;;  %v3954_v9 = vadd.f32 %v10668_v36, %v3948_v2 }
 0x68c   :  { %v6883_v37 = vmul.f32 -1.442695, %v3951_v21  ;;  %v6885_v14 = vmul.f32 -1.442695, %v3953_v54 }
 0x68d   :  { %v6884_v40 = vmul.f32 -1.442695, %v3952_v5 }
 0x68e   :  { %8858 = vpow2.f32 %v6883_v37 }
 0x68f   :  { %8860 = vpow2.f32 %v6884_v40 }
 0x690   :  { %8862 = vtanh.f32 %v3954_v9 }
 0x691   :  { %8864 = vpow2.f32 %v6885_v14 }
 0x698   :  { %v8859_v53 = vpop.eup %8858 }
 0x699   :  { %v3964_v32 = vadd.f32 1.0, %v8859_v53  ;;  %v8861_v20 = vpop.eup %8860 }
 0x69a   :  { %v3965_v22 = vadd.f32 1.0, %v8861_v20  ;;  %v8863_v62 = vpop.eup %8862 }
 0x69b   :  { %8866 = vrcp.f32 %v3964_v32  ;;  %v8865_v7 = vpop.eup %8864 }
 0x69c   :  { %8868 = vrcp.f32 %v3965_v22  ;;  %v3966_v8 = vadd.f32 1.0, %v8865_v7 }
 0x69e   :  { %8870 = vrcp.f32 %v3966_v8 }
 0x6a5   :  { %v8867_v19 = vpop.eup %8866 }
 0x6a6   :  { %v3978_v41 = vmul.f32 %v8867_v19, %v8863_v62  ;;  %v8869_v57 = vpop.eup %8868 }
 0x6a7   :  { %v3977_v44 = vmul.f32 %v8869_v57, %v3975_v60 }
 0x6a8   :  { %v8871_v21 = vpop.eup %8870 }
 0x6a9   :  { %v10877_v1 = vadd.f32 %v3978_v41, %v3977_v44 }
 0x6ab   :  { %8872 = vtanh.f32 %v10877_v1 }
 0x6b5   :  { %v8873_v6 = vpop.eup %8872 }
 0x6b6   :  { %v10880_v2 = vmul.f32 %v8873_v6, %v8871_v21  ;;  %v4160_v6 = vrot.slane %v10877_v1, 6 }
 0x6b8   :  { %4047 = vmatmul.mubr.f32.vlgmr.msra.gmra.mrb[14].mxu0 %v10880_v2  ;;  %4118 = vmatmul.mubr.f32.vlgmr.msra.gmra.mrb[14].mxu1 %v10880_v2 }
 0x6b9   :  { %7359 = vmatpush1.bf16.msra.mxu0 %v10356_v26  ;;  %7391 = vmatpush1.bf16.msra.mxu1 %v10358_v27 }
 0x6ba   :  { %7361 = vmatprep.subr.bf16.mxu0 %v10368_v30  ;;  %7393 = vmatprep.subr.bf16.mxu1 %v10370_v31 }
 0x6bb   :  { %4234 = vmatprep.mubr.f32.mxu0 %v9074_v50  ;;  %4305 = vmatprep.mubr.f32.mxu1 %v9074_v50 }
 0x6bd   :  { %7363 = vmatpush1.bf16.msra.mxu0 %v10392_v38  ;;  %7395 = vmatpush1.bf16.msra.mxu1 %v10394_v39 }
 0x6be   :  { %7365 = vmatprep.subr.bf16.mxu0 %v10404_v42  ;;  %7397 = vmatprep.subr.bf16.mxu1 %v10406_v43 }
 0x6c1   :  { %7367 = vmatpush1.bf16.msra.mxu0 %v10430_v51  ;;  %7399 = vmatpush1.bf16.msra.mxu1 %v10432_v52 }
 0x6c2   :  { %7369 = vmatprep.subr.bf16.mxu0 %v10442_v55  ;;  %7401 = vmatprep.subr.bf16.mxu1 %v10444_v56 }
 0x6c5   :  { %7371 = vmatpush1.bf16.msra.mxu0 %v10466_v63  ;;  %7403 = vmatpush1.bf16.msra.mxu1 %v10468_v0 }
 0x6c6   :  { %7373 = vmatprep.subr.bf16.mxu0 %v10478_v3  ;;  %7405 = vmatprep.subr.bf16.mxu1 %v10480_v4 }
 0x6c9   :  { %7375 = vmatpush1.bf16.msra.mxu0 %v10502_v11  ;;  %7407 = vmatpush1.bf16.msra.mxu1 %v10504_v12 }
 0x6ca   :  { %7377 = vmatprep.subr.bf16.mxu0 %v10514_v15  ;;  %7409 = vmatprep.subr.bf16.mxu1 %v10516_v16 }
 0x6cd   :  { %7379 = vmatpush1.bf16.msra.mxu0 %v10538_v25  ;;  %7411 = vmatpush1.bf16.msra.mxu1 %v10540_v28 }
 0x6ce   :  { %7381 = vmatprep.subr.bf16.mxu0 %v10550_v33  ;;  %7413 = vmatprep.subr.bf16.mxu1 %v10552_v34 }
 0x6d1   :  { %7383 = vmatpush1.bf16.msra.mxu0 %v10574_v45  ;;  %7415 = vmatpush1.bf16.msra.mxu1 %v10576_v46 }
 0x6d2   :  { %7385 = vmatprep.subr.bf16.mxu0 %v10583_v48  ;;  %7417 = vmatprep.subr.bf16.mxu1 %v10585_v49 }
 0x6d5   :  { %7387 = vmatpush1.bf16.msra.mxu0 %v10598_v58  ;;  %7419 = vmatpush1.bf16.msra.mxu1 %v10600_v59 }
 0x6d6   :  { %7421 = vmatprep.subr.bf16.mxu0 %v10331_v17  ;;  %7453 = vmatprep.subr.bf16.mxu1 %v10333_v18 }
 0x78b   :  { %v4048_v47 = vpop.f32.mrb[14].mxu0  ;;  %v4119_v5 = vpop.f32.mrb[14].mxu1 }
 0x78c   :  { %v4128_v37 = vrot.slane %v4048_v47, 6  ;;  %v4050_v40 = vpop.f32.mrb[15].mxu0  ;;  %v4121_v54 = vpop.f32.mrb[15].mxu1  ;;  %v4130_v22 = vrot.slane %v4119_v5, 6 }
 0x78d   :  { %v4129_v9 = vrot.slane %v4050_v40, 6  ;;  %v4131_v62 = vrot.slane %v4121_v54, 6 }
 0x78e   :  { %v4136_v14 = vadd.f32 %v10662_v23, %v4128_v37  ;;  %v4138_v17 = vadd.f32 %v10664_v24, %v4130_v22 }
 0x78f   :  { %v4137_v53 = vadd.f32 %v10666_v35, %v4129_v9  ;;  %v4139_v18 = vadd.f32 %v10668_v36, %v4131_v62 }
 0x790   :  { %v6886_v32 = vmul.f32 -1.442695, %v4136_v14  ;;  %v6888_v7 = vmul.f32 -1.442695, %v4138_v17  ;;  %v4582_v17 = vld [vmem:[%s12096_s4] sm:$0xff] }
 0x791   :  { %v6887_v20 = vmul.f32 -1.442695, %v4137_v53 }
 0x792   :  { %8874 = vpow2.f32 %v6886_v32 }
 0x793   :  { %8876 = vpow2.f32 %v6887_v20 }
 0x794   :  { %8878 = vtanh.f32 %v4139_v18  ;;  %v4586_v18 = vld [vmem:[%s12096_s4 + $0x20] sm:$0xff] }
 0x795   :  { %8880 = vpow2.f32 %v6888_v7 }
 0x79c   :  { %v8875_v19 = vpop.eup %8874 }
 0x79d   :  { %v4149_v60 = vadd.f32 1.0, %v8875_v19  ;;  %v8877_v41 = vpop.eup %8876  ;;  %v4584_v19 = vld [vmem:[%s12096_s4 + $0x10] sm:$0xff] }
 0x79e   :  { %v4150_v57 = vadd.f32 1.0, %v8877_v41  ;;  %v8879_v8 = vpop.eup %8878  ;;  %v4591_v41 = vld [vmem:[%s12096_s4 + $0x48] sm:$0xff] }
 0x79f   :  { %8882 = vrcp.f32 %v4149_v60  ;;  %v8881_v44 = vpop.eup %8880  ;;  %v4588_v60 = vld [vmem:[%s12096_s4 + $0x30] sm:$0xff] }
 0x7a0   :  { %8884 = vrcp.f32 %v4150_v57  ;;  %v4151_v37 = vadd.f32 1.0, %v8881_v44  ;;  %v4593_v44 = vld [vmem:[%s12096_s4 + $0x58] sm:$0xff] }
 0x7a2   :  { %8886 = vrcp.f32 %v4151_v37  ;;  %v4590_v37 = vld [vmem:[%s12096_s4 + $0x40] sm:$0xff] }
 0x7a9   :  { %v8883_v21 = vpop.eup %8882 }
 0x7aa   :  { %v4163_v47 = vmul.f32 %v8883_v21, %v8879_v8  ;;  %v8885_v5 = vpop.eup %8884  ;;  %v4595_v8 = vld [vmem:[%s12096_s4 + $0x68] sm:$0xff]  ;;  %v4597_v21 = vld [vmem:[%s12096_s4 + $0x78] sm:$0xff] }
 0x7ab   :  { %v4162_v40 = vmul.f32 %v8885_v5, %v4160_v6  ;;  %v7550_v5 = vpack.c.bf16 %v4588_v60, %v4584_v19 }
 0x7ac   :  { %v8887_v9 = vpop.eup %8886 }
 0x7ad   :  { %v10923_v54 = vadd.f32 %v4163_v47, %v4162_v40  ;;  %v7486_v47 = vpack.c.bf16 %v4586_v18, %v4582_v17  ;;  %v4594_v40 = vld [vmem:[%s12096_s4 + $0x60] sm:$0xff]  ;;  %v4621_v17 = vld [vmem:[%s12096_s4 + $0x138] sm:$0xff] }
 0x7ae   :  { %v4614_v18 = vld [vmem:[%s12096_s4 + $0x100] sm:$0xff] }
 0x7af   :  { %8888 = vtanh.f32 %v10923_v54 }
 0x7b9   :  { %v8889_v14 = vpop.eup %8888 }
 0x7ba   :  { %v10926_v53 = vmul.f32 %v8889_v14, %v8887_v9  ;;  %v7488_v14 = vpack.c.bf16 %v4595_v8, %v4591_v41  ;;  %v4616_v41 = vld [vmem:[%s12096_s4 + $0x110] sm:$0xff] }
 0x7bc   :  { %v4168_v32 = vrot.slane %v10926_v53, 2 }
 0x7be   :  { %4235 = vmatmul.mubr.f32.vlgmr.msra.gmra.mrb[16].mxu0 %v4168_v32  ;;  %4306 = vmatmul.mubr.f32.vlgmr.msra.gmra.mrb[16].mxu1 %v4168_v32  ;;  %v7552_v32 = vpack.c.bf16 %v4597_v21, %v4593_v44  ;;  %v4623_v44 = vld [vmem:[%s12096_s4 + $0x148] sm:$0xff] }
 0x7bf   :  { %7423 = vmatpush1.bf16.msra.mxu0 %v10356_v26  ;;  %7455 = vmatpush1.bf16.msra.mxu1 %v10358_v27  ;;  %v4583_v26 = vld [vmem:[%s12096_s4 + $0x8] sm:$0xff] }
 0x7c0   :  { %7425 = vmatprep.subr.bf16.mxu0 %v10368_v30  ;;  %7457 = vmatprep.subr.bf16.mxu1 %v10370_v31  ;;  %v4587_v27 = vld [vmem:[%s12096_s4 + $0x28] sm:$0xff]  ;;  %v4585_v30 = vld [vmem:[%s12096_s4 + $0x18] sm:$0xff] }
 0x7c1   :  { %4422 = vmatprep.mubr.f32.mxu0 %v9074_v50  ;;  %4493 = vmatprep.mubr.f32.mxu1 %v9074_v50  ;;  %v7484_v31 = vpack.c.bf16 %v4587_v27, %v4583_v26  ;;  %v4592_v26 = vld [vmem:[%s12096_s4 + $0x50] sm:$0xff]  ;;  %v4627_v21 = vld [vmem:[%s12096_s4 + $0x168] sm:$0xff] }
 0x7c2   :  { %v4596_v27 = vld [vmem:[%s12096_s4 + $0x70] sm:$0xff] }
 0x7c3   :  { %7427 = vmatpush1.bf16.msra.mxu0 %v10392_v38  ;;  %7459 = vmatpush1.bf16.msra.mxu1 %v10394_v39  ;;  %v4589_v38 = vld [vmem:[%s12096_s4 + $0x38] sm:$0xff] }
 0x7c4   :  { %7429 = vmatprep.subr.bf16.mxu0 %v10404_v42  ;;  %7461 = vmatprep.subr.bf16.mxu1 %v10406_v43  ;;  %v7548_v39 = vpack.c.bf16 %v4589_v38, %v4585_v30  ;;  %v4599_v30 = vld [vmem:[%s12096_s4 + $0x88] sm:$0xff] }
 0x7c5   :  { %v4603_v38 = vld [vmem:[%s12096_s4 + $0xa8] sm:$0xff] }
 0x7c7   :  { %7431 = vmatpush1.bf16.msra.mxu0 %v10430_v51  ;;  %7463 = vmatpush1.bf16.msra.mxu1 %v10432_v52 }
 0x7c8   :  { %7433 = vmatprep.subr.bf16.mxu0 %v10442_v55  ;;  %7465 = vmatprep.subr.bf16.mxu1 %v10444_v56 }
 0x7cb   :  { %7435 = vmatpush1.bf16.msra.mxu0 %v10466_v63  ;;  %7467 = vmatpush1.bf16.msra.mxu1 %v10468_v0 }
 0x7cc   :  { %7437 = vmatprep.subr.bf16.mxu0 %v10478_v3  ;;  %7469 = vmatprep.subr.bf16.mxu1 %v10480_v4 }
 0x7cf   :  { %7439 = vmatpush1.bf16.msra.mxu0 %v10502_v11  ;;  %7471 = vmatpush1.bf16.msra.mxu1 %v10504_v12 }
 0x7d0   :  { %7441 = vmatprep.subr.bf16.mxu0 %v10514_v15  ;;  %7473 = vmatprep.subr.bf16.mxu1 %v10516_v16 }
 0x7d3   :  { %7443 = vmatpush1.bf16.msra.mxu0 %v10538_v25  ;;  %7475 = vmatpush1.bf16.msra.mxu1 %v10540_v28 }
 0x7d4   :  { %7445 = vmatprep.subr.bf16.mxu0 %v10550_v33  ;;  %7477 = vmatprep.subr.bf16.mxu1 %v10552_v34 }
 0x7d7   :  { %7447 = vmatpush1.bf16.msra.mxu0 %v10574_v45  ;;  %7479 = vmatpush1.bf16.msra.mxu1 %v10576_v46 }
 0x7d8   :  { %7449 = vmatprep.subr.bf16.mxu0 %v10583_v48  ;;  %7481 = vmatprep.subr.bf16.mxu1 %v10585_v49 }
 0x7db   :  { %7451 = vmatpush1.bf16.msra.mxu0 %v10598_v58  ;;  %7483 = vmatpush1.bf16.msra.mxu1 %v10600_v59  ;;  %v4348_v58 = vrot.slane %v10923_v54, 6  ;;  %v4549_v54 = vsel %vm4543_vm0, %v10880_v2, %v10926_v53 }
 0x7dc   :  { %7485 = vmatprep.subr.bf16.mxu0 %v7484_v31  ;;  %7549 = vmatprep.subr.bf16.mxu1 %v7548_v39  ;;  %v4601_v39 = vld [vmem:[%s12096_s4 + $0x98] sm:$0xff] }
 0x891   :  { %v4236_v42 = vpop.f32.mrb[16].mxu0  ;;  %v4307_v43 = vpop.f32.mrb[16].mxu1 }
 0x892   :  { %v4316_v51 = vrot.slane %v4236_v42, 4  ;;  %v4238_v52 = vpop.f32.mrb[17].mxu0  ;;  %v4309_v55 = vpop.f32.mrb[17].mxu1  ;;  %v4318_v11 = vrot.slane %v4307_v43, 4  ;;  %v4605_v42 = vld [vmem:[%s12096_s4 + $0xb8] sm:$0xff]  ;;  %v7490_v43 = vpack.c.bf16 %v4594_v40, %v4590_v37  ;;  %v4622_v40 = vld [vmem:[%s12096_s4 + $0x140] sm:$0xff] }
 0x893   :  { %v4317_v56 = vrot.slane %v4238_v52, 4  ;;  %v4319_v12 = vrot.slane %v4309_v55, 4  ;;  %v7492_v52 = vpack.c.bf16 %v4603_v38, %v4599_v30  ;;  %v7556_v55 = vpack.c.bf16 %v4605_v42, %v4601_v39  ;;  %v4629_v37 = vld [vmem:[%s12096_s4 + $0x178] sm:$0xff]  ;;  %v4631_v30 = vld [vmem:[%s12096_s4 + $0x188] sm:$0xff] }
 0x894   :  { %v4324_v63 = vadd.f32 %v10662_v23, %v4316_v51  ;;  %v4326_v15 = vadd.f32 %v10664_v24, %v4318_v11  ;;  %v7554_v51 = vpack.c.bf16 %v4596_v27, %v4592_v26  ;;  %v4628_v26 = vld [vmem:[%s12096_s4 + $0x170] sm:$0xff]  ;;  %v4635_v38 = vld [vmem:[%s12096_s4 + $0x1a8] sm:$0xff]  ;;  %v4633_v39 = vld [vmem:[%s12096_s4 + $0x198] sm:$0xff] }
 0x895   :  { %v4325_v0 = vadd.f32 %v10666_v35, %v4317_v56  ;;  %v4327_v16 = vadd.f32 %v10668_v36, %v4319_v12  ;;  %v4598_v56 = vld [vmem:[%s12096_s4 + $0x80] sm:$0xff]  ;;  %v4607_v12 = vld [vmem:[%s12096_s4 + $0xc8] sm:$0xff]  ;;  %v7508_v42 = vpack.c.bf16 %v4635_v38, %v4631_v30  ;;  %v4665_v30 = vld [vmem:[%s12096_s4 + $0x298] sm:$0xff] }
 0x896   :  { %v6889_v3 = vmul.f32 -1.442695, %v4324_v63  ;;  %v6891_v25 = vmul.f32 -1.442695, %v4326_v15  ;;  %v4602_v63 = vld [vmem:[%s12096_s4 + $0xa0] sm:$0xff]  ;;  %v4611_v15 = vld [vmem:[%s12096_s4 + $0xe8] sm:$0xff] }
 0x897   :  { %v6890_v4 = vmul.f32 -1.442695, %v4325_v0  ;;  %v4600_v0 = vld [vmem:[%s12096_s4 + $0x90] sm:$0xff] }
 0x898   :  { %8890 = vpow2.f32 %v6889_v3  ;;  %v7494_v3 = vpack.c.bf16 %v4602_v63, %v4598_v56  ;;  %v4632_v63 = vld [vmem:[%s12096_s4 + $0x190] sm:$0xff] }
 0x899   :  { %8892 = vpow2.f32 %v6890_v4  ;;  %v4604_v4 = vld [vmem:[%s12096_s4 + $0xb0] sm:$0xff] }
 0x89a   :  { %8894 = vtanh.f32 %v4327_v16  ;;  %v7558_v11 = vpack.c.bf16 %v4604_v4, %v4600_v0  ;;  %v4609_v16 = vld [vmem:[%s12096_s4 + $0xd8] sm:$0xff]  ;;  %v4636_v0 = vld [vmem:[%s12096_s4 + $0x1b0] sm:$0xff]  ;;  %v4639_v4 = vld [vmem:[%s12096_s4 + $0x1c8] sm:$0xff] }
 0x89b   :  { %8896 = vpow2.f32 %v6891_v25  ;;  %v7496_v25 = vpack.c.bf16 %v4611_v15, %v4607_v12  ;;  %v4641_v12 = vld [vmem:[%s12096_s4 + $0x1d8] sm:$0xff] }
 0x8a2   :  { %v8891_v28 = vpop.eup %8890 }
 0x8a3   :  { %v4337_v33 = vadd.f32 1.0, %v8891_v28  ;;  %v8893_v34 = vpop.eup %8892  ;;  %v4613_v28 = vld [vmem:[%s12096_s4 + $0xf8] sm:$0xff] }
 0x8a4   :  { %v4338_v45 = vadd.f32 1.0, %v8893_v34  ;;  %v8895_v46 = vpop.eup %8894  ;;  %v4610_v34 = vld [vmem:[%s12096_s4 + $0xe0] sm:$0xff] }
 0x8a5   :  { %8898 = vrcp.f32 %v4337_v33  ;;  %v8897_v48 = vpop.eup %8896  ;;  %v4606_v33 = vld [vmem:[%s12096_s4 + $0xc0] sm:$0xff] }
 0x8a6   :  { %8900 = vrcp.f32 %v4338_v45  ;;  %v4339_v20 = vadd.f32 1.0, %v8897_v48  ;;  %v7560_v45 = vpack.c.bf16 %v4613_v28, %v4609_v16  ;;  %v4608_v48 = vld [vmem:[%s12096_s4 + $0xd0] sm:$0xff]  ;;  %v4645_v16 = vld [vmem:[%s12096_s4 + $0x1f8] sm:$0xff]  ;;  %v4642_v28 = vld [vmem:[%s12096_s4 + $0x1e0] sm:$0xff] }
 0x8a8   :  { %8902 = vrcp.f32 %v4339_v20  ;;  %v4617_v20 = vld [vmem:[%s12096_s4 + $0x118] sm:$0xff] }
 0x8a9   :  { %v7564_v19 = vpack.c.bf16 %v4621_v17, %v4617_v20  ;;  %v4653_v20 = vld [vmem:[%s12096_s4 + $0x238] sm:$0xff]  ;;  %v4650_v17 = vld [vmem:[%s12096_s4 + $0x220] sm:$0xff] }
 0x8af   :  { %v8899_v49 = vpop.eup %8898 }
 0x8b0   :  { %v4351_v59 = vmul.f32 %v8899_v49, %v8895_v46  ;;  %v8901_v1 = vpop.eup %8900  ;;  %v7498_v46 = vpack.c.bf16 %v4610_v34, %v4606_v33  ;;  %v4612_v49 = vld [vmem:[%s12096_s4 + $0xf0] sm:$0xff]  ;;  %v7576_v33 = vpack.c.bf16 %v4645_v16, %v4641_v12  ;;  %v4677_v12 = vld [vmem:[%s12096_s4 + $0x2f8] sm:$0xff]  ;;  %v4674_v16 = vld [vmem:[%s12096_s4 + $0x2e0] sm:$0xff] }
 0x8b1   :  { %v4350_v22 = vmul.f32 %v8901_v1, %v4348_v58  ;;  %v7562_v58 = vpack.c.bf16 %v4612_v49, %v4608_v48  ;;  %v4619_v1 = vld [vmem:[%s12096_s4 + $0x128] sm:$0xff] }
 0x8b2   :  { %v8903_v7 = vpop.eup %8902  ;;  %v4647_v49 = vld [vmem:[%s12096_s4 + $0x208] sm:$0xff] }
 0x8b3   :  { %v10978_v62 = vadd.f32 %v4351_v59, %v4350_v22  ;;  %v4615_v59 = vld [vmem:[%s12096_s4 + $0x108] sm:$0xff] }
 0x8b4   :  { %v7500_v22 = vpack.c.bf16 %v4619_v1, %v4615_v59  ;;  %v4649_v59 = vld [vmem:[%s12096_s4 + $0x218] sm:$0xff] }
 0x8b5   :  { %8904 = vtanh.f32 %v10978_v62 }
 0x8bf   :  { %v8905_v57 = vpop.eup %8904 }
 0x8c0   :  { %v11005_v6 = vmul.f32 %v8905_v57, %v8903_v7  ;;  %v4618_v7 = vld [vmem:[%s12096_s4 + $0x120] sm:$0xff]  ;;  %v4620_v57 = vld [vmem:[%s12096_s4 + $0x130] sm:$0xff] }
 0x8c1   :  { %v7502_v60 = vpack.c.bf16 %v4618_v7, %v4614_v18  ;;  %v7566_v8 = vpack.c.bf16 %v4620_v57, %v4616_v41  ;;  %v7580_v18 = vpack.c.bf16 %v4653_v20, %v4649_v59  ;;  %v4655_v57 = vld [vmem:[%s12096_s4 + $0x248] sm:$0xff]  ;;  %v4685_v59 = vld [vmem:[%s12096_s4 + $0x338] sm:$0xff]  ;;  %v4682_v20 = vld [vmem:[%s12096_s4 + $0x320] sm:$0xff] }
 0x8c2   :  { %v4356_v9 = vrot.slane %v11005_v6, 4  ;;  %v11028_v31 = vsel %vm4545_vm1, %v4549_v54, %v11005_v6  ;;  %v4626_v54 = vld [vmem:[%s12096_s4 + $0x160] sm:$0xff] }
 0x8c4   :  { %4423 = vmatmul.mubr.f32.vlgmr.msra.gmra.mrb[18].mxu0 %v4356_v9  ;;  %4494 = vmatmul.mubr.f32.vlgmr.msra.gmra.mrb[18].mxu1 %v4356_v9 }
 0x8c5   :  { %7487 = vmatpush1.bf16.msra.mxu0 %v7486_v47  ;;  %7551 = vmatpush1.bf16.msra.mxu1 %v7550_v5  ;;  %v4625_v47 = vld [vmem:[%s12096_s4 + $0x158] sm:$0xff]  ;;  %v7504_v5 = vpack.c.bf16 %v4627_v21, %v4623_v44 }
 0x8c6   :  { %7489 = vmatprep.subr.bf16.mxu0 %v7488_v14  ;;  %7553 = vmatprep.subr.bf16.mxu1 %v7552_v32  ;;  %v7568_v9 = vpack.c.bf16 %v4629_v37, %v4625_v47  ;;  %v7506_v14 = vpack.c.bf16 %v4626_v54, %v4622_v40  ;;  %v4624_v32 = vld [vmem:[%s12096_s4 + $0x150] sm:$0xff]  ;;  %v4657_v44 = vld [vmem:[%s12096_s4 + $0x258] sm:$0xff]  ;;  %v4658_v37 = vld [vmem:[%s12096_s4 + $0x260] sm:$0xff] }
 0x8c7   :  { %v7570_v27 = vpack.c.bf16 %v4628_v26, %v4624_v32  ;;  %v4661_v47 = vld [vmem:[%s12096_s4 + $0x278] sm:$0xff]  ;;  %v4663_v26 = vld [vmem:[%s12096_s4 + $0x288] sm:$0xff] }
 0x8c8   :  { %v7584_v40 = vpack.c.bf16 %v4661_v47, %v4657_v44  ;;  %v4686_v47 = vld [vmem:[%s12096_s4 + $0x340] sm:$0xff] }
 0x8c9   :  { %7491 = vmatpush1.bf16.msra.mxu0 %v7490_v43  ;;  %7555 = vmatpush1.bf16.msra.mxu1 %v7554_v51  ;;  %v4637_v43 = vld [vmem:[%s12096_s4 + $0x1b8] sm:$0xff]  ;;  %v4630_v51 = vld [vmem:[%s12096_s4 + $0x180] sm:$0xff] }
 0x8ca   :  { %7493 = vmatprep.subr.bf16.mxu0 %v7492_v52  ;;  %7557 = vmatprep.subr.bf16.mxu1 %v7556_v55  ;;  %v4634_v52 = vld [vmem:[%s12096_s4 + $0x1a0] sm:$0xff]  ;;  %v7572_v55 = vpack.c.bf16 %v4637_v43, %v4633_v39  ;;  %v4669_v39 = vld [vmem:[%s12096_s4 + $0x2b8] sm:$0xff] }
 0x8cb   :  { %v7510_v56 = vpack.c.bf16 %v4634_v52, %v4630_v51  ;;  %v4666_v43 = vld [vmem:[%s12096_s4 + $0x2a0] sm:$0xff]  ;;  %v7588_v51 = vpack.c.bf16 %v4669_v39, %v4665_v30  ;;  %v4701_v30 = vld [vmem:[%s12096_s4 + $0x3b8] sm:$0xff] }
 0x8cd   :  { %7495 = vmatpush1.bf16.msra.mxu0 %v7494_v3  ;;  %7559 = vmatpush1.bf16.msra.mxu1 %v7558_v11  ;;  %v7574_v3 = vpack.c.bf16 %v4636_v0, %v4632_v63  ;;  %v4643_v11 = vld [vmem:[%s12096_s4 + $0x1e8] sm:$0xff] }
 0x8ce   :  { %7497 = vmatprep.subr.bf16.mxu0 %v7496_v25  ;;  %7561 = vmatprep.subr.bf16.mxu1 %v7560_v45  ;;  %v7512_v15 = vpack.c.bf16 %v4643_v11, %v4639_v4  ;;  %v4638_v25 = vld [vmem:[%s12096_s4 + $0x1c0] sm:$0xff]  ;;  %v4640_v45 = vld [vmem:[%s12096_s4 + $0x1d0] sm:$0xff]  ;;  %v4671_v0 = vld [vmem:[%s12096_s4 + $0x2c8] sm:$0xff] }
 0x8cf   :  { %v7514_v34 = vpack.c.bf16 %v4642_v28, %v4638_v25  ;;  %v4673_v4 = vld [vmem:[%s12096_s4 + $0x2d8] sm:$0xff] }
 0x8d0   :  { %v7592_v25 = vpack.c.bf16 %v4677_v12, %v4673_v4  ;;  %v4709_v4 = vld [vmem:[%s12096_s4 + $0x3f8] sm:$0xff]  ;;  %v4706_v12 = vld [vmem:[%s12096_s4 + $0x3e0] sm:$0xff] }
 0x8d1   :  { %7499 = vmatpush1.bf16.msra.mxu0 %v7498_v46  ;;  %7563 = vmatpush1.bf16.msra.mxu1 %v7562_v58  ;;  %v4644_v46 = vld [vmem:[%s12096_s4 + $0x1f0] sm:$0xff]  ;;  %v4651_v58 = vld [vmem:[%s12096_s4 + $0x228] sm:$0xff] }
 0x8d2   :  { %7501 = vmatprep.subr.bf16.mxu0 %v7500_v22  ;;  %7565 = vmatprep.subr.bf16.mxu1 %v7564_v19  ;;  %v7578_v48 = vpack.c.bf16 %v4644_v46, %v4640_v45  ;;  %v7516_v1 = vpack.c.bf16 %v4651_v58, %v4647_v49  ;;  %v4646_v22 = vld [vmem:[%s12096_s4 + $0x200] sm:$0xff]  ;;  %v4648_v19 = vld [vmem:[%s12096_s4 + $0x210] sm:$0xff]  ;;  %v4679_v46 = vld [vmem:[%s12096_s4 + $0x308] sm:$0xff] }
 0x8d3   :  { %v7518_v7 = vpack.c.bf16 %v4650_v17, %v4646_v22  ;;  %v4681_v49 = vld [vmem:[%s12096_s4 + $0x318] sm:$0xff] }
 0x8d4   :  { %v7596_v22 = vpack.c.bf16 %v4685_v59, %v4681_v49  ;;  %v104_v49 = vld [vmem:[%s12098_s6 + $0x38] sm:$0xff] }
 0x8d5   :  { %7503 = vmatpush1.bf16.msra.mxu0 %v7502_v60  ;;  %7567 = vmatpush1.bf16.msra.mxu1 %v7566_v8  ;;  %v4652_v60 = vld [vmem:[%s12096_s4 + $0x230] sm:$0xff]  ;;  %v4659_v8 = vld [vmem:[%s12096_s4 + $0x268] sm:$0xff] }
 0x8d6   :  { %7505 = vmatprep.subr.bf16.mxu0 %v7504_v5  ;;  %7569 = vmatprep.subr.bf16.mxu1 %v7568_v9  ;;  %v7582_v41 = vpack.c.bf16 %v4652_v60, %v4648_v19  ;;  %v7520_v21 = vpack.c.bf16 %v4659_v8, %v4655_v57  ;;  %v4654_v5 = vld [vmem:[%s12096_s4 + $0x240] sm:$0xff]  ;;  %v4656_v9 = vld [vmem:[%s12096_s4 + $0x250] sm:$0xff]  ;;  %v4687_v19 = vld [vmem:[%s12096_s4 + $0x348] sm:$0xff] }
 0x8d7   :  { %v7522_v54 = vpack.c.bf16 %v4658_v37, %v4654_v5  ;;  %v4689_v57 = vld [vmem:[%s12096_s4 + $0x358] sm:$0xff]  ;;  %v4690_v5 = vld [vmem:[%s12096_s4 + $0x360] sm:$0xff]  ;;  %v4688_v37 = vld [vmem:[%s12096_s4 + $0x350] sm:$0xff] }
 0x8d8   :  { %v4693_v8 = vld [vmem:[%s12096_s4 + $0x378] sm:$0xff] }
 0x8d9   :  { %7507 = vmatpush1.bf16.msra.mxu0 %v7506_v14  ;;  %7571 = vmatpush1.bf16.msra.mxu1 %v7570_v27  ;;  %v4660_v14 = vld [vmem:[%s12096_s4 + $0x270] sm:$0xff]  ;;  %v4667_v27 = vld [vmem:[%s12096_s4 + $0x2a8] sm:$0xff] }
 0x8da   :  { %7509 = vmatprep.subr.bf16.mxu0 %v7508_v42  ;;  %7573 = vmatprep.subr.bf16.mxu1 %v7572_v55  ;;  %v7586_v32 = vpack.c.bf16 %v4660_v14, %v4656_v9  ;;  %v7524_v38 = vpack.c.bf16 %v4667_v27, %v4663_v26  ;;  %v4662_v42 = vld [vmem:[%s12096_s4 + $0x280] sm:$0xff]  ;;  %v4664_v55 = vld [vmem:[%s12096_s4 + $0x290] sm:$0xff]  ;;  %v4695_v9 = vld [vmem:[%s12096_s4 + $0x388] sm:$0xff] }
 0x8db   :  { %v7526_v52 = vpack.c.bf16 %v4666_v43, %v4662_v42  ;;  %v4699_v14 = vld [vmem:[%s12096_s4 + $0x3a8] sm:$0xff]  ;;  %v4697_v27 = vld [vmem:[%s12096_s4 + $0x398] sm:$0xff]  ;;  %v4698_v42 = vld [vmem:[%s12096_s4 + $0x3a0] sm:$0xff] }
 0x8dc   :  { %v7540_v26 = vpack.c.bf16 %v4699_v14, %v4695_v9  ;;  %v7604_v39 = vpack.c.bf16 %v4701_v30, %v4697_v27  ;;  %v4696_v43 = vld [vmem:[%s12096_s4 + $0x390] sm:$0xff]  ;;  %v4536_v14 = vrot.slane %v10978_v62, 6  ;;  %v97_v62 = vld [vmem:[%s12098_s6] sm:$0xff] }
 0x8dd   :  { %7511 = vmatpush1.bf16.msra.mxu0 %v7510_v56  ;;  %7575 = vmatpush1.bf16.msra.mxu1 %v7574_v3  ;;  %v4668_v56 = vld [vmem:[%s12096_s4 + $0x2b0] sm:$0xff]  ;;  %v4675_v3 = vld [vmem:[%s12096_s4 + $0x2e8] sm:$0xff] }
 0x8de   :  { %7513 = vmatprep.subr.bf16.mxu0 %v7512_v15  ;;  %7577 = vmatprep.subr.bf16.mxu1 %v7576_v33  ;;  %v7590_v63 = vpack.c.bf16 %v4668_v56, %v4664_v55  ;;  %v7528_v11 = vpack.c.bf16 %v4675_v3, %v4671_v0  ;;  %v4670_v15 = vld [vmem:[%s12096_s4 + $0x2c0] sm:$0xff]  ;;  %v4672_v33 = vld [vmem:[%s12096_s4 + $0x2d0] sm:$0xff]  ;;  %v4703_v55 = vld [vmem:[%s12096_s4 + $0x3c8] sm:$0xff] }
 0x8df   :  { %v7530_v28 = vpack.c.bf16 %v4674_v16, %v4670_v15  ;;  %v4707_v56 = vld [vmem:[%s12096_s4 + $0x3e8] sm:$0xff]  ;;  %v4704_v16 = vld [vmem:[%s12096_s4 + $0x3d0] sm:$0xff] }
 0x8e0   :  { %v7544_v3 = vpack.c.bf16 %v4707_v56, %v4703_v55  ;;  %v4555_v55 = vrot.slane %v11005_v6, 2  ;;  %v103_v6 = vld [vmem:[%s12098_s6 + $0x30] sm:$0xff] }
 0x8e1   :  { %7515 = vmatpush1.bf16.msra.mxu0 %v7514_v34  ;;  %7579 = vmatpush1.bf16.msra.mxu1 %v7578_v48  ;;  %v4676_v34 = vld [vmem:[%s12096_s4 + $0x2f0] sm:$0xff]  ;;  %v4683_v48 = vld [vmem:[%s12096_s4 + $0x328] sm:$0xff] }
 0x8e2   :  { %7517 = vmatprep.subr.bf16.mxu0 %v7516_v1  ;;  %7581 = vmatprep.subr.bf16.mxu1 %v7580_v18  ;;  %v7594_v45 = vpack.c.bf16 %v4676_v34, %v4672_v33  ;;  %v7532_v58 = vpack.c.bf16 %v4683_v48, %v4679_v46  ;;  %v4678_v1 = vld [vmem:[%s12096_s4 + $0x300] sm:$0xff]  ;;  %v4680_v18 = vld [vmem:[%s12096_s4 + $0x310] sm:$0xff]  ;;  %v98_v34 = vld [vmem:[%s12098_s6 + $0x8] sm:$0xff] }
 0x8e3   :  { %v7534_v17 = vpack.c.bf16 %v4682_v20, %v4678_v1  ;;  %v100_v46 = vld [vmem:[%s12098_s6 + $0x18] sm:$0xff] }
 0x8e5   :  { %7519 = vmatpush1.bf16.msra.mxu0 %v7518_v7  ;;  %7583 = vmatpush1.bf16.msra.mxu1 %v7582_v41  ;;  %v4684_v7 = vld [vmem:[%s12096_s4 + $0x330] sm:$0xff]  ;;  %v4691_v41 = vld [vmem:[%s12096_s4 + $0x368] sm:$0xff] }
 0x8e6   :  { %7521 = vmatprep.subr.bf16.mxu0 %v7520_v21  ;;  %7585 = vmatprep.subr.bf16.mxu1 %v7584_v40  ;;  %v7598_v60 = vpack.c.bf16 %v4684_v7, %v4680_v18  ;;  %v7536_v44 = vpack.c.bf16 %v4691_v41, %v4687_v19  ;;  %v7600_v21 = vpack.c.bf16 %v4693_v8, %v4689_v57 }
 0x8e7   :  { %v7538_v40 = vpack.c.bf16 %v4690_v5, %v4686_v47 }
 0x8e9   :  { %7523 = vmatpush1.bf16.msra.mxu0 %v7522_v54  ;;  %7587 = vmatpush1.bf16.msra.mxu1 %v7586_v32  ;;  %v4692_v54 = vld [vmem:[%s12096_s4 + $0x370] sm:$0xff] }
 0x8ea   :  { %7525 = vmatprep.subr.bf16.mxu0 %v7524_v38  ;;  %7589 = vmatprep.subr.bf16.mxu1 %v7588_v51  ;;  %v7602_v32 = vpack.c.bf16 %v4692_v54, %v4688_v37  ;;  %v4694_v38 = vld [vmem:[%s12096_s4 + $0x380] sm:$0xff]  ;;  %v4700_v51 = vld [vmem:[%s12096_s4 + $0x3b0] sm:$0xff] }
 0x8eb   :  { %v7606_v0 = vpack.c.bf16 %v4700_v51, %v4696_v43  ;;  %v4567_v51 = vrot.slane %v10685_v29, 2  ;;  %v99_v29 = vld [vmem:[%s12098_s6 + $0x10] sm:$0xff] }
 0x8ed   :  { %7527 = vmatpush1.bf16.msra.mxu0 %v7526_v52  ;;  %7591 = vmatpush1.bf16.msra.mxu1 %v7590_v63  ;;  %v7542_v52 = vpack.c.bf16 %v4698_v42, %v4694_v38  ;;  %v4705_v63 = vld [vmem:[%s12096_s4 + $0x3d8] sm:$0xff] }
 0x8ee   :  { %7529 = vmatprep.subr.bf16.mxu0 %v7528_v11  ;;  %7593 = vmatprep.subr.bf16.mxu1 %v7592_v25  ;;  %v4702_v11 = vld [vmem:[%s12096_s4 + $0x3c0] sm:$0xff]  ;;  %v7608_v15 = vpack.c.bf16 %v4709_v4, %v4705_v63  ;;  %v4708_v25 = vld [vmem:[%s12096_s4 + $0x3f0] sm:$0xff]  ;;  %v4574_v63 = vsel %vm4547_vm2, %v10838_v10, %v4567_v51  ;;  %v4560_v10 = vrot.slane %v10880_v2, 2  ;;  %v112_v2 = vld [vmem:[%s12098_s6 + $0x78] sm:$0xff] }
 0x8ef   :  { %v7610_v33 = vpack.c.bf16 %v4708_v25, %v4704_v16  ;;  %v108_v16 = vld [vmem:[%s12098_s6 + $0x58] sm:$0xff]  ;;  %v129_v51 = vld [vmem:[%s12098_s6 + $0x100] sm:$0xff] }
 0x8f1   :  { %7531 = vmatpush1.bf16.msra.mxu0 %v7530_v28  ;;  %7595 = vmatpush1.bf16.msra.mxu1 %v7594_v45  ;;  %v7546_v28 = vpack.c.bf16 %v4706_v12, %v4702_v11  ;;  %v102_v45 = vld [vmem:[%s12098_s6 + $0x28] sm:$0xff] }
 0x8f2   :  { %7533 = vmatprep.subr.bf16.mxu0 %v7532_v58  ;;  %7597 = vmatprep.subr.bf16.mxu1 %v7596_v22  ;;  %v11372_v48 = vpack.c.bf16 %v102_v45, %v98_v34  ;;  %v11377_v58 = vpack.c.bf16 %v104_v49, %v100_v46  ;;  %v106_v11 = vld [vmem:[%s12098_s6 + $0x48] sm:$0xff]  ;;  %v105_v34 = vld [vmem:[%s12098_s6 + $0x40] sm:$0xff] }
 0x8f3   :  { %v109_v45 = vld [vmem:[%s12098_s6 + $0x60] sm:$0xff] }
 0x8f5   :  { %7535 = vmatpush1.bf16.msra.mxu0 %v7534_v17  ;;  %7599 = vmatpush1.bf16.msra.mxu1 %v7598_v60 }
 0x8f6   :  { %7537 = vmatprep.subr.bf16.mxu0 %v7536_v44  ;;  %7601 = vmatprep.subr.bf16.mxu1 %v7600_v21 }
 0x8f9   :  { %7539 = vmatpush1.bf16.msra.mxu0 %v7538_v40  ;;  %7603 = vmatpush1.bf16.msra.mxu1 %v7602_v32 }
 0x8fa   :  { %7541 = vmatprep.subr.bf16.mxu0 %v7540_v26  ;;  %7605 = vmatprep.subr.bf16.mxu1 %v7604_v39 }
 0x8fd   :  { %7543 = vmatpush1.bf16.msra.mxu0 %v7542_v52  ;;  %7607 = vmatpush1.bf16.msra.mxu1 %v7606_v0  ;;  %v4557_v0 = vrot.slane %v10926_v53, 6 }
 0x8fe   :  { %7545 = vmatprep.subr.bf16.mxu0 %v7544_v3  ;;  %7609 = vmatprep.subr.bf16.mxu1 %v7608_v15  ;;  %v101_v3 = vld [vmem:[%s12098_s6 + $0x20] sm:$0xff]  ;;  %v110_v15 = vld [vmem:[%s12098_s6 + $0x68] sm:$0xff] }
 0x901   :  { %7547 = vmatpush1.bf16.msra.mxu0 %v7546_v28  ;;  %7611 = vmatpush1.bf16.msra.mxu1 %v7610_v33  ;;  %v11424_v28 = vpack.c.bf16 %v101_v3, %v97_v62  ;;  %v11426_v33 = vpack.c.bf16 %v103_v6, %v99_v29  ;;  %v142_v3 = vld [vmem:[%s12098_s6 + $0x168] sm:$0xff]  ;;  %v140_v29 = vld [vmem:[%s12098_s6 + $0x158] sm:$0xff] }
 0x902   :  { %7613 = vmatprep.subr.bf16.mxu0 %v11372_v48  ;;  %7645 = vmatprep.subr.bf16.mxu1 %v11377_v58  ;;  %v144_v6 = vld [vmem:[%s12098_s6 + $0x178] sm:$0xff] }
 0x997   :  { %v4424_v59 = vpop.f32.mrb[18].mxu0  ;;  %v4495_v1 = vpop.f32.mrb[18].mxu1 }
 0x998   :  { %v4504_v20 = vrot.slane %v4424_v59, 2  ;;  %v4426_v22 = vpop.f32.mrb[19].mxu0  ;;  %v4497_v17 = vpop.f32.mrb[19].mxu1  ;;  %v4506_v57 = vrot.slane %v4495_v1, 2  ;;  %v107_v59 = vld [vmem:[%s12098_s6 + $0x50] sm:$0xff] }
 0x999   :  { %v4505_v18 = vrot.slane %v4426_v22, 2  ;;  %v4507_v8 = vrot.slane %v4497_v17, 2  ;;  %v111_v1 = vld [vmem:[%s12098_s6 + $0x70] sm:$0xff]  ;;  %v11447_v22 = vpack.c.bf16 %v110_v15, %v106_v11  ;;  %v11449_v17 = vpack.c.bf16 %v112_v2, %v108_v16  ;;  %v146_v2 = vld [vmem:[%s12098_s6 + $0x188] sm:$0xff] }
 0x99a   :  { %v4512_v7 = vadd.f32 %v10662_v23, %v4504_v20  ;;  %v4514_v44 = vadd.f32 %v10664_v24, %v4506_v57  ;;  %v114_v20 = vld [vmem:[%s12098_s6 + $0x88] sm:$0xff]  ;;  %v117_v57 = vld [vmem:[%s12098_s6 + $0xa0] sm:$0xff]  ;;  %v139_v15 = vld [vmem:[%s12098_s6 + $0x150] sm:$0xff] }
 0x99b   :  { %v4513_v19 = vadd.f32 %v10666_v35, %v4505_v18  ;;  %v4515_v21 = vadd.f32 %v10668_v36, %v4507_v8  ;;  %v12107_v36 = vlaneseq  ;;  %v116_v18 = vld [vmem:[%s12098_s6 + $0x98] sm:$0xff]  ;;  %v143_v16 = vld [vmem:[%s12098_s6 + $0x170] sm:$0xff] }
 0x99c   :  { %v6892_v60 = vmul.f32 -1.442695, %v4512_v7  ;;  %v6894_v47 = vmul.f32 -1.442695, %v4514_v44  ;;  %v120_v7 = vld [vmem:[%s12098_s6 + $0xb8] sm:$0xff] }
 0x99d   :  { %v6893_v41 = vmul.f32 -1.442695, %v4513_v19  ;;  %v4576_v38 = vand.u32 127, %v12107_v36  ;;  %v11462_v19 = vpack.c.bf16 %v109_v45, %v105_v34  ;;  %v11474_v44 = vpack.c.bf16 %v120_v7, %v116_v18  ;;  %v134_v36 = vld [vmem:[%s12098_s6 + $0x128] sm:$0xff]  ;;  %v148_v34 = vld [vmem:[%s12098_s6 + $0x198] sm:$0xff]  ;;  %v147_v18 = vld [vmem:[%s12098_s6 + $0x190] sm:$0xff] }
 0x99e   :  { %8906 = vpow2.f32 %v6892_v60  ;;  %v11464_v60 = vpack.c.bf16 %v111_v1, %v107_v59  ;;  %v152_v45 = vld [vmem:[%s12098_s6 + $0x1b8] sm:$0xff]  ;;  %v145_v59 = vld [vmem:[%s12098_s6 + $0x180] sm:$0xff]  ;;  %v151_v7 = vld [vmem:[%s12098_s6 + $0x1b0] sm:$0xff] }
 0x99f   :  { %8908 = vpow2.f32 %v6893_v41  ;;  %vm4577_vm3 = vcmp.lt.s32.totalorder %v4576_v38, 64  ;;  %v113_v41 = vld [vmem:[%s12098_s6 + $0x80] sm:$0xff]  ;;  %v132_v38 = vld [vmem:[%s12098_s6 + $0x118] sm:$0xff] }
 0x9a0   :  { %8910 = vtanh.f32 %v4515_v21  ;;  %v115_v21 = vld [vmem:[%s12098_s6 + $0x90] sm:$0xff]  ;;  %v149_v1 = vld [vmem:[%s12098_s6 + $0x1a0] sm:$0xff] }
 0x9a1   :  { %8912 = vpow2.f32 %v6894_v47  ;;  %v119_v47 = vld [vmem:[%s12098_s6 + $0xb0] sm:$0xff] }
 0x9a8   :  { %v8907_v5 = vpop.eup %8906 }
 0x9a9   :  { %v4525_v37 = vadd.f32 1.0, %v8907_v5  ;;  %v8909_v40 = vpop.eup %8908  ;;  %v122_v5 = vld [vmem:[%s12098_s6 + $0xc8] sm:$0xff] }
 0x9aa   :  { %v4526_v23 = vadd.f32 1.0, %v8909_v40  ;;  %v8911_v35 = vpop.eup %8910  ;;  %v124_v40 = vld [vmem:[%s12098_s6 + $0xd8] sm:$0xff] }
 0x9ab   :  { %8914 = vrcp.f32 %v4525_v37  ;;  %v8913_v54 = vpop.eup %8912  ;;  %v126_v37 = vld [vmem:[%s12098_s6 + $0xe8] sm:$0xff] }
 0x9ac   :  { %8916 = vrcp.f32 %v4526_v23  ;;  %v4527_v27 = vadd.f32 1.0, %v8913_v54  ;;  %v128_v23 = vld [vmem:[%s12098_s6 + $0xf8] sm:$0xff]  ;;  %v11500_v54 = vpack.c.bf16 %v119_v47, %v115_v21 }
 0x9ad   :  { %v156_v21 = vld [vmem:[%s12098_s6 + $0x1d8] sm:$0xff] }
 0x9ae   :  { %8918 = vrcp.f32 %v4527_v27  ;;  %v123_v27 = vld [vmem:[%s12098_s6 + $0xd0] sm:$0xff]  ;;  %v160_v47 = vld [vmem:[%s12098_s6 + $0x1f8] sm:$0xff] }
 0x9b5   :  { %v8915_v9 = vpop.eup %8914 }
 0x9b6   :  { %v4539_v32 = vmul.f32 %v8915_v9, %v8911_v35  ;;  %v8917_v26 = vpop.eup %8916  ;;  %v11498_v35 = vpack.c.bf16 %v117_v57, %v113_v41  ;;  %v121_v9 = vld [vmem:[%s12098_s6 + $0xc0] sm:$0xff]  ;;  %v154_v41 = vld [vmem:[%s12098_s6 + $0x1c8] sm:$0xff] }
 0x9b7   :  { %v4538_v24 = vmul.f32 %v8917_v26, %v4536_v14  ;;  %v125_v14 = vld [vmem:[%s12098_s6 + $0xe0] sm:$0xff]  ;;  %v11512_v26 = vpack.c.bf16 %v128_v23, %v124_v40  ;;  %v158_v57 = vld [vmem:[%s12098_s6 + $0x1e8] sm:$0xff] }
 0x9b8   :  { %v8919_v39 = vpop.eup %8918  ;;  %v153_v40 = vld [vmem:[%s12098_s6 + $0x1c0] sm:$0xff]  ;;  %v11653_v23 = vpack.c.bf16 %v158_v57, %v154_v41 }
 0x9b9   :  { %v4540_v30 = vadd.f32 %v4539_v32, %v4538_v24  ;;  %v11510_v32 = vpack.c.bf16 %v126_v37, %v122_v5  ;;  %v127_v24 = vld [vmem:[%s12098_s6 + $0xf0] sm:$0xff]  ;;  %v11644_v5 = vpack.c.bf16 %v149_v1, %v145_v59  ;;  %v11646_v37 = vpack.c.bf16 %v151_v7, %v147_v18 }
 0x9bb   :  { %8920 = vtanh.f32 %v4540_v30  ;;  %v130_v30 = vld [vmem:[%s12098_s6 + $0x108] sm:$0xff] }
 0x9c5   :  { %v8921_v42 = vpop.eup %8920 }
 0x9c6   :  { %v4542_v43 = vmul.f32 %v8921_v42, %v8919_v39  ;;  %v136_v39 = vld [vmem:[%s12098_s6 + $0x138] sm:$0xff]  ;;  %v11536_v42 = vpack.c.bf16 %v125_v14, %v121_v9  ;;  %v11655_v9 = vpack.c.bf16 %v160_v47, %v156_v21  ;;  %v157_v14 = vld [vmem:[%s12098_s6 + $0x1e0] sm:$0xff] }
 0x9c7   :  { %v11550_v62 = vpack.c.bf16 %v136_v39, %v132_v38  ;;  %v4710_v38 = vld [vmem:[%s12097_s5] sm:$0xf] }
 0x9c8   :  { %v4553_v52 = vrot.slane %v4542_v43, 6  ;;  %v4551_v56 = vsel %vm4547_vm2, %v11028_v31, %v4542_v43  ;;  %v11538_v43 = vpack.c.bf16 %v127_v24, %v123_v27  ;;  %v155_v27 = vld [vmem:[%s12098_s6 + $0x1d0] sm:$0xff] }
 0x9c9   :  { %v4581_v4 = vsel %vm4577_vm3, %v4574_v63, %v4551_v56  ;;  %v4579_v31 = vsel %vm4577_vm3, %v4551_v56, %v4574_v63  ;;  %v131_v56 = vld [vmem:[%s12098_s6 + $0x110] sm:$0xff] }
 0x9ca   :  { %v4569_v53 = vsel %vm4543_vm0, %v4553_v52, %v4555_v55  ;;  %v133_v52 = vld [vmem:[%s12098_s6 + $0x120] sm:$0xff]  ;;  %v11548_v55 = vpack.c.bf16 %v134_v36, %v130_v30  ;;  %v135_v63 = vld [vmem:[%s12098_s6 + $0x130] sm:$0xff]  ;;  %v11668_v30 = vpack.c.bf16 %v157_v14, %v153_v40 }
 0x9cb   :  { %v4570_v12 = vsel %vm4545_vm1, %v4569_v53, %v4557_v0  ;;  %v138_v0 = vld [vmem:[%s12098_s6 + $0x148] sm:$0xff]  ;;  %v141_v53 = vld [vmem:[%s12098_s6 + $0x160] sm:$0xff]  ;;  %v159_v24 = vld [vmem:[%s12098_s6 + $0x1f0] sm:$0xff] }
 0x9cc   :  { %v4571_v25 = vsel %vm4547_vm2, %v4570_v12, %v4560_v10  ;;  %v137_v10 = vld [vmem:[%s12098_s6 + $0x140] sm:$0xff]  ;;  %v11584_v11 = vpack.c.bf16 %v142_v3, %v138_v0  ;;  %v11586_v12 = vpack.c.bf16 %v144_v6, %v140_v29  ;;  %v11670_v36 = vpack.c.bf16 %v159_v24, %v155_v27 }
 0x9cd   :  { %v4580_v46 = vsel %vm4577_vm3, %v4571_v25, %v10830_v13  ;;  %v4578_v49 = vsel %vm4577_vm3, %v10830_v13, %v4571_v25  ;;  %v118_v13 = vld [vmem:[%s12098_s6 + $0xa8] sm:$0xff]  ;;  %v12109_v3 = vsub.s32 2, %v10645_v61  ;;  %v12110_v6 = vsub.s32 1, %v10645_v61 }
 0x9ce   :  { %4796 = vmatprep.mubr.f32.mxu0 %v4580_v46  ;;  %4873 = vmatprep.mubr.f32.mxu1 %v4580_v46  ;;  %v11472_v8 = vpack.c.bf16 %v118_v13, %v114_v20  ;;  %v150_v25 = vld [vmem:[%s12098_s6 + $0x1a8] sm:$0xff]  ;;  %v11608_v46 = vpack.c.bf16 %v141_v53, %v137_v10  ;;  %v11622_v13 = vpack.c.bf16 %v152_v45, %v148_v34  ;;  %v12111_v53 = vsub.s32 3, %v10645_v61 }
 0x9cf   :  { %4797 = vmatmul.mubr.f32.vlgmr.msra.gmra.mrb[20].mxu0 %v4578_v49  ;;  %4874 = vmatmul.mubr.f32.vlgmr.msra.gmra.mrb[20].mxu1 %v4578_v49  ;;  %v11610_v49 = vpack.c.bf16 %v143_v16, %v139_v15  ;;  %v11620_v20 = vpack.c.bf16 %v150_v25, %v146_v2  ;;  %v4723_v29 = vrot.slane %v4710_v38, %v12109_v3 }
 0x9d0   :  { %7615 = vmatpush1.bf16.msra.mxu0 %v11424_v28  ;;  %7647 = vmatpush1.bf16.msra.mxu1 %v11426_v33  ;;  %v4719_v10 = vrot.slane %v4710_v38, %v12110_v6  ;;  %v4727_v15 = vrot.slane %v4710_v38, %v12111_v53 }
 0x9d1   :  { %4802 = vmatprep.mubr.f32.mxu0 %v4581_v4  ;;  %4879 = vmatprep.mubr.f32.mxu1 %v4581_v4  ;;  %v11572_v4 = vpack.c.bf16 %v133_v52, %v129_v51 }
 0x9d2   :  { %7617 = vmatprep.subr.bf16.mxu0 %v11447_v22  ;;  %7649 = vmatprep.subr.bf16.mxu1 %v11449_v17 }
 0x9d3   :  { %4803 = vmatmul.mubr.f32.gmra.mrb[22].mxu0 %v4579_v31  ;;  %4880 = vmatmul.mubr.f32.gmra.mrb[22].mxu1 %v4579_v31  ;;  %v11574_v31 = vpack.c.bf16 %v135_v63, %v131_v56  ;;  %v12108_v63 = vsub.s32 0, %v10645_v61 }
 0x9d4   :  { %7619 = vmatpush1.bf16.msra.mxu0 %v11462_v19  ;;  %7651 = vmatpush1.bf16.msra.mxu1 %v11464_v60 }
 0x9d5   :  { %7621 = vmatprep.subr.bf16.mxu0 %v11472_v8  ;;  %7653 = vmatprep.subr.bf16.mxu1 %v11474_v44  ;;  %v4715_v0 = vrot.slane %v4710_v38, %v12108_v63 }
 0x9d6   :  { %4950 = vmatprep.mubr.f32.mxu0 %v9074_v50  ;;  %5021 = vmatprep.mubr.f32.mxu1 %v9074_v50 }
 0x9d8   :  { %7623 = vmatpush1.bf16.msra.mxu0 %v11498_v35  ;;  %7655 = vmatpush1.bf16.msra.mxu1 %v11500_v54 }
 0x9d9   :  { %7625 = vmatprep.subr.bf16.mxu0 %v11510_v32  ;;  %7657 = vmatprep.subr.bf16.mxu1 %v11512_v26 }
 0x9dc   :  { %7627 = vmatpush1.bf16.msra.mxu0 %v11536_v42  ;;  %7659 = vmatpush1.bf16.msra.mxu1 %v11538_v43 }
 0x9dd   :  { %7629 = vmatprep.subr.bf16.mxu0 %v11548_v55  ;;  %7661 = vmatprep.subr.bf16.mxu1 %v11550_v62 }
 0x9e0   :  { %7631 = vmatpush1.bf16.msra.mxu0 %v11572_v4  ;;  %7663 = vmatpush1.bf16.msra.mxu1 %v11574_v31 }
 0x9e1   :  { %7633 = vmatprep.subr.bf16.mxu0 %v11584_v11  ;;  %7665 = vmatprep.subr.bf16.mxu1 %v11586_v12 }
 0x9e4   :  { %7635 = vmatpush1.bf16.msra.mxu0 %v11608_v46  ;;  %7667 = vmatpush1.bf16.msra.mxu1 %v11610_v49 }
 0x9e5   :  { %7637 = vmatprep.subr.bf16.mxu0 %v11620_v20  ;;  %7669 = vmatprep.subr.bf16.mxu1 %v11622_v13 }
 0x9e8   :  { %7639 = vmatpush1.bf16.msra.mxu0 %v11644_v5  ;;  %7671 = vmatpush1.bf16.msra.mxu1 %v11646_v37 }
 0x9e9   :  { %7641 = vmatprep.subr.bf16.mxu0 %v11653_v23  ;;  %7673 = vmatprep.subr.bf16.mxu1 %v11655_v9 }
 0x9ec   :  { %7643 = vmatpush1.bf16.msra.mxu0 %v11668_v30  ;;  %7675 = vmatpush1.bf16.msra.mxu1 %v11670_v36 }
 0x9ed   :  { %7677 = vmatprep.subr.bf16.mxu0 %v11372_v48  ;;  %7709 = vmatprep.subr.bf16.mxu1 %v11377_v58 }
 0x9ef   :  { %4951 = vmatmul.mubr.f32.vlgmr.msra.gmra.mrb[24].mxu0 %v9074_v50  ;;  %5022 = vmatmul.mubr.f32.vlgmr.msra.gmra.mrb[24].mxu1 %v9074_v50 }
 0x9f0   :  { %7679 = vmatpush1.bf16.msra.mxu0 %v11424_v28  ;;  %7711 = vmatpush1.bf16.msra.mxu1 %v11426_v33 }
 0x9f1   :  { %7681 = vmatprep.subr.bf16.mxu0 %v11447_v22  ;;  %7713 = vmatprep.subr.bf16.mxu1 %v11449_v17 }
 0x9f2   :  { %5121 = vmatprep.mubr.f32.mxu0 %v9074_v50  ;;  %5192 = vmatprep.mubr.f32.mxu1 %v9074_v50 }
 0x9f4   :  { %7683 = vmatpush1.bf16.msra.mxu0 %v11462_v19  ;;  %7715 = vmatpush1.bf16.msra.mxu1 %v11464_v60 }
 0x9f5   :  { %7685 = vmatprep.subr.bf16.mxu0 %v11472_v8  ;;  %7717 = vmatprep.subr.bf16.mxu1 %v11474_v44 }
 0x9f8   :  { %7687 = vmatpush1.bf16.msra.mxu0 %v11498_v35  ;;  %7719 = vmatpush1.bf16.msra.mxu1 %v11500_v54 }
 0x9f9   :  { %7689 = vmatprep.subr.bf16.mxu0 %v11510_v32  ;;  %7721 = vmatprep.subr.bf16.mxu1 %v11512_v26 }
 0x9fc   :  { %7691 = vmatpush1.bf16.msra.mxu0 %v11536_v42  ;;  %7723 = vmatpush1.bf16.msra.mxu1 %v11538_v43 }
 0x9fd   :  { %7693 = vmatprep.subr.bf16.mxu0 %v11548_v55  ;;  %7725 = vmatprep.subr.bf16.mxu1 %v11550_v62 }
 0xa00   :  { %7695 = vmatpush1.bf16.msra.mxu0 %v11572_v4  ;;  %7727 = vmatpush1.bf16.msra.mxu1 %v11574_v31 }
 0xa01   :  { %7697 = vmatprep.subr.bf16.mxu0 %v11584_v11  ;;  %7729 = vmatprep.subr.bf16.mxu1 %v11586_v12 }
 0xa04   :  { %7699 = vmatpush1.bf16.msra.mxu0 %v11608_v46  ;;  %7731 = vmatpush1.bf16.msra.mxu1 %v11610_v49 }
 0xa05   :  { %7701 = vmatprep.subr.bf16.mxu0 %v11620_v20  ;;  %7733 = vmatprep.subr.bf16.mxu1 %v11622_v13 }
 0xa08   :  { %7703 = vmatpush1.bf16.msra.mxu0 %v11644_v5  ;;  %7735 = vmatpush1.bf16.msra.mxu1 %v11646_v37 }
 0xa09   :  { %7705 = vmatprep.subr.bf16.mxu0 %v11653_v23  ;;  %7737 = vmatprep.subr.bf16.mxu1 %v11655_v9 }
 0xa0c   :  { %7707 = vmatpush1.bf16.msra.mxu0 %v11668_v30  ;;  %7739 = vmatpush1.bf16.msra.mxu1 %v11670_v36 }
 0xa0d   :  { %7741 = vmatprep.subr.bf16.mxu0 %v11372_v48  ;;  %7773 = vmatprep.subr.bf16.mxu1 %v11377_v58 }
 0xaa2   :  { %v4798_v39 = vpop.f32.mrb[20].mxu0  ;;  %v4875_v51 = vpop.f32.mrb[20].mxu1 }
 0xaa3   :  { %v4800_v52 = vpop.f32.mrb[21].mxu0  ;;  %v4877_v56 = vpop.f32.mrb[21].mxu1  ;;  %v11733_v7 = vadd.f32 %v4798_v39, %v4715_v0  ;;  %v11739_v38 = vadd.f32 %v4875_v51, %v4723_v29 }
 0xaa4   :  { %v11735_v41 = vadd.f32 %v4800_v52, %v4719_v10  ;;  %v11742_v39 = vadd.f32 %v4877_v56, %v4727_v15 }
 0xaa6   :  { %v4804_v16 = vpop.f32.mrb[22].mxu0  ;;  %v4881_v2 = vpop.f32.mrb[22].mxu1 }
 0xaa7   :  { %v11725_v25 = vadd.f32 %v4804_v16, %v4715_v0  ;;  %v11727_v34 = vadd.f32 %v4881_v2, %v4723_v29  ;;  %v4806_v45 = vpop.f32.mrb[23].mxu0  ;;  %v4883_v59 = vpop.f32.mrb[23].mxu1 }
 0xaa8   :  { %v11729_v1 = vadd.f32 %v4806_v45, %v4719_v10  ;;  %v11731_v18 = vadd.f32 %v4883_v59, %v4727_v15 }
 0xac2   :  { %v4952_v57 = vpop.f32.mrb[24].mxu0  ;;  %v5023_v21 = vpop.f32.mrb[24].mxu1 }
 0xac3   :  { %v5028_v61 = vadd.f32 %v4952_v57, %v11733_v7  ;;  %v4954_v47 = vpop.f32.mrb[25].mxu0  ;;  %v5025_v40 = vpop.f32.mrb[25].mxu1  ;;  %v5030_v63 = vadd.f32 %v5023_v21, %v11739_v38 }
 0xac4   :  { %v5029_v14 = vadd.f32 %v4954_v47, %v11735_v41  ;;  %v5031_v52 = vadd.f32 %v5025_v40, %v11742_v39 }
 0xac5   :  { %v6895_v27 = vmul.f32 -1.442695, %v5028_v61  ;;  %v6897_v0 = vmul.f32 -1.442695, %v5030_v63 }
 0xac6   :  { %v6896_v24 = vmul.f32 -1.442695, %v5029_v14 }
 0xac7   :  { %8922 = vpow2.f32 %v6895_v27 }
 0xac8   :  { %8924 = vpow2.f32 %v6896_v24 }
 0xac9   :  { %8926 = vtanh.f32 %v5031_v52 }
 0xaca   :  { %8928 = vpow2.f32 %v6897_v0 }
 0xad1   :  { %v8923_v3 = vpop.eup %8922 }
 0xad2   :  { %v5041_v6 = vadd.f32 1.0, %v8923_v3  ;;  %v8925_v10 = vpop.eup %8924 }
 0xad3   :  { %v5042_v53 = vadd.f32 1.0, %v8925_v10  ;;  %v8927_v16 = vpop.eup %8926 }
 0xad4   :  { %8930 = vrcp.f32 %v5041_v6  ;;  %v8929_v2 = vpop.eup %8928 }
 0xad5   :  { %8932 = vrcp.f32 %v5042_v53  ;;  %v5043_v59 = vadd.f32 1.0, %v8929_v2 }
 0xad7   :  { %8934 = vrcp.f32 %v5043_v59 }
 0xade   :  { %v8931_v51 = vpop.eup %8930 }
 0xadf   :  { %v5052_v29 = vmul.f32 %v8931_v51, %v8927_v16  ;;  %v8933_v45 = vpop.eup %8932 }
 0xae0   :  { %v5051_v57 = vmul.f32 0.0, %v8933_v45 }
 0xae1   :  { %v8935_v15 = vpop.eup %8934 }
 0xae2   :  { %v11745_v56 = vadd.f32 %v5052_v29, %v5051_v57 }
 0xae4   :  { %8936 = vtanh.f32 %v11745_v56 }
 0xaee   :  { %v8937_v21 = vpop.eup %8936 }
 0xaef   :  { %v11748_v61 = vmul.f32 %v8937_v21, %v8935_v15 }
 0xaf1   :  { %5122 = vmatmul.mubr.f32.vlgmr.msra.gmra.mrb[26].mxu0 %v11748_v61  ;;  %5193 = vmatmul.mubr.f32.vlgmr.msra.gmra.mrb[26].mxu1 %v11748_v61 }
 0xaf2   :  { %7743 = vmatpush1.bf16.msra.mxu0 %v11424_v28  ;;  %7775 = vmatpush1.bf16.msra.mxu1 %v11426_v33 }
 0xaf3   :  { %7745 = vmatprep.subr.bf16.mxu0 %v11447_v22  ;;  %7777 = vmatprep.subr.bf16.mxu1 %v11449_v17 }
 0xaf4   :  { %5310 = vmatprep.mubr.f32.mxu0 %v9074_v50  ;;  %5381 = vmatprep.mubr.f32.mxu1 %v9074_v50 }
 0xaf6   :  { %7747 = vmatpush1.bf16.msra.mxu0 %v11462_v19  ;;  %7779 = vmatpush1.bf16.msra.mxu1 %v11464_v60 }
 0xaf7   :  { %7749 = vmatprep.subr.bf16.mxu0 %v11472_v8  ;;  %7781 = vmatprep.subr.bf16.mxu1 %v11474_v44 }
 0xafa   :  { %7751 = vmatpush1.bf16.msra.mxu0 %v11498_v35  ;;  %7783 = vmatpush1.bf16.msra.mxu1 %v11500_v54 }
 0xafb   :  { %7753 = vmatprep.subr.bf16.mxu0 %v11510_v32  ;;  %7785 = vmatprep.subr.bf16.mxu1 %v11512_v26 }
 0xafe   :  { %7755 = vmatpush1.bf16.msra.mxu0 %v11536_v42  ;;  %7787 = vmatpush1.bf16.msra.mxu1 %v11538_v43 }
 0xaff   :  { %7757 = vmatprep.subr.bf16.mxu0 %v11548_v55  ;;  %7789 = vmatprep.subr.bf16.mxu1 %v11550_v62 }
 0xb02   :  { %7759 = vmatpush1.bf16.msra.mxu0 %v11572_v4  ;;  %7791 = vmatpush1.bf16.msra.mxu1 %v11574_v31 }
 0xb03   :  { %7761 = vmatprep.subr.bf16.mxu0 %v11584_v11  ;;  %7793 = vmatprep.subr.bf16.mxu1 %v11586_v12 }
 0xb06   :  { %7763 = vmatpush1.bf16.msra.mxu0 %v11608_v46  ;;  %7795 = vmatpush1.bf16.msra.mxu1 %v11610_v49 }
 0xb07   :  { %7765 = vmatprep.subr.bf16.mxu0 %v11620_v20  ;;  %7797 = vmatprep.subr.bf16.mxu1 %v11622_v13 }
 0xb0a   :  { %7767 = vmatpush1.bf16.msra.mxu0 %v11644_v5  ;;  %7799 = vmatpush1.bf16.msra.mxu1 %v11646_v37 }
 0xb0b   :  { %7769 = vmatprep.subr.bf16.mxu0 %v11653_v23  ;;  %7801 = vmatprep.subr.bf16.mxu1 %v11655_v9 }
 0xb0e   :  { %7771 = vmatpush1.bf16.msra.mxu0 %v11668_v30  ;;  %7803 = vmatpush1.bf16.msra.mxu1 %v11670_v36 }
 0xb0f   :  { %7805 = vmatprep.subr.bf16.mxu0 %v11372_v48  ;;  %7837 = vmatprep.subr.bf16.mxu1 %v11377_v58 }
 0xbc4   :  { %v5123_v47 = vpop.f32.mrb[26].mxu0  ;;  %v5194_v40 = vpop.f32.mrb[26].mxu1 }
 0xbc5   :  { %v5203_v14 = vrot.slane %v5123_v47, 6  ;;  %v5125_v27 = vpop.f32.mrb[27].mxu0  ;;  %v5196_v24 = vpop.f32.mrb[27].mxu1  ;;  %v5205_v10 = vrot.slane %v5194_v40, 6  ;;  %v5235_v40 = vrot.slane %v11745_v56, 6 }
 0xbc6   :  { %v5204_v63 = vrot.slane %v5125_v27, 6  ;;  %v5206_v53 = vrot.slane %v5196_v24, 6 }
 0xbc7   :  { %v5211_v52 = vadd.f32 %v5203_v14, %v11733_v7  ;;  %v5213_v16 = vadd.f32 %v5205_v10, %v11739_v38 }
 0xbc8   :  { %v5212_v0 = vadd.f32 %v5204_v63, %v11735_v41  ;;  %v5214_v2 = vadd.f32 %v5206_v53, %v11742_v39 }
 0xbc9   :  { %v6898_v3 = vmul.f32 -1.442695, %v5211_v52  ;;  %v6900_v51 = vmul.f32 -1.442695, %v5213_v16 }
 0xbca   :  { %v6899_v6 = vmul.f32 -1.442695, %v5212_v0 }
 0xbcb   :  { %8938 = vpow2.f32 %v6898_v3 }
 0xbcc   :  { %8940 = vpow2.f32 %v6899_v6 }
 0xbcd   :  { %8942 = vtanh.f32 %v5214_v2 }
 0xbce   :  { %8944 = vpow2.f32 %v6900_v51 }
 0xbd5   :  { %v8939_v29 = vpop.eup %8938 }
 0xbd6   :  { %v5224_v45 = vadd.f32 1.0, %v8939_v29  ;;  %v8941_v59 = vpop.eup %8940 }
 0xbd7   :  { %v5225_v57 = vadd.f32 1.0, %v8941_v59  ;;  %v8943_v15 = vpop.eup %8942 }
 0xbd8   :  { %8946 = vrcp.f32 %v5224_v45  ;;  %v8945_v21 = vpop.eup %8944 }
 0xbd9   :  { %8948 = vrcp.f32 %v5225_v57  ;;  %v5226_v24 = vadd.f32 1.0, %v8945_v21 }
 0xbdb   :  { %8950 = vrcp.f32 %v5226_v24 }
 0xbe2   :  { %v8947_v47 = vpop.eup %8946 }
 0xbe3   :  { %v5238_v14 = vmul.f32 %v8947_v47, %v8943_v15  ;;  %v8949_v27 = vpop.eup %8948 }
 0xbe4   :  { %v5237_v63 = vmul.f32 %v8949_v27, %v5235_v40 }
 0xbe5   :  { %v8951_v0 = vpop.eup %8950 }
 0xbe6   :  { %v11791_v52 = vadd.f32 %v5238_v14, %v5237_v63 }
 0xbe8   :  { %8952 = vtanh.f32 %v11791_v52 }
 0xbf2   :  { %v8953_v3 = vpop.eup %8952 }
 0xbf3   :  { %v5241_v6 = vmul.f32 %v8953_v3, %v8951_v0 }
 0xbf5   :  { %v11794_v10 = vrot.slane %v5241_v6, 2 }
 0xbf7   :  { %5311 = vmatmul.mubr.f32.vlgmr.msra.gmra.mrb[28].mxu0 %v11794_v10  ;;  %5382 = vmatmul.mubr.f32.vlgmr.msra.gmra.mrb[28].mxu1 %v11794_v10 }
 0xbf8   :  { %7807 = vmatpush1.bf16.msra.mxu0 %v11424_v28  ;;  %7839 = vmatpush1.bf16.msra.mxu1 %v11426_v33 }
 0xbf9   :  { %7809 = vmatprep.subr.bf16.mxu0 %v11447_v22  ;;  %7841 = vmatprep.subr.bf16.mxu1 %v11449_v17 }
 0xbfa   :  { %5499 = vmatprep.mubr.f32.mxu0 %v9074_v50  ;;  %5570 = vmatprep.mubr.f32.mxu1 %v9074_v50 }
 0xbfc   :  { %7811 = vmatpush1.bf16.msra.mxu0 %v11462_v19  ;;  %7843 = vmatpush1.bf16.msra.mxu1 %v11464_v60 }
 0xbfd   :  { %7813 = vmatprep.subr.bf16.mxu0 %v11472_v8  ;;  %7845 = vmatprep.subr.bf16.mxu1 %v11474_v44 }
 0xc00   :  { %7815 = vmatpush1.bf16.msra.mxu0 %v11498_v35  ;;  %7847 = vmatpush1.bf16.msra.mxu1 %v11500_v54 }
 0xc01   :  { %7817 = vmatprep.subr.bf16.mxu0 %v11510_v32  ;;  %7849 = vmatprep.subr.bf16.mxu1 %v11512_v26 }
 0xc04   :  { %7819 = vmatpush1.bf16.msra.mxu0 %v11536_v42  ;;  %7851 = vmatpush1.bf16.msra.mxu1 %v11538_v43 }
 0xc05   :  { %7821 = vmatprep.subr.bf16.mxu0 %v11548_v55  ;;  %7853 = vmatprep.subr.bf16.mxu1 %v11550_v62 }
 0xc08   :  { %7823 = vmatpush1.bf16.msra.mxu0 %v11572_v4  ;;  %7855 = vmatpush1.bf16.msra.mxu1 %v11574_v31 }
 0xc09   :  { %7825 = vmatprep.subr.bf16.mxu0 %v11584_v11  ;;  %7857 = vmatprep.subr.bf16.mxu1 %v11586_v12 }
 0xc0c   :  { %7827 = vmatpush1.bf16.msra.mxu0 %v11608_v46  ;;  %7859 = vmatpush1.bf16.msra.mxu1 %v11610_v49 }
 0xc0d   :  { %7829 = vmatprep.subr.bf16.mxu0 %v11620_v20  ;;  %7861 = vmatprep.subr.bf16.mxu1 %v11622_v13 }
 0xc10   :  { %7831 = vmatpush1.bf16.msra.mxu0 %v11644_v5  ;;  %7863 = vmatpush1.bf16.msra.mxu1 %v11646_v37 }
 0xc11   :  { %7833 = vmatprep.subr.bf16.mxu0 %v11653_v23  ;;  %7865 = vmatprep.subr.bf16.mxu1 %v11655_v9 }
 0xc14   :  { %7835 = vmatpush1.bf16.msra.mxu0 %v11668_v30  ;;  %7867 = vmatpush1.bf16.msra.mxu1 %v11670_v36 }
 0xc15   :  { %7869 = vmatprep.subr.bf16.mxu0 %v11372_v48  ;;  %7901 = vmatprep.subr.bf16.mxu1 %v11377_v58 }
 0xcca   :  { %v5312_v56 = vpop.f32.mrb[28].mxu0  ;;  %v5383_v53 = vpop.f32.mrb[28].mxu1 }
 0xccb   :  { %v5392_v16 = vrot.slane %v5312_v56, 4  ;;  %v5314_v2 = vpop.f32.mrb[29].mxu0  ;;  %v5385_v51 = vpop.f32.mrb[29].mxu1  ;;  %v5394_v21 = vrot.slane %v5383_v53, 4  ;;  %v5424_v53 = vrot.slane %v11791_v52, 6 }
 0xccc   :  { %v5393_v29 = vrot.slane %v5314_v2, 4  ;;  %v5395_v47 = vrot.slane %v5385_v51, 4 }
 0xccd   :  { %v5400_v45 = vadd.f32 %v5392_v16, %v11733_v7  ;;  %v5402_v40 = vadd.f32 %v5394_v21, %v11739_v38 }
 0xcce   :  { %v5401_v59 = vadd.f32 %v5393_v29, %v11735_v41  ;;  %v5403_v14 = vadd.f32 %v5395_v47, %v11742_v39  ;;  %v5245_v47 = vadd.f32 %v11794_v10, %v11748_v61 }
 0xccf   :  { %v6901_v57 = vmul.f32 -1.442695, %v5400_v45  ;;  %v6903_v27 = vmul.f32 -1.442695, %v5402_v40 }
 0xcd0   :  { %v6902_v15 = vmul.f32 -1.442695, %v5401_v59 }
 0xcd1   :  { %8954 = vpow2.f32 %v6901_v57 }
 0xcd2   :  { %8956 = vpow2.f32 %v6902_v15 }
 0xcd3   :  { %8958 = vtanh.f32 %v5403_v14 }
 0xcd4   :  { %8960 = vpow2.f32 %v6903_v27 }
 0xcdb   :  { %v8955_v24 = vpop.eup %8954 }
 0xcdc   :  { %v5413_v63 = vadd.f32 1.0, %v8955_v24  ;;  %v8957_v0 = vpop.eup %8956 }
 0xcdd   :  { %v5414_v3 = vadd.f32 1.0, %v8957_v0  ;;  %v8959_v6 = vpop.eup %8958 }
 0xcde   :  { %8962 = vrcp.f32 %v5413_v63  ;;  %v8961_v56 = vpop.eup %8960 }
 0xcdf   :  { %8964 = vrcp.f32 %v5414_v3  ;;  %v5415_v29 = vadd.f32 1.0, %v8961_v56 }
 0xce1   :  { %8966 = vrcp.f32 %v5415_v29 }
 0xce8   :  { %v8963_v16 = vpop.eup %8962 }
 0xce9   :  { %v5427_v2 = vmul.f32 %v8963_v16, %v8959_v6  ;;  %v8965_v51 = vpop.eup %8964 }
 0xcea   :  { %v5426_v45 = vmul.f32 %v8965_v51, %v5424_v53 }
 0xceb   :  { %v8967_v57 = vpop.eup %8966 }
 0xcec   :  { %v11837_v59 = vadd.f32 %v5427_v2, %v5426_v45 }
 0xcee   :  { %8968 = vtanh.f32 %v11837_v59 }
 0xcf8   :  { %v8969_v15 = vpop.eup %8968 }
 0xcf9   :  { %v5430_v21 = vmul.f32 %v8969_v15, %v8967_v57 }
 0xcfb   :  { %v5432_v40 = vrot.slane %v5430_v21, 4 }
 0xcfd   :  { %v11842_v14 = vadd.f32 %v5432_v40, %v5245_v47  ;;  %5500 = vmatmul.mubr.f32.vlgmr.msra.gmra.mrb[30].mxu0 %v5432_v40  ;;  %5571 = vmatmul.mubr.f32.vlgmr.msra.gmra.mrb[30].mxu1 %v5432_v40  ;;  %v5613_v40 = vrot.slane %v11837_v59, 6 }
 0xcfe   :  { %7871 = vmatpush1.bf16.msra.mxu0 %v11424_v28  ;;  %7903 = vmatpush1.bf16.msra.mxu1 %v11426_v33 }
 0xcff   :  { %7873 = vmatprep.subr.bf16.mxu0 %v11447_v22  ;;  %7905 = vmatprep.subr.bf16.mxu1 %v11449_v17 }
 0xd00   :  { %5688 = vmatprep.mubr.f32.mxu0 %v9074_v50  ;;  %5759 = vmatprep.mubr.f32.mxu1 %v9074_v50 }
 0xd02   :  { %7875 = vmatpush1.bf16.msra.mxu0 %v11462_v19  ;;  %7907 = vmatpush1.bf16.msra.mxu1 %v11464_v60 }
 0xd03   :  { %7877 = vmatprep.subr.bf16.mxu0 %v11472_v8  ;;  %7909 = vmatprep.subr.bf16.mxu1 %v11474_v44 }
 0xd06   :  { %7879 = vmatpush1.bf16.msra.mxu0 %v11498_v35  ;;  %7911 = vmatpush1.bf16.msra.mxu1 %v11500_v54 }
 0xd07   :  { %7881 = vmatprep.subr.bf16.mxu0 %v11510_v32  ;;  %7913 = vmatprep.subr.bf16.mxu1 %v11512_v26 }
 0xd0a   :  { %7883 = vmatpush1.bf16.msra.mxu0 %v11536_v42  ;;  %7915 = vmatpush1.bf16.msra.mxu1 %v11538_v43 }
 0xd0b   :  { %7885 = vmatprep.subr.bf16.mxu0 %v11548_v55  ;;  %7917 = vmatprep.subr.bf16.mxu1 %v11550_v62 }
 0xd0e   :  { %7887 = vmatpush1.bf16.msra.mxu0 %v11572_v4  ;;  %7919 = vmatpush1.bf16.msra.mxu1 %v11574_v31 }
 0xd0f   :  { %7889 = vmatprep.subr.bf16.mxu0 %v11584_v11  ;;  %7921 = vmatprep.subr.bf16.mxu1 %v11586_v12 }
 0xd12   :  { %7891 = vmatpush1.bf16.msra.mxu0 %v11608_v46  ;;  %7923 = vmatpush1.bf16.msra.mxu1 %v11610_v49 }
 0xd13   :  { %7893 = vmatprep.subr.bf16.mxu0 %v11620_v20  ;;  %7925 = vmatprep.subr.bf16.mxu1 %v11622_v13 }
 0xd16   :  { %7895 = vmatpush1.bf16.msra.mxu0 %v11644_v5  ;;  %7927 = vmatpush1.bf16.msra.mxu1 %v11646_v37 }
 0xd17   :  { %7897 = vmatprep.subr.bf16.mxu0 %v11653_v23  ;;  %7929 = vmatprep.subr.bf16.mxu1 %v11655_v9 }
 0xd1a   :  { %7899 = vmatpush1.bf16.msra.mxu0 %v11668_v30  ;;  %7931 = vmatpush1.bf16.msra.mxu1 %v11670_v36 }
 0xd1b   :  { %7933 = vmatprep.subr.bf16.mxu0 %v11372_v48  ;;  %7965 = vmatprep.subr.bf16.mxu1 %v11377_v58 }
 0xdd0   :  { %v5501_v61 = vpop.f32.mrb[30].mxu0  ;;  %v5572_v52 = vpop.f32.mrb[30].mxu1 }
 0xdd1   :  { %v5581_v10 = vrot.slane %v5501_v61, 2  ;;  %v5503_v27 = vpop.f32.mrb[31].mxu0  ;;  %v5574_v24 = vpop.f32.mrb[31].mxu1  ;;  %v5583_v16 = vrot.slane %v5572_v52, 2 }
 0xdd2   :  { %v5582_v63 = vrot.slane %v5503_v27, 2  ;;  %v5584_v53 = vrot.slane %v5574_v24, 2 }
 0xdd3   :  { %v5589_v0 = vadd.f32 %v5581_v10, %v11733_v7  ;;  %v5591_v2 = vadd.f32 %v5583_v16, %v11739_v38 }
 0xdd4   :  { %v5590_v3 = vadd.f32 %v5582_v63, %v11735_v41  ;;  %v5592_v51 = vadd.f32 %v5584_v53, %v11742_v39 }
 0xdd5   :  { %v6904_v6 = vmul.f32 -1.442695, %v5589_v0  ;;  %v6906_v29 = vmul.f32 -1.442695, %v5591_v2 }
 0xdd6   :  { %v6905_v56 = vmul.f32 -1.442695, %v5590_v3 }
 0xdd7   :  { %8970 = vpow2.f32 %v6904_v6 }
 0xdd8   :  { %8972 = vpow2.f32 %v6905_v56 }
 0xdd9   :  { %8974 = vtanh.f32 %v5592_v51 }
 0xdda   :  { %8976 = vpow2.f32 %v6906_v29 }
 0xde1   :  { %v8971_v45 = vpop.eup %8970 }
 0xde2   :  { %v5602_v57 = vadd.f32 1.0, %v8971_v45  ;;  %v8973_v15 = vpop.eup %8972 }
 0xde3   :  { %v5603_v7 = vadd.f32 1.0, %v8973_v15  ;;  %v8975_v41 = vpop.eup %8974 }
 0xde4   :  { %8978 = vrcp.f32 %v5602_v57  ;;  %v8977_v21 = vpop.eup %8976 }
 0xde5   :  { %8980 = vrcp.f32 %v5603_v7  ;;  %v5604_v10 = vadd.f32 1.0, %v8977_v21 }
 0xde7   :  { %8982 = vrcp.f32 %v5604_v10 }
 0xdee   :  { %v8979_v47 = vpop.eup %8978 }
 0xdef   :  { %v5616_v61 = vmul.f32 %v8979_v47, %v8975_v41  ;;  %v8981_v52 = vpop.eup %8980 }
 0xdf0   :  { %v5615_v38 = vmul.f32 %v8981_v52, %v5613_v40 }
 0xdf1   :  { %v8983_v39 = vpop.eup %8982 }
 0xdf2   :  { %v11883_v27 = vadd.f32 %v5616_v61, %v5615_v38 }
 0xdf4   :  { %8984 = vtanh.f32 %v11883_v27  ;;  %v5790_v52 = vrot.slane %v11883_v27, 6 }
 0xdfe   :  { %v8985_v24 = vpop.eup %8984 }
 0xdff   :  { %v5619_v63 = vmul.f32 %v8985_v24, %v8983_v39 }
 0xe01   :  { %v5621_v0 = vrot.slane %v5619_v63, 6 }
 0xe03   :  { %v11887_v3 = vadd.f32 %v5621_v0, %v11842_v14  ;;  %5689 = vmatmul.mubr.f32.vlgmr.msra.gmra.mrb[32].mxu0 %v5621_v0  ;;  %5760 = vmatmul.mubr.f32.vlgmr.msra.gmra.mrb[32].mxu1 %v5621_v0 }
 0xe04   :  { %7935 = vmatpush1.bf16.msra.mxu0 %v11424_v28  ;;  %7967 = vmatpush1.bf16.msra.mxu1 %v11426_v33 }
 0xe05   :  { %7937 = vmatprep.subr.bf16.mxu0 %v11447_v22  ;;  %7969 = vmatprep.subr.bf16.mxu1 %v11449_v17 }
 0xe06   :  { %5862 = vmatprep.mubr.f32.mxu0 %v9074_v50  ;;  %5933 = vmatprep.mubr.f32.mxu1 %v9074_v50 }
 0xe08   :  { %7939 = vmatpush1.bf16.msra.mxu0 %v11462_v19  ;;  %7971 = vmatpush1.bf16.msra.mxu1 %v11464_v60 }
 0xe09   :  { %7941 = vmatprep.subr.bf16.mxu0 %v11472_v8  ;;  %7973 = vmatprep.subr.bf16.mxu1 %v11474_v44 }
 0xe0c   :  { %7943 = vmatpush1.bf16.msra.mxu0 %v11498_v35  ;;  %7975 = vmatpush1.bf16.msra.mxu1 %v11500_v54 }
 0xe0d   :  { %7945 = vmatprep.subr.bf16.mxu0 %v11510_v32  ;;  %7977 = vmatprep.subr.bf16.mxu1 %v11512_v26 }
 0xe10   :  { %7947 = vmatpush1.bf16.msra.mxu0 %v11536_v42  ;;  %7979 = vmatpush1.bf16.msra.mxu1 %v11538_v43 }
 0xe11   :  { %7949 = vmatprep.subr.bf16.mxu0 %v11548_v55  ;;  %7981 = vmatprep.subr.bf16.mxu1 %v11550_v62 }
 0xe14   :  { %7951 = vmatpush1.bf16.msra.mxu0 %v11572_v4  ;;  %7983 = vmatpush1.bf16.msra.mxu1 %v11574_v31 }
 0xe15   :  { %7953 = vmatprep.subr.bf16.mxu0 %v11584_v11  ;;  %7985 = vmatprep.subr.bf16.mxu1 %v11586_v12 }
 0xe18   :  { %7955 = vmatpush1.bf16.msra.mxu0 %v11608_v46  ;;  %7987 = vmatpush1.bf16.msra.mxu1 %v11610_v49 }
 0xe19   :  { %7957 = vmatprep.subr.bf16.mxu0 %v11620_v20  ;;  %7989 = vmatprep.subr.bf16.mxu1 %v11622_v13 }
 0xe1c   :  { %7959 = vmatpush1.bf16.msra.mxu0 %v11644_v5  ;;  %7991 = vmatpush1.bf16.msra.mxu1 %v11646_v37 }
 0xe1d   :  { %7961 = vmatprep.subr.bf16.mxu0 %v11653_v23  ;;  %7993 = vmatprep.subr.bf16.mxu1 %v11655_v9 }
 0xe20   :  { %7963 = vmatpush1.bf16.msra.mxu0 %v11668_v30  ;;  %7995 = vmatpush1.bf16.msra.mxu1 %v11670_v36 }
 0xe21   :  { %7997 = vmatprep.subr.bf16.mxu0 %v11372_v48  ;;  %8029 = vmatprep.subr.bf16.mxu1 %v11377_v58 }
 0xed6   :  { %v5690_v59 = vpop.f32.mrb[32].mxu0  ;;  %v5761_v14 = vpop.f32.mrb[32].mxu1 }
 0xed7   :  { %v5766_v6 = vadd.f32 %v5690_v59, %v11725_v25  ;;  %v5692_v56 = vpop.f32.mrb[33].mxu0  ;;  %v5763_v16 = vpop.f32.mrb[33].mxu1  ;;  %v5768_v29 = vadd.f32 %v5761_v14, %v11727_v34 }
 0xed8   :  { %v5767_v53 = vadd.f32 %v5692_v56, %v11729_v1  ;;  %v5769_v45 = vadd.f32 %v5763_v16, %v11731_v18 }
 0xed9   :  { %v6907_v2 = vmul.f32 -1.442695, %v5766_v6  ;;  %v6909_v57 = vmul.f32 -1.442695, %v5768_v29 }
 0xeda   :  { %v6908_v51 = vmul.f32 -1.442695, %v5767_v53 }
 0xedb   :  { %8986 = vpow2.f32 %v6907_v2 }
 0xedc   :  { %8988 = vpow2.f32 %v6908_v51 }
 0xedd   :  { %8990 = vtanh.f32 %v5769_v45 }
 0xede   :  { %8992 = vpow2.f32 %v6909_v57 }
 0xee5   :  { %v8987_v15 = vpop.eup %8986 }
 0xee6   :  { %v5779_v7 = vadd.f32 1.0, %v8987_v15  ;;  %v8989_v41 = vpop.eup %8988 }
 0xee7   :  { %v5780_v21 = vadd.f32 1.0, %v8989_v41  ;;  %v8991_v47 = vpop.eup %8990 }
 0xee8   :  { %8994 = vrcp.f32 %v5779_v7  ;;  %v8993_v40 = vpop.eup %8992 }
 0xee9   :  { %8996 = vrcp.f32 %v5780_v21  ;;  %v5781_v39 = vadd.f32 1.0, %v8993_v40 }
 0xeeb   :  { %8998 = vrcp.f32 %v5781_v39 }
 0xef2   :  { %v8995_v61 = vpop.eup %8994 }
 0xef3   :  { %v5793_v10 = vmul.f32 %v8995_v61, %v8991_v47  ;;  %v8997_v38 = vpop.eup %8996 }
 0xef4   :  { %v5792_v24 = vmul.f32 %v8997_v38, %v5790_v52 }
 0xef5   :  { %v8999_v0 = vpop.eup %8998 }
 0xef6   :  { %v11928_v63 = vadd.f32 %v5793_v10, %v5792_v24 }
 0xef8   :  { %9000 = vtanh.f32 %v11928_v63  ;;  %v5976_v39 = vrot.slane %v11928_v63, 6 }
 0xf02   :  { %v9001_v59 = vpop.eup %9000 }
 0xf03   :  { %v5796_v14 = vmul.f32 %v9001_v59, %v8999_v0 }
 0xf05   :  { %v11932_v6 = vadd.f32 %v5796_v14, %v11887_v3  ;;  %5863 = vmatmul.mubr.f32.vlgmr.msra.gmra.mrb[34].mxu0 %v5796_v14  ;;  %5934 = vmatmul.mubr.f32.vlgmr.msra.gmra.mrb[34].mxu1 %v5796_v14 }
 0xf06   :  { %7999 = vmatpush1.bf16.msra.mxu0 %v11424_v28  ;;  %8031 = vmatpush1.bf16.msra.mxu1 %v11426_v33 }
 0xf07   :  { %8001 = vmatprep.subr.bf16.mxu0 %v11447_v22  ;;  %8033 = vmatprep.subr.bf16.mxu1 %v11449_v17 }
 0xf08   :  { %6051 = vmatprep.mubr.f32.mxu0 %v9074_v50  ;;  %6122 = vmatprep.mubr.f32.mxu1 %v9074_v50 }
 0xf0a   :  { %8003 = vmatpush1.bf16.msra.mxu0 %v11462_v19  ;;  %8035 = vmatpush1.bf16.msra.mxu1 %v11464_v60 }
 0xf0b   :  { %8005 = vmatprep.subr.bf16.mxu0 %v11472_v8  ;;  %8037 = vmatprep.subr.bf16.mxu1 %v11474_v44 }
 0xf0e   :  { %8007 = vmatpush1.bf16.msra.mxu0 %v11498_v35  ;;  %8039 = vmatpush1.bf16.msra.mxu1 %v11500_v54 }
 0xf0f   :  { %8009 = vmatprep.subr.bf16.mxu0 %v11510_v32  ;;  %8041 = vmatprep.subr.bf16.mxu1 %v11512_v26 }
 0xf12   :  { %8011 = vmatpush1.bf16.msra.mxu0 %v11536_v42  ;;  %8043 = vmatpush1.bf16.msra.mxu1 %v11538_v43 }
 0xf13   :  { %8013 = vmatprep.subr.bf16.mxu0 %v11548_v55  ;;  %8045 = vmatprep.subr.bf16.mxu1 %v11550_v62 }
 0xf16   :  { %8015 = vmatpush1.bf16.msra.mxu0 %v11572_v4  ;;  %8047 = vmatpush1.bf16.msra.mxu1 %v11574_v31 }
 0xf17   :  { %8017 = vmatprep.subr.bf16.mxu0 %v11584_v11  ;;  %8049 = vmatprep.subr.bf16.mxu1 %v11586_v12 }
 0xf1a   :  { %8019 = vmatpush1.bf16.msra.mxu0 %v11608_v46  ;;  %8051 = vmatpush1.bf16.msra.mxu1 %v11610_v49 }
 0xf1b   :  { %8021 = vmatprep.subr.bf16.mxu0 %v11620_v20  ;;  %8053 = vmatprep.subr.bf16.mxu1 %v11622_v13 }
 0xf1e   :  { %8023 = vmatpush1.bf16.msra.mxu0 %v11644_v5  ;;  %8055 = vmatpush1.bf16.msra.mxu1 %v11646_v37 }
 0xf1f   :  { %8025 = vmatprep.subr.bf16.mxu0 %v11653_v23  ;;  %8057 = vmatprep.subr.bf16.mxu1 %v11655_v9 }
 0xf22   :  { %8027 = vmatpush1.bf16.msra.mxu0 %v11668_v30  ;;  %8059 = vmatpush1.bf16.msra.mxu1 %v11670_v36 }
 0xf23   :  { %8061 = vmatprep.subr.bf16.mxu0 %v11372_v48  ;;  %8093 = vmatprep.subr.bf16.mxu1 %v11377_v58 }
 0xfd8   :  { %v5864_v27 = vpop.f32.mrb[34].mxu0  ;;  %v5935_v3 = vpop.f32.mrb[34].mxu1 }
 0xfd9   :  { %v5944_v56 = vrot.slane %v5864_v27, 6  ;;  %v5866_v16 = vpop.f32.mrb[35].mxu0  ;;  %v5937_v53 = vpop.f32.mrb[35].mxu1  ;;  %v5946_v15 = vrot.slane %v5935_v3, 6 }
 0xfda   :  { %v5945_v2 = vrot.slane %v5866_v16, 6  ;;  %v5947_v7 = vrot.slane %v5937_v53, 6 }
 0xfdb   :  { %v5952_v51 = vadd.f32 %v5944_v56, %v11725_v25  ;;  %v5954_v48 = vadd.f32 %v5946_v15, %v11727_v34  ;;  %v9075_v15 = vmov 0.0|0.0  }
 0xfdc   :  { %v5953_v29 = vadd.f32 %v5945_v2, %v11729_v1  ;;  %v5955_v58 = vadd.f32 %v5947_v7, %v11731_v18  ;;  %v6368_v7 = vld [vmem:[%s12099_s7 + $0x10] sm:$0xff] }
 0xfdd   :  { %v6910_v45 = vmul.f32 -1.442695, %v5952_v51  ;;  %v6912_v41 = vmul.f32 -1.442695, %v5954_v48  ;;  %v6369_v48 = vld [vmem:[%s12099_s7 + $0x18] sm:$0xff] }
 0xfde   :  { %v6911_v57 = vmul.f32 -1.442695, %v5953_v29  ;;  %v6366_v29 = vld [vmem:[%s12099_s7] sm:$0xff] }
 0xfdf   :  { %9002 = vpow2.f32 %v6910_v45  ;;  %v6367_v45 = vld [vmem:[%s12099_s7 + $0x8] sm:$0xff] }
 0xfe0   :  { %9004 = vpow2.f32 %v6911_v57  ;;  %v8125_v57 = vpack.c.bf16 %v6367_v45, %v6366_v29 }
 0xfe1   :  { %9006 = vtanh.f32 %v5955_v58  ;;  %v8128_v58 = vpack.c.bf16 %v6369_v48, %v6368_v7 }
 0xfe2   :  { %9008 = vpow2.f32 %v6912_v41  ;;  %v6370_v41 = vld [vmem:[%s12099_s7 + $0x20] sm:$0xff] }
 0xfe9   :  { %v9003_v21 = vpop.eup %9002 }
 0xfea   :  { %v5965_v47 = vadd.f32 1.0, %v9003_v21  ;;  %v9005_v40 = vpop.eup %9004  ;;  %v6371_v21 = vld [vmem:[%s12099_s7 + $0x28] sm:$0xff] }
 0xfeb   :  { %v5966_v61 = vadd.f32 1.0, %v9005_v40  ;;  %v9007_v52 = vpop.eup %9006  ;;  %v6372_v40 = vld [vmem:[%s12099_s7 + $0x30] sm:$0xff] }
 0xfec   :  { %9010 = vrcp.f32 %v5965_v47  ;;  %v9009_v10 = vpop.eup %9008  ;;  %v8131_v47 = vpack.c.bf16 %v6371_v21, %v6370_v41 }
 0xfed   :  { %9012 = vrcp.f32 %v5966_v61  ;;  %v5967_v59 = vadd.f32 1.0, %v9009_v10  ;;  %v6373_v61 = vld [vmem:[%s12099_s7 + $0x38] sm:$0xff]  ;;  %v6374_v10 = vld [vmem:[%s12099_s7 + $0x40] sm:$0xff] }
 0xfef   :  { %9014 = vrcp.f32 %v5967_v59 }
 0xff6   :  { %v9011_v38 = vpop.eup %9010 }
 0xff7   :  { %v5979_v24 = vmul.f32 %v9011_v38, %v9007_v52  ;;  %v9013_v0 = vpop.eup %9012  ;;  %v8134_v52 = vpack.c.bf16 %v6373_v61, %v6372_v40  ;;  %v6375_v38 = vld [vmem:[%s12099_s7 + $0x48] sm:$0xff] }
 0xff8   :  { %v5978_v14 = vmul.f32 %v9013_v0, %v5976_v39  ;;  %v8137_v39 = vpack.c.bf16 %v6375_v38, %v6374_v10  ;;  %v6377_v0 = vld [vmem:[%s12099_s7 + $0x58] sm:$0xff] }
 0xff9   :  { %v9015_v3 = vpop.eup %9014 }
 0xffa   :  { %v11973_v27 = vadd.f32 %v5979_v24, %v5978_v14  ;;  %v6376_v24 = vld [vmem:[%s12099_s7 + $0x50] sm:$0xff]  ;;  %v6378_v14 = vld [vmem:[%s12099_s7 + $0x60] sm:$0xff] }
 0xffb   :  { %v8140_v59 = vpack.c.bf16 %v6377_v0, %v6376_v24 }
 0xffc   :  { %9016 = vtanh.f32 %v11973_v27 }
0x1006   :  { %v9017_v56 = vpop.eup %9016 }
0x1007   :  { %v5982_v16 = vmul.f32 %v9017_v56, %v9015_v3  ;;  %v6380_v56 = vld [vmem:[%s12099_s7 + $0x70] sm:$0xff] }
0x1009   :  { %v5984_v53 = vrot.slane %v5982_v16, 2 }
0x100b   :  { %6052 = vmatmul.mubr.f32.vlgmr.msra.gmra.mrb[36].mxu0 %v5984_v53  ;;  %6123 = vmatmul.mubr.f32.vlgmr.msra.gmra.mrb[36].mxu1 %v5984_v53  ;;  %v11977_v2 = vadd.f32 %v5984_v53, %v11932_v6 }
0x100c   :  { %8063 = vmatpush1.bf16.msra.mxu0 %v11424_v28  ;;  %8095 = vmatpush1.bf16.msra.mxu1 %v11426_v33 }
0x100d   :  { %8065 = vmatprep.subr.bf16.mxu0 %v11447_v22  ;;  %8097 = vmatprep.subr.bf16.mxu1 %v11449_v17 }
0x100e   :  { %6240 = vmatprep.mubr.f32.mxu0 %v9074_v50  ;;  %6311 = vmatprep.mubr.f32.mxu1 %v9074_v50 }
0x1010   :  { %8067 = vmatpush1.bf16.msra.mxu0 %v11462_v19  ;;  %8099 = vmatpush1.bf16.msra.mxu1 %v11464_v60 }
0x1011   :  { %8069 = vmatprep.subr.bf16.mxu0 %v11472_v8  ;;  %8101 = vmatprep.subr.bf16.mxu1 %v11474_v44 }
0x1014   :  { %8071 = vmatpush1.bf16.msra.mxu0 %v11498_v35  ;;  %8103 = vmatpush1.bf16.msra.mxu1 %v11500_v54 }
0x1015   :  { %8073 = vmatprep.subr.bf16.mxu0 %v11510_v32  ;;  %8105 = vmatprep.subr.bf16.mxu1 %v11512_v26 }
0x1018   :  { %8075 = vmatpush1.bf16.msra.mxu0 %v11536_v42  ;;  %8107 = vmatpush1.bf16.msra.mxu1 %v11538_v43 }
0x1019   :  { %8077 = vmatprep.subr.bf16.mxu0 %v11548_v55  ;;  %8109 = vmatprep.subr.bf16.mxu1 %v11550_v62 }
0x101c   :  { %8079 = vmatpush1.bf16.msra.mxu0 %v11572_v4  ;;  %8111 = vmatpush1.bf16.msra.mxu1 %v11574_v31 }
0x101d   :  { %8081 = vmatprep.subr.bf16.mxu0 %v11584_v11  ;;  %8113 = vmatprep.subr.bf16.mxu1 %v11586_v12 }
0x1020   :  { %8083 = vmatpush1.bf16.msra.mxu0 %v11608_v46  ;;  %8115 = vmatpush1.bf16.msra.mxu1 %v11610_v49 }
0x1021   :  { %8085 = vmatprep.subr.bf16.mxu0 %v11620_v20  ;;  %8117 = vmatprep.subr.bf16.mxu1 %v11622_v13  ;;  %v6165_v20 = vrot.slane %v11973_v27, 6  ;;  %v6379_v27 = vld [vmem:[%s12099_s7 + $0x68] sm:$0xff] }
0x1022   :  { %v8143_v3 = vpack.c.bf16 %v6379_v27, %v6378_v14 }
0x1024   :  { %8087 = vmatpush1.bf16.msra.mxu0 %v11644_v5  ;;  %8119 = vmatpush1.bf16.msra.mxu1 %v11646_v37 }
0x1025   :  { %8089 = vmatprep.subr.bf16.mxu0 %v11653_v23  ;;  %8121 = vmatprep.subr.bf16.mxu1 %v11655_v9 }
0x1028   :  { %8091 = vmatpush1.bf16.msra.mxu0 %v11668_v30  ;;  %8123 = vmatpush1.bf16.msra.mxu1 %v11670_v36 }
0x1029   :  { %8124 = vmatprep.subr.bf16.mxu0 %v9075_v15 }
0x10de   :  { %v6053_v28 = vpop.f32.mrb[36].mxu0  ;;  %v6124_v33 = vpop.f32.mrb[36].mxu1 }
0x10df   :  { %v6133_v22 = vrot.slane %v6053_v28, 4  ;;  %v6055_v17 = vpop.f32.mrb[37].mxu0  ;;  %v6126_v19 = vpop.f32.mrb[37].mxu1  ;;  %v6135_v32 = vrot.slane %v6124_v33, 4 }
0x10e0   :  { %v6134_v60 = vrot.slane %v6055_v17, 4  ;;  %v6136_v26 = vrot.slane %v6126_v19, 4 }
0x10e1   :  { %v6141_v8 = vadd.f32 %v6133_v22, %v11725_v25  ;;  %v6143_v42 = vadd.f32 %v6135_v32, %v11727_v34 }
0x10e2   :  { %v6142_v44 = vadd.f32 %v6134_v60, %v11729_v1  ;;  %v6144_v43 = vadd.f32 %v6136_v26, %v11731_v18 }
0x10e3   :  { %v6913_v35 = vmul.f32 -1.442695, %v6141_v8  ;;  %v6915_v55 = vmul.f32 -1.442695, %v6143_v42 }
0x10e4   :  { %v6914_v54 = vmul.f32 -1.442695, %v6142_v44 }
0x10e5   :  { %9018 = vpow2.f32 %v6913_v35 }
0x10e6   :  { %9020 = vpow2.f32 %v6914_v54 }
0x10e7   :  { %9022 = vtanh.f32 %v6144_v43 }
0x10e8   :  { %9024 = vpow2.f32 %v6915_v55 }
0x10ef   :  { %v9019_v62 = vpop.eup %9018 }
0x10f0   :  { %v6154_v4 = vadd.f32 1.0, %v9019_v62  ;;  %v9021_v31 = vpop.eup %9020 }
0x10f1   :  { %v6155_v11 = vadd.f32 1.0, %v9021_v31  ;;  %v9023_v12 = vpop.eup %9022 }
0x10f2   :  { %9026 = vrcp.f32 %v6154_v4  ;;  %v9025_v46 = vpop.eup %9024 }
0x10f3   :  { %9028 = vrcp.f32 %v6155_v11  ;;  %v6156_v37 = vadd.f32 1.0, %v9025_v46 }
0x10f5   :  { %9030 = vrcp.f32 %v6156_v37 }
0x10fc   :  { %v9027_v49 = vpop.eup %9026 }
0x10fd   :  { %v6168_v13 = vmul.f32 %v9027_v49, %v9023_v12  ;;  %v9029_v5 = vpop.eup %9028 }
0x10fe   :  { %v6167_v23 = vmul.f32 %v9029_v5, %v6165_v20 }
0x10ff   :  { %v9031_v30 = vpop.eup %9030 }
0x1100   :  { %v12016_v9 = vadd.f32 %v6168_v13, %v6167_v23 }
0x1102   :  { %9032 = vtanh.f32 %v12016_v9  ;;  %v6354_v11 = vrot.slane %v12016_v9, 6 }
0x110c   :  { %v9033_v36 = vpop.eup %9032 }
0x110d   :  { %v6171_v63 = vmul.f32 %v9033_v36, %v9031_v30  ;;  %v6919_v36 = vld [vmem:[%s12100_s8] ss:$0 sm:$0xff] }
0x110f   :  { %v6173_v6 = vrot.slane %v6171_v63, 4 }
0x1111   :  { %6241 = vmatmul.mubr.f32.vlgmr.msra.gmra.mrb[38].mxu0 %v6173_v6  ;;  %6312 = vmatmul.mubr.f32.vlgmr.msra.gmra.mrb[38].mxu1 %v6173_v6  ;;  %v12020_v51 = vadd.f32 %v6173_v6, %v11977_v2 }
0x1112   :  { %8126 = vmatpush3.bf16.msra.mxu0 %v8125_v57  ;;  %6969 = vmatprep.mubr.msk.f32.mxu0 %vm9076_vm4, %v9074_v50  ;;  %v6381_v50 = vld [vmem:[%s12099_s7 + $0x78] sm:$0xff] }
0x1113   :  { %8127 = vmatprep.subr.bf16.mxu0 %v9075_v15  ;;  %v8146_v16 = vpack.c.bf16 %v6381_v50, %v6380_v56 }
0x1116   :  { %8129 = vmatpush3.bf16.msra.mxu0 %v8128_v58 }
0x1117   :  { %8130 = vmatprep.subr.bf16.mxu0 %v9075_v15 }
0x111a   :  { %8132 = vmatpush3.bf16.msra.mxu0 %v8131_v47 }
0x111b   :  { %8133 = vmatprep.subr.bf16.mxu0 %v9075_v15 }
0x111e   :  { %8135 = vmatpush3.bf16.msra.mxu0 %v8134_v52 }
0x111f   :  { %8136 = vmatprep.subr.bf16.mxu0 %v9075_v15 }
0x1122   :  { %8138 = vmatpush3.bf16.msra.mxu0 %v8137_v39 }
0x1123   :  { %8139 = vmatprep.subr.bf16.mxu0 %v9075_v15 }
0x1126   :  { %8141 = vmatpush3.bf16.msra.mxu0 %v8140_v59 }
0x1127   :  { %8142 = vmatprep.subr.bf16.mxu0 %v9075_v15 }
0x112a   :  { %8144 = vmatpush3.bf16.msra.mxu0 %v8143_v3 }
0x112b   :  { %8145 = vmatprep.subr.bf16.mxu0 %v9075_v15 }
0x112e   :  { %8147 = vmatpush3.bf16.msra.mxu0 %v8146_v16 }
0x11e4   :  { %v6242_v53 = vpop.f32.mrb[38].mxu0  ;;  %v6313_v2 = vpop.f32.mrb[38].mxu1 }
0x11e5   :  { %v6322_v28 = vrot.slane %v6242_v53, 2  ;;  %v6244_v33 = vpop.f32.mrb[39].mxu0  ;;  %v6315_v22 = vpop.f32.mrb[39].mxu1  ;;  %v6324_v35 = vrot.slane %v6313_v2, 2 }
0x11e6   :  { %v6323_v17 = vrot.slane %v6244_v33, 2  ;;  %v6325_v54 = vrot.slane %v6315_v22, 2 }
0x11e7   :  { %v6330_v19 = vadd.f32 %v6322_v28, %v11725_v25  ;;  %v6332_v32 = vadd.f32 %v6324_v35, %v11727_v34 }
0x11e8   :  { %v6331_v60 = vadd.f32 %v6323_v17, %v11729_v1  ;;  %v6333_v26 = vadd.f32 %v6325_v54, %v11731_v18 }
0x11e9   :  { %v6916_v8 = vmul.f32 -1.442695, %v6330_v19  ;;  %v6918_v42 = vmul.f32 -1.442695, %v6332_v32 }
0x11ea   :  { %v6917_v44 = vmul.f32 -1.442695, %v6331_v60 }
0x11eb   :  { %9034 = vpow2.f32 %v6916_v8 }
0x11ec   :  { %9036 = vpow2.f32 %v6917_v44 }
0x11ed   :  { %9038 = vtanh.f32 %v6333_v26 }
0x11ee   :  { %9040 = vpow2.f32 %v6918_v42 }
0x11f5   :  { %v9035_v43 = vpop.eup %9034 }
0x11f6   :  { %v6343_v55 = vadd.f32 1.0, %v9035_v43  ;;  %v9037_v62 = vpop.eup %9036 }
0x11f7   :  { %v6344_v25 = vadd.f32 1.0, %v9037_v62  ;;  %v9039_v1 = vpop.eup %9038 }
0x11f8   :  { %9042 = vrcp.f32 %v6343_v55  ;;  %v9041_v4 = vpop.eup %9040 }
0x11f9   :  { %9044 = vrcp.f32 %v6344_v25  ;;  %v6345_v49 = vadd.f32 1.0, %v9041_v4 }
0x11fb   :  { %9046 = vrcp.f32 %v6345_v49 }
0x1202   :  { %v9043_v31 = vpop.eup %9042 }
0x1203   :  { %v6357_v12 = vmul.f32 %v9043_v31, %v9039_v1  ;;  %v9045_v46 = vpop.eup %9044 }
0x1204   :  { %v6356_v34 = vmul.f32 %v9045_v46, %v6354_v11 }
0x1205   :  { %v9047_v18 = vpop.eup %9046 }
0x1206   :  { %v6358_v20 = vadd.f32 %v6357_v12, %v6356_v34 }
0x1208   :  { %9048 = vtanh.f32 %v6358_v20 }
0x1212   :  { %v9049_v13 = vpop.eup %9048 }
0x1213   :  { %v6360_v5 = vmul.f32 %v9049_v13, %v9047_v18 }
0x1215   :  { %v6362_v37 = vrot.slane %v6360_v5, 6 }
0x1217   :  { %v6364_v23 = vadd.f32 %v6362_v37, %v12020_v51 }
0x1219   :  { %v6365_v30 = vmul.f32 0.125, %v6364_v23 }
0x121b   :  { %6970 = vmatmul.mubr.f32.vlgmr.msra.gmra.mrb[40].mxu0 %v6365_v30 }
0x12ee   :  { %v6455_v9 = vpop.f32.mrb[40].mxu0 }
0x12ef   :  { %v6456_v63 = vadd.f32 %v6919_v36, %v6455_v9  ;;  %v6971_v6 = vpop.f32.mrb[41].mxu0 }
0x12f1   :  { %6460 = vst.msk [vmem:[#allocation2] sm:$0x3] %vm6459_vm5, %v6456_v63 }
0x12f2   :  { %9061 = shalt.err (!%p9058_p4)
}
0x12f3   :  { %s9062_s28 = scalar_lea.hbm %s12101_s9, 32 }
0x12f4   :  { %p9063_p5 = scmp.ne.s32.totalorder %s12101_s9, %s9062_s28  ;;  %p9066_p6 = scmp.lt.u32.totalorder %s9062_s28, %s12101_s9 }
0x12f6   :  { %p9068_p7 = pnand %p9066_p6, %p9063_p5 }
0x12f8   :  { %9071 = shalt.err (!%p9068_p7)
}
0x12f9   :  { %6470 = dma.vmem_to_hbm [thread:$0]  %s6468_s25, 32, %s12101_s9, [#allocation3]  }
0x12fa   :  { %9072 = dma.done.wait [#allocation3], 32  }
0x12fb   :  { %9073 = vsyncadd [#allocation3], 4294967264 }
0x12fc   :  { %6474 = vsyncpa [#allocation3], 1 }

</bundles_post_ra>
